<compile_context>
chip_gen: v7x
topology: tpu7x:2x2x1
jax: 0.10.0
libtpu: 0.0.40
codegen_flags: <defaults>
</compile_context>

<pallas_src>
import functools

import jax
import jax.numpy as jnp
from jax.experimental import pallas as pl
from jax.experimental.pallas import tpu as pltpu

LN_EPS = 1e-5  # torch.nn.LayerNorm default

# f32-accurate MXU matmul (LN statistics need full f32; the kernel is
# memory-bound, so the extra MXU passes are not on the critical path).
_dot = functools.partial(jnp.dot, preferred_element_type=jnp.float32,
                         precision=jax.lax.Precision.HIGHEST)


def _round_up(x, m):
    return ((x + m - 1) // m) * m


def _choose_pack(n_tokens, embed_dim):
    """Tokens packed per kernel row so the output width fills a 128-lane vreg."""
    target = max(1, min(4, 128 // max(embed_dim, 1)))
    for cand in (4, 2, 1):
        if cand <= target and n_tokens % cand == 0:
            return cand
    return 1


def _choose_row_tile(n_rows, max_tile=2048):
    """Row tile over the packed token matrix.

    Multiple of 8 (or the full extent).  Chosen so that:
      * per-step I/O is large enough to hide the ~0.35us fixed grid-step cost,
      * the per-step footprint (tiles + f32 temporaries) stays well below
        v7x's 64 MiB physical VMEM,
      * the grid length is even whenever there is more than one step, so the
        "parallel" axis keeps both of v7x's TensorCores busy.
    """
    if n_rows <= 8:
        return n_rows
    if n_rows <= 2 * max_tile:
        return max(8, _round_up(pl.cdiv(n_rows, 2), 8))
    steps = pl.cdiv(n_rows, max_tile)
    steps += steps % 2                       # even number of grid steps
    return max(8, _round_up(pl.cdiv(n_rows, steps), 8))


def _vmem_limit_bytes(tm, din, dout):
    """Double-buffered tiles + resident params + allowance for f32 temporaries."""
    tile_io = 4 * tm * (din + dout)
    params = 4 * (din * din + dout * dout + din * dout + 3 * dout)
    need = 2 * (tile_io + params) + 4 * tile_io + (4 << 20)
    # Cap below v7x's 64 MiB physical VMEM (leave Mosaic scratch headroom).
    return int(min(56 << 20, max(32 << 20, need)))


def _adapter_proj_kernel(x_ref, w_ref, bc_ref, g2_ref, b2_ref, m1_ref, m2_ref, o_ref):
    """Packed LN1 -> Linear -> LN2 on a (tm, pack*D) row tile.

    LN1's affine and LN2's mean-centering are folded into w_ref/bc_ref at
    wrapper time (exact).  Per-token means/variances are computed with small
    block-diagonal averaging matmuls (MXU), so everything stays lane-dense —
    no cross-lane reshapes and no masked stores.
    """
    x = x_ref[...].astype(jnp.float32)               # (tm, P*D)
    m1 = m1_ref[...]

    # LayerNorm(patch_dim): per 64-lane segment (= per original token).
    mu = _dot(x, m1)                                 # segment mean, broadcast
    xc = x - mu
    var = _dot(xc * xc, m1)                          # biased variance (torch)
    xn = xc * jax.lax.rsqrt(var + LN_EPS)

    # Linear + LN2 mean-centering (both folded into w_ref / bc_ref):
    # yc == y - mean_E(y) exactly.
    yc = _dot(xn, w_ref[...]) + bc_ref[...]          # (tm, P*E), lane-dense

    # LayerNorm(embed_dim): only the variance reduction remains.
    var2 = _dot(yc * yc, m2_ref[...])
    o_ref[...] = (yc * jax.lax.rsqrt(var2 + LN_EPS) * g2_ref[...]
                  + b2_ref[...]).astype(o_ref.dtype)


def adapter_proj(tokens_packed, w_big, bc_big, g2_big, b2_big, m1, m2,
                 *, max_row_tile=2048):
    """tokens_packed: (R, pack*D) -> (R, pack*E), one fused tiled Pallas kernel."""
    r, din = tokens_packed.shape
    dout = w_big.shape[1]

    tm = _choose_row_tile(r, max_row_tile)
    # No jnp.pad: a trailing partial block (if any) reads undefined rows and its
    # out-of-bounds output rows are masked on write.  Every row is independent
    # through both LayerNorms, so garbage rows never affect valid outputs.
    grid = (pl.cdiv(r, tm),)

    row_in = pl.BlockSpec((tm, din), lambda i: (i, 0))
    row_out = pl.BlockSpec((tm, dout), lambda i: (i, 0))
    # Constant block index keeps params VMEM-resident across all row tiles:
    # only the token tiles (in) and embedding tiles (out) stream through HBM.
    const = lambda shape: pl.BlockSpec(shape, lambda i: (0, 0))

    return pl.pallas_call(
        _adapter_proj_kernel,
        out_shape=jax.ShapeDtypeStruct((r, dout), tokens_packed.dtype),
        grid_spec=pltpu.PrefetchScalarGridSpec(
            num_scalar_prefetch=0,
            grid=grid,
            in_specs=[
                row_in,                   # packed token tile        (streamed)
                const(w_big.shape),       # block-diag fused weight  (resident)
                const(bc_big.shape),      # centered fused bias      (resident)
                const(g2_big.shape),      # LN2 gamma (tiled)        (resident)
                const(b2_big.shape),      # LN2 beta  (tiled)        (resident)
                const(m1.shape),          # LN1 segment averager     (resident)
                const(m2.shape),          # LN2 segment averager     (resident)
            ],
            out_specs=row_out,
        ),
        compiler_params=pltpu.CompilerParams(
            dimension_semantics=("parallel",),
            vmem_limit_bytes=_vmem_limit_bytes(tm, din, dout),
            # Allow XLA to fuse the wrapper-side patchify transpose into the
            # token operand instead of materializing it in HBM first.
            allow_input_fusion=[True] + [False] * 6,
        ),
    )(tokens_packed, w_big, bc_big, g2_big, b2_big, m1, m2)


def image_adapter_forward(x_nchw, params, *, num_channels, patch_size, embed_dim):
    """Full ImageAdapter.forward. x_nchw: (B, C, H, W)."""
    assert x_nchw.ndim == 4
    b, c, h_img, w_img = x_nchw.shape
    assert c == num_channels

    p = patch_size
    h, w = h_img // p, w_img // p
    d = p * p * c
    e = embed_dim
    n = b * h * w

    # channel_first=True: 'b c h w -> b h w c' followed by the patchify
    # 'b (h p1) (w p2) c -> b h w (p1 p2 c)', done as a SINGLE transpose.
    # TODO(synk): a fully in-kernel patchify (strided band DMA from NCHW) would
    # avoid this pass entirely but needs sub-(8,128) blocks; allow_input_fusion
    # gives XLA the chance to fuse it into the kernel input instead.
    tokens = jnp.transpose(x_nchw.reshape(b, c, h, p, w, p),
                           (0, 2, 4, 3, 5, 1)).reshape(n, d)

    # pos_encoding is None in this instantiation.
    # TODO(synk): a pos_encoding would concatenate extra features here pre-proj.

    pack = _choose_pack(n, e)

    # --- Exact parameter folding (done once, outside the kernel) ---
    # LN1 affine into the linear:
    #   (xn*g1 + b1) @ W + b  ==  xn @ (g1[:,None]*W) + (b1@W + b)
    # NOTE: params['w'] is (in, out) = (patch_dim, embed_dim); a torch nn.Linear
    # checkpoint stores (out, in) and must be transposed when loading.
    w_f = params["w"] * params["ln1_g"].reshape(-1, 1)            # (D, E)
    b_f = params["b"] + params["ln1_b"] @ params["w"]             # (1, E)
    # LN2 mean-centering into the linear:
    #   y - mean_E(y)  ==  xn @ (W - colmean(W)) + (b - mean(b))
    w_c = w_f - jnp.mean(w_f, axis=1, keepdims=True)
    b_c = b_f - jnp.mean(b_f)

    # Lane-dense packing: `pack` tokens per kernel row (free row-major reshape),
    # block-diagonal weight, tiled vectors, block-diag segment-averaging mats.
    eye = jnp.eye(pack, dtype=jnp.float32)
    w_big = jnp.kron(eye, w_c)                                    # (P*D, P*E)
    m1 = jnp.kron(eye, jnp.full((d, d), 1.0 / d, jnp.float32))    # LN1 averager
    m2 = jnp.kron(eye, jnp.full((e, e), 1.0 / e, jnp.float32))    # LN2 averager
    bc_big = jnp.tile(b_c, (1, pack))
    g2_big = jnp.tile(params["ln2_g"], (1, pack))
    b2_big = jnp.tile(params["ln2_b"], (1, pack))

    tokens_p = tokens.reshape(n // pack, pack * d)                # free reshape

    out_p = adapter_proj(tokens_p, w_big, bc_big, g2_big, b2_big, m1, m2)

    # unpack + 'b h w c -> b (h w) c' (free row-major reshape)
    return out_p.reshape(b, h * w, e)


def init_params(key, patch_dim, embed_dim):
    """Deterministic parameter init matching module shapes (no checkpoint load)."""
    k_w, k_b = jax.random.split(key)
    bound = 1.0 / jnp.sqrt(patch_dim)
    w = jax.random.uniform(k_w, (patch_dim, embed_dim), jnp.float32, -bound, bound)
    b = jax.random.uniform(k_b, (1, embed_dim), jnp.float32, -bound, bound)
    return {
        "ln1_g": jnp.ones((1, patch_dim), jnp.float32),
        "ln1_b": jnp.zeros((1, patch_dim), jnp.float32),
        "w": w,
        "b": b,
        "ln2_g": jnp.ones((1, embed_dim), jnp.float32),
        "ln2_b": jnp.zeros((1, embed_dim), jnp.float32),
    }


def _reference_forward(x_nchw, params, *, num_channels, patch_size, embed_dim):
    """Pure-JAX reference (unfused, torch.nn semantics) for sanity checking."""
    b, c, h_img, w_img = x_nchw.shape
    x = jnp.transpose(x_nchw, (0, 2, 3, 1))
    p = patch_size
    h, w = h_img // p, w_img // p
    x = x.reshape(b, h, p, w, p, c).transpose(0, 1, 3, 2, 4, 5).reshape(b, h, w, p * p * c)
    mu = x.mean(-1, keepdims=True)
    var = ((x - mu) ** 2).mean(-1, keepdims=True)
    xn = (x - mu) * jax.lax.rsqrt(var + LN_EPS) * params["ln1_g"][0] + params["ln1_b"][0]
    y = jnp.dot(xn, params["w"], precision=jax.lax.Precision.HIGHEST) + params["b"][0]
    mu2 = y.mean(-1, keepdims=True)
    var2 = ((y - mu2) ** 2).mean(-1, keepdims=True)
    yn = (y - mu2) * jax.lax.rsqrt(var2 + LN_EPS) * params["ln2_g"][0] + params["ln2_b"][0]
    return yn.reshape(b, h * w, embed_dim)


if __name__ == "__main__":
    B, C, H, W = 2, 4, 16, 16
    PATCH = 4
    EMBED = 32
    PATCH_DIM = PATCH * PATCH * C  # 64

    key = jax.random.PRNGKey(0)
    k_x, k_p = jax.random.split(key)
    x = jax.random.normal(k_x, (B, C, H, W), jnp.float32)
    params = init_params(k_p, PATCH_DIM, EMBED)

    fwd = jax.jit(functools.partial(image_adapter_forward, num_channels=C,
                                    patch_size=PATCH, embed_dim=EMBED))
    out = fwd(x, params)
    out = jax.block_until_ready(out)

    ref = _reference_forward(x, params, num_channels=C, patch_size=PATCH, embed_dim=EMBED)
    assert out.shape == (B, (H // PATCH) * (W // PATCH), EMBED)
    assert jnp.allclose(out, ref, atol=1e-4, rtol=1e-4)

    print("KERNEL_OK")
</pallas_src>

<mosaic_0001>
module attributes {stable_mosaic.version = 11 : i64} {
  func.func @_adapter_proj_kernel(%arg0: i32, %arg1: memref<8x256xf32, #tpu.memory_space<vmem>>, %arg2: memref<256x128xf32, #tpu.memory_space<vmem>>, %arg3: memref<1x128xf32, #tpu.memory_space<vmem>>, %arg4: memref<1x128xf32, #tpu.memory_space<vmem>>, %arg5: memref<1x128xf32, #tpu.memory_space<vmem>>, %arg6: memref<256x256xf32, #tpu.memory_space<vmem>>, %arg7: memref<128x128xf32, #tpu.memory_space<vmem>>, %arg8: memref<8x128xf32, #tpu.memory_space<vmem>>) attributes {dimension_semantics = [#tpu.dimension_semantics<parallel>], iteration_bounds = array<i64: 1>, scalar_prefetch = 0 : i64, scratch_operands = 0 : i64, tpu.core_type = #tpu.core_type<tc>, window_params = [{transform_indices = @transform_0, window_bounds = array<i64: 8, 256>}, {pipeline_mode = #tpu.pipeline_mode<synchronous>, transform_indices = @transform_1, window_bounds = array<i64: 256, 128>}, {pipeline_mode = #tpu.pipeline_mode<synchronous>, transform_indices = @transform_2, window_bounds = array<i64: 1, 128>}, {pipeline_mode = #tpu.pipeline_mode<synchronous>, transform_indices = @transform_3, window_bounds = array<i64: 1, 128>}, {pipeline_mode = #tpu.pipeline_mode<synchronous>, transform_indices = @transform_4, window_bounds = array<i64: 1, 128>}, {pipeline_mode = #tpu.pipeline_mode<synchronous>, transform_indices = @transform_5, window_bounds = array<i64: 256, 256>}, {pipeline_mode = #tpu.pipeline_mode<synchronous>, transform_indices = @transform_6, window_bounds = array<i64: 128, 128>}, {transform_indices = @transform_7, window_bounds = array<i64: 8, 128>}]} {
    %c0 = arith.constant 0 : index
    %c0_0 = arith.constant 0 : index
    %0 = vector.load %arg1[%c0, %c0_0] : memref<8x256xf32, #tpu.memory_space<vmem>>, vector<8x256xf32>
    %c0_1 = arith.constant 0 : index
    %c0_2 = arith.constant 0 : index
    %1 = vector.load %arg6[%c0_1, %c0_2] : memref<256x256xf32, #tpu.memory_space<vmem>>, vector<256x256xf32>
    %cst = arith.constant dense<0.000000e+00> : vector<8x256xf32>
    %2 = tpu.matmul %0, %1, %cst {dimension_numbers = #tpu.dot_dimension_numbers<[1], [0], [0], [1], [0, 0, 1, 1], [], []>, precision = #tpu.contract_precision<fp32>} : vector<8x256xf32>, vector<256x256xf32>, vector<8x256xf32> -> vector<8x256xf32>
    %3 = arith.subf %0, %2 : vector<8x256xf32>
    %4 = arith.mulf %3, %3 : vector<8x256xf32>
    %cst_3 = arith.constant dense<0.000000e+00> : vector<8x256xf32>
    %5 = tpu.matmul %4, %1, %cst_3 {dimension_numbers = #tpu.dot_dimension_numbers<[1], [0], [0], [1], [0, 0, 1, 1], [], []>, precision = #tpu.contract_precision<fp32>} : vector<8x256xf32>, vector<256x256xf32>, vector<8x256xf32> -> vector<8x256xf32>
    %cst_4 = arith.constant 9.99999974E-6 : f32
    %6 = vector.broadcast %cst_4 : f32 to vector<8x256xf32>
    %7 = arith.addf %5, %6 : vector<8x256xf32>
    %8 = math.rsqrt %7 : vector<8x256xf32>
    %9 = arith.mulf %3, %8 : vector<8x256xf32>
    %c0_5 = arith.constant 0 : index
    %c0_6 = arith.constant 0 : index
    %10 = vector.load %arg2[%c0_5, %c0_6] : memref<256x128xf32, #tpu.memory_space<vmem>>, vector<256x128xf32>
    %cst_7 = arith.constant dense<0.000000e+00> : vector<8x128xf32>
    %11 = tpu.matmul %9, %10, %cst_7 {dimension_numbers = #tpu.dot_dimension_numbers<[1], [0], [0], [1], [0, 0, 1, 1], [], []>, precision = #tpu.contract_precision<fp32>} : vector<8x256xf32>, vector<256x128xf32>, vector<8x128xf32> -> vector<8x128xf32>
    %c0_8 = arith.constant 0 : index
    %c0_9 = arith.constant 0 : index
    %12 = vector.load %arg3[%c0_8, %c0_9] : memref<1x128xf32, #tpu.memory_space<vmem>>, vector<1x128xf32>
    %13 = vector.broadcast %12 : vector<1x128xf32> to vector<8x128xf32>
    %14 = arith.addf %11, %13 : vector<8x128xf32>
    %15 = arith.mulf %14, %14 : vector<8x128xf32>
    %c0_10 = arith.constant 0 : index
    %c0_11 = arith.constant 0 : index
    %16 = vector.load %arg7[%c0_10, %c0_11] : memref<128x128xf32, #tpu.memory_space<vmem>>, vector<128x128xf32>
    %cst_12 = arith.constant dense<0.000000e+00> : vector<8x128xf32>
    %17 = tpu.matmul %15, %16, %cst_12 {dimension_numbers = #tpu.dot_dimension_numbers<[1], [0], [0], [1], [0, 0, 1, 1], [], []>, precision = #tpu.contract_precision<fp32>} : vector<8x128xf32>, vector<128x128xf32>, vector<8x128xf32> -> vector<8x128xf32>
    %cst_13 = arith.constant 9.99999974E-6 : f32
    %18 = vector.broadcast %cst_13 : f32 to vector<8x128xf32>
    %19 = arith.addf %17, %18 : vector<8x128xf32>
    %20 = math.rsqrt %19 : vector<8x128xf32>
    %21 = arith.mulf %14, %20 : vector<8x128xf32>
    %c0_14 = arith.constant 0 : index
    %c0_15 = arith.constant 0 : index
    %22 = vector.load %arg4[%c0_14, %c0_15] : memref<1x128xf32, #tpu.memory_space<vmem>>, vector<1x128xf32>
    %23 = vector.broadcast %22 : vector<1x128xf32> to vector<8x128xf32>
    %24 = arith.mulf %21, %23 : vector<8x128xf32>
    %c0_16 = arith.constant 0 : index
    %c0_17 = arith.constant 0 : index
    %25 = vector.load %arg5[%c0_16, %c0_17] : memref<1x128xf32, #tpu.memory_space<vmem>>, vector<1x128xf32>
    %26 = vector.broadcast %25 : vector<1x128xf32> to vector<8x128xf32>
    %27 = arith.addf %24, %26 : vector<8x128xf32>
    %c0_18 = arith.constant 0 : index
    %c0_19 = arith.constant 0 : index
    %28 = vector.load %arg8[%c0_18, %c0_19] : memref<8x128xf32, #tpu.memory_space<vmem>>, vector<8x128xf32>
    tpu.vector_store %arg8[%c0_18, %c0_19], %27 {strides = array<i32>} : memref<8x128xf32, #tpu.memory_space<vmem>>, vector<8x128xf32>,
    return
  }
  func.func @transform_0(%arg0: i32) -> (i32, i32) {
    %c0_i32 = arith.constant 0 : i32
    %c0_i32_0 = arith.constant 0 : i32
    return %arg0, %c0_i32 : i32, i32
  }
  func.func @transform_1(%arg0: i32) -> (i32, i32) {
    %c0_i32 = arith.constant 0 : i32
    %c0_i32_0 = arith.constant 0 : i32
    %c0_i32_1 = arith.constant 0 : i32
    return %c0_i32, %c0_i32_0 : i32, i32
  }
  func.func @transform_2(%arg0: i32) -> (i32, i32) {
    %c0_i32 = arith.constant 0 : i32
    %c0_i32_0 = arith.constant 0 : i32
    %c0_i32_1 = arith.constant 0 : i32
    return %c0_i32, %c0_i32_0 : i32, i32
  }
  func.func @transform_3(%arg0: i32) -> (i32, i32) {
    %c0_i32 = arith.constant 0 : i32
    %c0_i32_0 = arith.constant 0 : i32
    %c0_i32_1 = arith.constant 0 : i32
    return %c0_i32, %c0_i32_0 : i32, i32
  }
  func.func @transform_4(%arg0: i32) -> (i32, i32) {
    %c0_i32 = arith.constant 0 : i32
    %c0_i32_0 = arith.constant 0 : i32
    %c0_i32_1 = arith.constant 0 : i32
    return %c0_i32, %c0_i32_0 : i32, i32
  }
  func.func @transform_5(%arg0: i32) -> (i32, i32) {
    %c0_i32 = arith.constant 0 : i32
    %c0_i32_0 = arith.constant 0 : i32
    %c0_i32_1 = arith.constant 0 : i32
    return %c0_i32, %c0_i32_0 : i32, i32
  }
  func.func @transform_6(%arg0: i32) -> (i32, i32) {
    %c0_i32 = arith.constant 0 : i32
    %c0_i32_0 = arith.constant 0 : i32
    %c0_i32_1 = arith.constant 0 : i32
    return %c0_i32, %c0_i32_0 : i32, i32
  }
  func.func @transform_7(%arg0: i32) -> (i32, i32) {
    %c0_i32 = arith.constant 0 : i32
    %c0_i32_0 = arith.constant 0 : i32
    return %arg0, %c0_i32 : i32, i32
  }
}

</mosaic_0001>

<bundles_post_ra>
// kernel: image_adapter_forward.1
= control target key start
LH: loop header
LB: loop body
LE: loop exit
PB: predicated region body
PF: predicated region fallthrough
CT: control target
= control target key end

     0   :  { %vm5922_vm0 = vmmov 0   ;;  %s8249_s5 = inlined_call_operand.vmem [shape: f32[256,256], index: 5, kind: input, shape index: {}]   ;;  %s8250_s0 = inlined_call_operand.vmem [shape: f32[8,256], index: 0, kind: input, shape index: {}]   ;;  %s8251_s1 = inlined_call_operand.vmem [shape: f32[256,128], index: 1, kind: input, shape index: {}]   ;;  %s8252_s6 = inlined_call_operand.vmem [shape: f32[128,128], index: 6, kind: input, shape index: {}]   ;;  %s8253_s2 = inlined_call_operand.vmem [shape: f32[1,128], index: 2, kind: input, shape index: {}]   ;;  %s8254_s3 = inlined_call_operand.vmem [shape: f32[1,128], index: 3, kind: input, shape index: {}]   ;;  %s8255_s4 = inlined_call_operand.vmem [shape: f32[1,128], index: 4, kind: input, shape index: {}]   ;;  %s8256_s7 = inlined_call_operand.vmem [shape: f32[8,128], index: 7, kind: output, shape index: {}]  }
   0x1   :  { %v29_v0 = vld [vmem:[%s8249_s5 + $0x8] sm:$0xff]  ;;  %v31_v1 = vld [vmem:[%s8249_s5 + $0x18] sm:$0xff]  ;;  %v28_v2 = vld [vmem:[%s8249_s5] sm:$0xff] }
   0x2   :  { %v92_v3 = vand.u32 4294901760, %v29_v0  ;;  %v96_v4 = vand.u32 4294901760, %v31_v1  ;;  %v30_v5 = vld [vmem:[%s8249_s5 + $0x10] sm:$0xff]  ;;  %v94_v6 = vand.u32 4294901760, %v28_v2  ;;  %v33_v7 = vld [vmem:[%s8249_s5 + $0x28] sm:$0xff]  ;;  %v35_v8 = vld [vmem:[%s8249_s5 + $0x38] sm:$0xff] }
   0x3   :  { %v98_v9 = vand.u32 4294901760, %v30_v5  ;;  %v100_v10 = vand.u32 4294901760, %v33_v7  ;;  %v104_v11 = vand.u32 4294901760, %v35_v8  ;;  %v32_v16 = vld [vmem:[%s8249_s5 + $0x20] sm:$0xff]  ;;  %v34_v17 = vld [vmem:[%s8249_s5 + $0x30] sm:$0xff]  ;;  %v37_v38 = vld [vmem:[%s8249_s5 + $0x48] sm:$0xff] }
   0x4   :  { %v5982_v12 = vpack.c.bf16 %v96_v4, %v92_v3  ;;  %v5984_v13 = vsub.f32 %v29_v0, %v92_v3  ;;  %v5986_v14 = vsub.f32 %v31_v1, %v96_v4  ;;  %v5988_v15 = vsub.f32 %v28_v2, %v94_v6  ;;  %v39_v39 = vld [vmem:[%s8249_s5 + $0x58] sm:$0xff]  ;;  %v36_v44 = vld [vmem:[%s8249_s5 + $0x40] sm:$0xff]  ;;  %v38_v53 = vld [vmem:[%s8249_s5 + $0x50] sm:$0xff] }
   0x5   :  { %v5996_v18 = vpack.c.bf16 %v98_v9, %v94_v6  ;;  %v5998_v19 = vsub.f32 %v30_v5, %v98_v9  ;;  %v6000_v20 = vpack.c.bf16 %v104_v11, %v100_v10  ;;  %v6002_v21 = vsub.f32 %v33_v7, %v100_v10  ;;  %v41_v58 = vld [vmem:[%s8249_s5 + $0x68] sm:$0xff]  ;;  %v43_v59 = vld [vmem:[%s8249_s5 + $0x78] sm:$0xff] }
   0x6   :  { %8575 = vst [vmem:[#allocation2_spill] sm:$0xff] %v5982_v12  ;;  %v8278_v22 = vand.u32 4294901760, %v5984_v13  ;;  %v8277_v23 = vand.u32 4294901760, %v5986_v14  ;;  %v8275_v24 = vand.u32 4294901760, %v5988_v15  ;;  %v6007_v25 = vsub.f32 %v35_v8, %v104_v11  ;;  %4776 = vmatprep.subr.bf16.mxu1 %v5982_v12 }
   0x7   :  { %8576 = vst [vmem:[#allocation3_spill] sm:$0xff] %v5996_v18  ;;  %8577 = vst [vmem:[#allocation4_spill] sm:$0xff] %v6000_v20  ;;  %v8274_v26 = vand.u32 4294901760, %v5998_v19  ;;  %v8272_v27 = vand.u32 4294901760, %v6002_v21  ;;  %v102_v28 = vand.u32 4294901760, %v32_v16  ;;  %v106_v29 = vand.u32 4294901760, %v34_v17  ;;  %4778 = vmatpush1.bf16.msra.mxu1 %v5996_v18 }
   0x8   :  { %v240_v30 = vsub.f32 %v5984_v13, %v8278_v22  ;;  %v252_v31 = vsub.f32 %v5986_v14, %v8277_v23  ;;  %v246_v32 = vsub.f32 %v5988_v15, %v8275_v24  ;;  %v8271_v33 = vand.u32 4294901760, %v6007_v25  ;;  %4780 = vmatprep.subr.bf16.mxu1 %v6000_v20 }
   0x9   :  { %v258_v34 = vsub.f32 %v5998_v19, %v8274_v26  ;;  %v264_v35 = vsub.f32 %v6002_v21, %v8272_v27  ;;  %v6030_v36 = vpack.c.bf16 %v106_v29, %v102_v28  ;;  %v6032_v37 = vsub.f32 %v32_v16, %v102_v28  ;;  %v40_v16 = vld [vmem:[%s8249_s5 + $0x60] sm:$0xff] }
   0xa   :  { %v241_v40 = vand.u32 4294901760, %v240_v30  ;;  %v253_v41 = vand.u32 4294901760, %v252_v31  ;;  %v247_v42 = vand.u32 4294901760, %v246_v32  ;;  %v276_v43 = vsub.f32 %v6007_v25, %v8271_v33  ;;  %v42_v31 = vld [vmem:[%s8249_s5 + $0x70] sm:$0xff] }
   0xb   :  { %8578 = vst [vmem:[#allocation5_spill] sm:$0xff] %v6030_v36  ;;  %8579 = vst [vmem:[#allocation6_spill] sm:$0xff] %v6032_v37  ;;  %v259_v45 = vand.u32 4294901760, %v258_v34  ;;  %v265_v46 = vand.u32 4294901760, %v264_v35  ;;  %v8269_v47 = vand.u32 4294901760, %v6032_v37  ;;  %v6047_v48 = vsub.f32 %v34_v17, %v106_v29  ;;  %4782 = vmatpush1.bf16.msra.mxu1 %v6030_v36 }
   0xc   :  { %v6050_v49 = vpack.c.bf16 %v253_v41, %v241_v40  ;;  %v277_v50 = vand.u32 4294901760, %v276_v43  ;;  %v108_v51 = vand.u32 4294901760, %v37_v38  ;;  %v112_v52 = vand.u32 4294901760, %v39_v39 }
   0xd   :  { %8580 = vst [vmem:[#allocation7_spill] sm:$0xff] %v6047_v48  ;;  %v6055_v54 = vpack.c.bf16 %v259_v45, %v247_v42  ;;  %v270_v55 = vsub.f32 %v6032_v37, %v8269_v47  ;;  %v8268_v56 = vand.u32 4294901760, %v6047_v48  ;;  %v110_v57 = vand.u32 4294901760, %v36_v44 }
   0xe   :  { %8581 = vst [vmem:[#allocation8_spill] sm:$0xff] %v6050_v49  ;;  %4840 = vmatprep.subr.bf16.mxu0 %v6050_v49  ;;  %v6068_v60 = vpack.c.bf16 %v277_v50, %v265_v46  ;;  %v6070_v61 = vpack.c.bf16 %v112_v52, %v108_v51  ;;  %v6072_v62 = vsub.f32 %v37_v38, %v108_v51  ;;  %v114_v2 = vand.u32 4294901760, %v38_v53  ;;  %v47_v51 = vld [vmem:[%s8249_s5 + $0x98] sm:$0xff] }
   0xf   :  { %8582 = vst [vmem:[#allocation9_spill] sm:$0xff] %v6055_v54  ;;  %v6074_v63 = vsub.f32 %v39_v39, %v112_v52  ;;  %4842 = vmatpush1.bf16.msra.mxu0 %v6055_v54  ;;  %v271_v0 = vand.u32 4294901760, %v270_v55  ;;  %v282_v1 = vsub.f32 %v6047_v48, %v8268_v56  ;;  %v6080_v3 = vsub.f32 %v36_v44, %v110_v57  ;;  %v45_v39 = vld [vmem:[%s8249_s5 + $0x88] sm:$0xff] }
  0x10   :  { %8583 = vst [vmem:[#allocation10_spill] sm:$0xff] %v6068_v60  ;;  %8584 = vst [vmem:[#allocation11_spill] sm:$0xff] %v6070_v61  ;;  %4844 = vmatprep.subr.bf16.mxu0 %v6068_v60  ;;  %v8265_v4 = vand.u32 4294901760, %v6072_v62  ;;  %v116_v6 = vand.u32 4294901760, %v41_v58  ;;  %v120_v7 = vand.u32 4294901760, %v43_v59  ;;  %4784 = vmatprep.subr.bf16.mxu1 %v6070_v61  ;;  %v6086_v9 = vpack.c.bf16 %v114_v2, %v110_v57 }
  0x11   :  { %8585 = vst [vmem:[#allocation12_spill] sm:$0xff] %v6072_v62  ;;  %8586 = vst [vmem:[#allocation13_spill] sm:$0xff] %v6074_v63  ;;  %v8264_v5 = vand.u32 4294901760, %v6074_v63  ;;  %v283_v8 = vand.u32 4294901760, %v282_v1  ;;  %v8263_v10 = vand.u32 4294901760, %v6080_v3  ;;  %v6089_v11 = vsub.f32 %v38_v53, %v114_v2 }
  0x12   :  { %8587 = vst [vmem:[#allocation14_spill] sm:$0xff] %v6080_v3  ;;  %8588 = vst [vmem:[#allocation15_spill] sm:$0xff] %v6086_v9  ;;  %v288_v17 = vsub.f32 %v6072_v62, %v8265_v4  ;;  %v6100_v29 = vpack.c.bf16 %v120_v7, %v116_v6  ;;  %v6102_v30 = vsub.f32 %v41_v58, %v116_v6  ;;  %4786 = vmatpush1.bf16.msra.mxu1 %v6086_v9  ;;  %v44_v58 = vld [vmem:[%s8249_s5 + $0x80] sm:$0xff] }
  0x13   :  { %8589 = vst [vmem:[#allocation16_spill] sm:$0xff] %v6089_v11  ;;  %v300_v28 = vsub.f32 %v6074_v63, %v8264_v5  ;;  %v6107_v32 = vpack.c.bf16 %v283_v8, %v271_v0  ;;  %v294_v34 = vsub.f32 %v6080_v3, %v8263_v10  ;;  %v8262_v35 = vand.u32 4294901760, %v6089_v11  ;;  %v50_v5 = vld [vmem:[%s8249_s5 + $0xb0] sm:$0xff] }
  0x14   :  { %8590 = vst [vmem:[#allocation17_spill] sm:$0xff] %v6100_v29  ;;  %8591 = vst [vmem:[#allocation18_spill] sm:$0xff] %v6102_v30  ;;  %v6113_v38 = vsub.f32 %v43_v59, %v120_v7  ;;  %v289_v40 = vand.u32 4294901760, %v288_v17  ;;  %v8260_v42 = vand.u32 4294901760, %v6102_v30  ;;  %v118_v43 = vand.u32 4294901760, %v40_v16  ;;  %4788 = vmatprep.subr.bf16.mxu1 %v6100_v29  ;;  %v46_v17 = vld [vmem:[%s8249_s5 + $0x90] sm:$0xff] }
  0x15   :  { %8592 = vst [vmem:[#allocation19_spill] sm:$0xff] %v6107_v32  ;;  %v301_v41 = vand.u32 4294901760, %v300_v28  ;;  %4846 = vmatpush1.bf16.msra.mxu0 %v6107_v32  ;;  %v295_v44 = vand.u32 4294901760, %v294_v34  ;;  %v306_v45 = vsub.f32 %v6089_v11, %v8262_v35  ;;  %v122_v50 = vand.u32 4294901760, %v42_v31 }
  0x16   :  { %8593 = vst [vmem:[#allocation20_spill] sm:$0xff] %v6113_v38  ;;  %v8259_v46 = vand.u32 4294901760, %v6113_v38  ;;  %v312_v53 = vsub.f32 %v6102_v30, %v8260_v42  ;;  %v6134_v55 = vsub.f32 %v40_v16, %v118_v43  ;;  %v124_v57 = vand.u32 4294901760, %v45_v39 }
  0x17   :  { %v6129_v52 = vpack.c.bf16 %v301_v41, %v289_v40  ;;  %v307_v59 = vand.u32 4294901760, %v306_v45  ;;  %v6142_v1 = vpack.c.bf16 %v122_v50, %v118_v43  ;;  %v6144_v2 = vsub.f32 %v42_v31, %v122_v50  ;;  %v49_v31 = vld [vmem:[%s8249_s5 + $0xa8] sm:$0xff] }
  0x18   :  { %8595 = vst [vmem:[#allocation22_spill] sm:$0xff] %v6134_v55  ;;  %v324_v0 = vsub.f32 %v6113_v38, %v8259_v46  ;;  %v313_v6 = vand.u32 4294901760, %v312_v53  ;;  %v8257_v7 = vand.u32 4294901760, %v6134_v55  ;;  %v128_v8 = vand.u32 4294901760, %v47_v51 }
  0x19   :  { %8594 = vst [vmem:[#allocation21_spill] sm:$0xff] %v6129_v52  ;;  %8596 = vst [vmem:[#allocation23_spill] sm:$0xff] %v6142_v1  ;;  %4848 = vmatprep.subr.bf16.mxu0 %v6129_v52  ;;  %v6148_v16 = vsub.f32 %v45_v39, %v124_v57  ;;  %v6153_v28 = vpack.c.bf16 %v307_v59, %v295_v44  ;;  %v8258_v40 = vand.u32 4294901760, %v6144_v2  ;;  %v126_v41 = vand.u32 4294901760, %v44_v58 }
  0x1a   :  { %8597 = vst [vmem:[#allocation24_spill] sm:$0xff] %v6144_v2  ;;  %v325_v34 = vand.u32 4294901760, %v324_v0  ;;  %4790 = vmatpush1.bf16.msra.mxu1 %v6142_v1  ;;  %v318_v39 = vsub.f32 %v6134_v55, %v8257_v7  ;;  %v6163_v43 = vpack.c.bf16 %v128_v8, %v124_v57  ;;  %v6166_v44 = vsub.f32 %v47_v51, %v128_v8  ;;  %v51_v57 = vld [vmem:[%s8249_s5 + $0xb8] sm:$0xff] }
  0x1b   :  { %8598 = vst [vmem:[#allocation25_spill] sm:$0xff] %v6148_v16  ;;  %8599 = vst [vmem:[#allocation26_spill] sm:$0xff] %v6153_v28  ;;  %v8261_v45 = vand.u32 4294901760, %v6148_v16  ;;  %4850 = vmatpush1.bf16.msra.mxu0 %v6153_v28  ;;  %v330_v53 = vsub.f32 %v6144_v2, %v8258_v40  ;;  %v130_v59 = vand.u32 4294901760, %v46_v17  ;;  %v6174_v0 = vsub.f32 %v44_v58, %v126_v41 }
  0x1c   :  { %8600 = vst [vmem:[#allocation27_spill] sm:$0xff] %v6163_v43  ;;  %8601 = vst [vmem:[#allocation28_spill] sm:$0xff] %v6166_v44  ;;  %v6169_v50 = vpack.c.bf16 %v325_v34, %v313_v6  ;;  %v319_v7 = vand.u32 4294901760, %v318_v39  ;;  %v8266_v8 = vand.u32 4294901760, %v6166_v44  ;;  %v132_v6 = vand.u32 4294901760, %v49_v31  ;;  %v48_v34 = vld [vmem:[%s8249_s5 + $0xa0] sm:$0xff]  ;;  %4792 = vmatprep.subr.bf16.mxu1 %v6163_v43 }
  0x1d   :  { %8603 = vst [vmem:[#allocation30_spill] sm:$0xff] %v6174_v0  ;;  %v336_v51 = vsub.f32 %v6148_v16, %v8261_v45  ;;  %v331_v58 = vand.u32 4294901760, %v330_v53  ;;  %v6188_v40 = vpack.c.bf16 %v130_v59, %v126_v41  ;;  %v8267_v39 = vand.u32 4294901760, %v6174_v0 }
  0x1e   :  { %8602 = vst [vmem:[#allocation29_spill] sm:$0xff] %v6169_v50  ;;  %4852 = vmatprep.subr.bf16.mxu0 %v6169_v50  ;;  %v6191_v46 = vsub.f32 %v46_v17, %v130_v59  ;;  %v348_v45 = vsub.f32 %v6166_v44, %v8266_v8  ;;  %v136_v35 = vand.u32 4294901760, %v51_v57  ;;  %v6196_v10 = vsub.f32 %v49_v31, %v132_v6  ;;  %v53_v59 = vld [vmem:[%s8249_s5 + $0xc8] sm:$0xff] }
  0x1f   :  { %8604 = vst [vmem:[#allocation31_spill] sm:$0xff] %v6188_v40  ;;  %v337_v42 = vand.u32 4294901760, %v336_v51  ;;  %v6201_v4 = vpack.c.bf16 %v331_v58, %v319_v7  ;;  %v342_v41 = vsub.f32 %v6174_v0, %v8267_v39  ;;  %v134_v53 = vand.u32 4294901760, %v48_v34  ;;  %4794 = vmatpush1.bf16.msra.mxu1 %v6188_v40 }
  0x20   :  { %8605 = vst [vmem:[#allocation32_spill] sm:$0xff] %v6191_v46  ;;  %8606 = vst [vmem:[#allocation33_spill] sm:$0xff] %v6196_v10  ;;  %v8270_v17 = vand.u32 4294901760, %v6191_v46  ;;  %v349_v31 = vand.u32 4294901760, %v348_v45  ;;  %v6211_v51 = vpack.c.bf16 %v136_v35, %v132_v6  ;;  %v8273_v8 = vand.u32 4294901760, %v6196_v10  ;;  %v55_v45 = vld [vmem:[%s8249_s5 + $0xd8] sm:$0xff] }
  0x21   :  { %8607 = vst [vmem:[#allocation34_spill] sm:$0xff] %v6201_v4  ;;  %v6214_v7 = vsub.f32 %v51_v57, %v136_v35  ;;  %4854 = vmatpush1.bf16.msra.mxu0 %v6201_v4  ;;  %v343_v58 = vand.u32 4294901760, %v342_v41  ;;  %v138_v56 = vand.u32 4294901760, %v50_v5  ;;  %v6220_v47 = vsub.f32 %v48_v34, %v134_v53 }
  0x22   :  { %8608 = vst [vmem:[#allocation35_spill] sm:$0xff] %v6211_v51  ;;  %v354_v39 = vsub.f32 %v6191_v46, %v8270_v17  ;;  %v6225_v6 = vpack.c.bf16 %v349_v31, %v337_v42  ;;  %v360_v35 = vsub.f32 %v6196_v10, %v8273_v8  ;;  %v140_v41 = vand.u32 4294901760, %v53_v59  ;;  %v52_v17 = vld [vmem:[%s8249_s5 + $0xc0] sm:$0xff]  ;;  %4796 = vmatprep.subr.bf16.mxu1 %v6211_v51 }
  0x23   :  { %8609 = vst [vmem:[#allocation36_spill] sm:$0xff] %v6214_v7  ;;  %8610 = vst [vmem:[#allocation37_spill] sm:$0xff] %v6220_v47  ;;  %v8276_v57 = vand.u32 4294901760, %v6214_v7  ;;  %v6235_v33 = vpack.c.bf16 %v138_v56, %v134_v53  ;;  %v8279_v27 = vand.u32 4294901760, %v6220_v47  ;;  %v6238_v42 = vsub.f32 %v50_v5, %v138_v56 }
  0x24   :  { %8611 = vst [vmem:[#allocation38_spill] sm:$0xff] %v6225_v6  ;;  %v355_v34 = vand.u32 4294901760, %v354_v39  ;;  %4856 = vmatprep.subr.bf16.mxu0 %v6225_v6  ;;  %v361_v31 = vand.u32 4294901760, %v360_v35  ;;  %v144_v26 = vand.u32 4294901760, %v55_v45  ;;  %v6244_v24 = vsub.f32 %v53_v59, %v140_v41  ;;  %v54_v39 = vld [vmem:[%s8249_s5 + $0xd0] sm:$0xff] }
  0x25   :  { %8612 = vst [vmem:[#allocation39_spill] sm:$0xff] %v6235_v33  ;;  %8613 = vst [vmem:[#allocation40_spill] sm:$0xff] %v6238_v42  ;;  %v372_v8 = vsub.f32 %v6214_v7, %v8276_v57  ;;  %v366_v56 = vsub.f32 %v6220_v47, %v8279_v27  ;;  %v8282_v5 = vand.u32 4294901760, %v6238_v42  ;;  %v142_v35 = vand.u32 4294901760, %v52_v17  ;;  %v57_v57 = vld [vmem:[%s8249_s5 + $0xe8] sm:$0xff]  ;;  %4798 = vmatpush1.bf16.msra.mxu1 %v6235_v33 }
  0x26   :  { %v6249_v53 = vpack.c.bf16 %v355_v34, %v343_v58  ;;  %v6259_v23 = vpack.c.bf16 %v144_v26, %v140_v41  ;;  %v8285_v22 = vand.u32 4294901760, %v6244_v24  ;;  %v6262_v58 = vsub.f32 %v55_v45, %v144_v26 }
  0x27   :  { %v373_v59 = vand.u32 4294901760, %v372_v8  ;;  %v367_v34 = vand.u32 4294901760, %v366_v56  ;;  %v378_v27 = vsub.f32 %v6238_v42, %v8282_v5  ;;  %v146_v6 = vand.u32 4294901760, %v54_v39  ;;  %v59_v8 = vld [vmem:[%s8249_s5 + $0xf8] sm:$0xff]  ;;  %v56_v5 = vld [vmem:[%s8249_s5 + $0xe0] sm:$0xff] }
  0x28   :  { %8614 = vst [vmem:[#allocation41_spill] sm:$0xff] %v6249_v53  ;;  %8615 = vst [vmem:[#allocation42_spill] sm:$0xff] %v6259_v23  ;;  %4858 = vmatpush1.bf16.msra.mxu0 %v6249_v53  ;;  %v6268_v4 = vsub.f32 %v52_v17, %v142_v35  ;;  %v384_v26 = vsub.f32 %v6244_v24, %v8285_v22  ;;  %v8288_v45 = vand.u32 4294901760, %v6262_v58  ;;  %v148_v56 = vand.u32 4294901760, %v57_v57 }
  0x29   :  { %v6273_v41 = vpack.c.bf16 %v373_v59, %v361_v31  ;;  %4800 = vmatprep.subr.bf16.mxu1 %v6259_v23  ;;  %v379_v17 = vand.u32 4294901760, %v378_v27  ;;  %v6283_v53 = vpack.c.bf16 %v146_v6, %v142_v35  ;;  %v6286_v31 = vsub.f32 %v54_v39, %v146_v6  ;;  %v58_v27 = vld [vmem:[%s8249_s5 + $0xf0] sm:$0xff] }
  0x2a   :  { %v8291_v50 = vand.u32 4294901760, %v6268_v4  ;;  %v385_v59 = vand.u32 4294901760, %v384_v26  ;;  %v396_v22 = vsub.f32 %v6262_v58, %v8288_v45  ;;  %v152_v28 = vand.u32 4294901760, %v59_v8  ;;  %v61_v45 = vld [vmem:[%s8249_s5 + $0x108] sm:$0xff] }
  0x2b   :  { %8616 = vst [vmem:[#allocation43_spill] sm:$0xff] %v6273_v41  ;;  %8617 = vst [vmem:[#allocation44_spill] sm:$0xff] %v6283_v53  ;;  %4860 = vmatprep.subr.bf16.mxu0 %v6273_v41  ;;  %v6292_v52 = vsub.f32 %v57_v57, %v148_v56  ;;  %v6297_v35 = vpack.c.bf16 %v379_v17, %v367_v34  ;;  %v8294_v39 = vand.u32 4294901760, %v6286_v31  ;;  %v150_v26 = vand.u32 4294901760, %v56_v5 }
  0x2c   :  { %8618 = vst [vmem:[#allocation45_spill] sm:$0xff] %v6286_v31  ;;  %v390_v6 = vsub.f32 %v6268_v4, %v8291_v50  ;;  %4802 = vmatpush1.bf16.msra.mxu1 %v6283_v53  ;;  %v397_v57 = vand.u32 4294901760, %v396_v22  ;;  %v6307_v41 = vpack.c.bf16 %v152_v28, %v148_v56  ;;  %v6310_v34 = vsub.f32 %v59_v8, %v152_v28  ;;  %v63_v22 = vld [vmem:[%s8249_s5 + $0x118] sm:$0xff] }
  0x2d   :  { %8619 = vst [vmem:[#allocation46_spill] sm:$0xff] %v6297_v35  ;;  %v8297_v32 = vand.u32 4294901760, %v6292_v52  ;;  %4862 = vmatpush1.bf16.msra.mxu0 %v6297_v35  ;;  %v402_v50 = vsub.f32 %v6286_v31, %v8294_v39  ;;  %v154_v60 = vand.u32 4294901760, %v58_v27  ;;  %v6316_v54 = vsub.f32 %v56_v5, %v150_v26  ;;  %v60_v39 = vld [vmem:[%s8249_s5 + $0x100] sm:$0xff] }
  0x2e   :  { %8620 = vst [vmem:[#allocation47_spill] sm:$0xff] %v6307_v41  ;;  %8621 = vst [vmem:[#allocation48_spill] sm:$0xff] %v6310_v34  ;;  %v391_v17 = vand.u32 4294901760, %v390_v6  ;;  %v6321_v56 = vpack.c.bf16 %v397_v57, %v385_v59  ;;  %v8302_v8 = vand.u32 4294901760, %v6310_v34  ;;  %v156_v6 = vand.u32 4294901760, %v61_v45  ;;  %4804 = vmatprep.subr.bf16.mxu1 %v6307_v41 }
  0x2f   :  { %v408_v28 = vsub.f32 %v6292_v52, %v8297_v32  ;;  %v403_v5 = vand.u32 4294901760, %v402_v50  ;;  %v6331_v35 = vpack.c.bf16 %v154_v60, %v150_v26  ;;  %v8306_v49 = vand.u32 4294901760, %v6316_v54  ;;  %v62_v50 = vld [vmem:[%s8249_s5 + $0x110] sm:$0xff] }
  0x30   :  { %8622 = vst [vmem:[#allocation49_spill] sm:$0xff] %v6321_v56  ;;  %v6334_v59 = vsub.f32 %v58_v27, %v154_v60  ;;  %4864 = vmatprep.subr.bf16.mxu0 %v6321_v56  ;;  %v420_v32 = vsub.f32 %v6310_v34, %v8302_v8  ;;  %v160_v53 = vand.u32 4294901760, %v63_v22  ;;  %v6340_v23 = vsub.f32 %v61_v45, %v156_v6  ;;  %v65_v8 = vld [vmem:[%s8249_s5 + $0x128] sm:$0xff] }
  0x31   :  { %8623 = vst [vmem:[#allocation50_spill] sm:$0xff] %v6331_v35  ;;  %v409_v57 = vand.u32 4294901760, %v408_v28  ;;  %v6345_v26 = vpack.c.bf16 %v403_v5, %v391_v17  ;;  %v414_v60 = vsub.f32 %v6316_v54, %v8306_v49  ;;  %v158_v28 = vand.u32 4294901760, %v60_v39  ;;  %4806 = vmatpush1.bf16.msra.mxu1 %v6331_v35 }
  0x32   :  { %8624 = vst [vmem:[#allocation51_spill] sm:$0xff] %v6334_v59  ;;  %v8311_v27 = vand.u32 4294901760, %v6334_v59  ;;  %v421_v45 = vand.u32 4294901760, %v420_v32  ;;  %v6355_v56 = vpack.c.bf16 %v160_v53, %v156_v6  ;;  %v8315_v41 = vand.u32 4294901760, %v6340_v23  ;;  %v67_v32 = vld [vmem:[%s8249_s5 + $0x138] sm:$0xff] }
  0x33   :  { %8625 = vst [vmem:[#allocation52_spill] sm:$0xff] %v6345_v26  ;;  %v6358_v17 = vsub.f32 %v63_v22, %v160_v53  ;;  %4866 = vmatpush1.bf16.msra.mxu0 %v6345_v26  ;;  %v415_v5 = vand.u32 4294901760, %v414_v60  ;;  %v162_v33 = vand.u32 4294901760, %v62_v50  ;;  %v6364_v51 = vsub.f32 %v60_v39, %v158_v28 }
  0x34   :  { %8626 = vst [vmem:[#allocation53_spill] sm:$0xff] %v6355_v56  ;;  %v426_v49 = vsub.f32 %v6334_v59, %v8311_v27  ;;  %v6369_v6 = vpack.c.bf16 %v421_v45, %v409_v57  ;;  %v432_v53 = vsub.f32 %v6340_v23, %v8315_v41  ;;  %v164_v60 = vand.u32 4294901760, %v65_v8  ;;  %v64_v27 = vld [vmem:[%s8249_s5 + $0x120] sm:$0xff]  ;;  %4808 = vmatprep.subr.bf16.mxu1 %v6355_v56 }
  0x35   :  { %8627 = vst [vmem:[#allocation54_spill] sm:$0xff] %v6364_v51  ;;  %v8320_v22 = vand.u32 4294901760, %v6358_v17  ;;  %v6379_v26 = vpack.c.bf16 %v162_v33, %v158_v28  ;;  %v8324_v35 = vand.u32 4294901760, %v6364_v51  ;;  %v6382_v57 = vsub.f32 %v62_v50, %v162_v33 }
  0x36   :  { %8628 = vst [vmem:[#allocation55_spill] sm:$0xff] %v6369_v6  ;;  %v427_v39 = vand.u32 4294901760, %v426_v49  ;;  %4868 = vmatprep.subr.bf16.mxu0 %v6369_v6  ;;  %v433_v45 = vand.u32 4294901760, %v432_v53  ;;  %v168_v40 = vand.u32 4294901760, %v67_v32  ;;  %v6388_v43 = vsub.f32 %v65_v8, %v164_v60  ;;  %v66_v49 = vld [vmem:[%s8249_s5 + $0x130] sm:$0xff] }
  0x37   :  { %8629 = vst [vmem:[#allocation56_spill] sm:$0xff] %v6379_v26  ;;  %8630 = vst [vmem:[#allocation57_spill] sm:$0xff] %v6382_v57  ;;  %v444_v41 = vsub.f32 %v6358_v17, %v8320_v22  ;;  %v438_v33 = vsub.f32 %v6364_v51, %v8324_v35  ;;  %v8329_v50 = vand.u32 4294901760, %v6382_v57  ;;  %v166_v53 = vand.u32 4294901760, %v64_v27  ;;  %v69_v22 = vld [vmem:[%s8249_s5 + $0x148] sm:$0xff]  ;;  %4810 = vmatpush1.bf16.msra.mxu1 %v6379_v26 }
  0x38   :  { %8631 = vst [vmem:[#allocation58_spill] sm:$0xff] %v6388_v43  ;;  %v6393_v28 = vpack.c.bf16 %v427_v39, %v415_v5  ;;  %v6403_v6 = vpack.c.bf16 %v168_v40, %v164_v60  ;;  %v8333_v56 = vand.u32 4294901760, %v6388_v43  ;;  %v6406_v5 = vsub.f32 %v67_v32, %v168_v40 }
  0x39   :  { %v445_v8 = vand.u32 4294901760, %v444_v41  ;;  %v439_v39 = vand.u32 4294901760, %v438_v33  ;;  %v450_v35 = vsub.f32 %v6382_v57, %v8329_v50  ;;  %v170_v1 = vand.u32 4294901760, %v66_v49  ;;  %v71_v41 = vld [vmem:[%s8249_s5 + $0x158] sm:$0xff]  ;;  %v68_v50 = vld [vmem:[%s8249_s5 + $0x140] sm:$0xff] }
  0x3a   :  { %8632 = vst [vmem:[#allocation59_spill] sm:$0xff] %v6393_v28  ;;  %8633 = vst [vmem:[#allocation60_spill] sm:$0xff] %v6403_v6  ;;  %4870 = vmatpush1.bf16.msra.mxu0 %v6393_v28  ;;  %v6412_v29 = vsub.f32 %v64_v27, %v166_v53  ;;  %v456_v40 = vsub.f32 %v6388_v43, %v8333_v56  ;;  %v8338_v32 = vand.u32 4294901760, %v6406_v5  ;;  %v172_v33 = vand.u32 4294901760, %v69_v22 }
  0x3b   :  { %8634 = vst [vmem:[#allocation61_spill] sm:$0xff] %v6406_v5  ;;  %v6417_v60 = vpack.c.bf16 %v445_v8, %v433_v45  ;;  %4812 = vmatprep.subr.bf16.mxu1 %v6403_v6  ;;  %v451_v27 = vand.u32 4294901760, %v450_v35  ;;  %v6427_v28 = vpack.c.bf16 %v170_v1, %v166_v53  ;;  %v6430_v45 = vsub.f32 %v66_v49, %v170_v1  ;;  %v70_v35 = vld [vmem:[%s8249_s5 + $0x150] sm:$0xff] }
  0x3c   :  { %8635 = vst [vmem:[#allocation62_spill] sm:$0xff] %v6412_v29  ;;  %v8342_v26 = vand.u32 4294901760, %v6412_v29  ;;  %v457_v8 = vand.u32 4294901760, %v456_v40  ;;  %v468_v56 = vsub.f32 %v6406_v5, %v8338_v32  ;;  %v176_v9 = vand.u32 4294901760, %v71_v41  ;;  %v73_v32 = vld [vmem:[%s8249_s5 + $0x168] sm:$0xff] }
  0x3d   :  { %8636 = vst [vmem:[#allocation63_spill] sm:$0xff] %v6417_v60  ;;  %8637 = vst [vmem:[#allocation64_spill] sm:$0xff] %v6427_v28  ;;  %4872 = vmatprep.subr.bf16.mxu0 %v6417_v60  ;;  %v6436_v61 = vsub.f32 %v69_v22, %v172_v33  ;;  %v6441_v53 = vpack.c.bf16 %v451_v27, %v439_v39  ;;  %v8347_v49 = vand.u32 4294901760, %v6430_v45  ;;  %v174_v40 = vand.u32 4294901760, %v68_v50 }
  0x3e   :  { %8638 = vst [vmem:[#allocation65_spill] sm:$0xff] %v6430_v45  ;;  %v462_v1 = vsub.f32 %v6412_v29, %v8342_v26  ;;  %4814 = vmatpush1.bf16.msra.mxu1 %v6427_v28  ;;  %v469_v22 = vand.u32 4294901760, %v468_v56  ;;  %v6451_v60 = vpack.c.bf16 %v176_v9, %v172_v33  ;;  %v6454_v39 = vsub.f32 %v71_v41, %v176_v9  ;;  %v75_v56 = vld [vmem:[%s8249_s5 + $0x178] sm:$0xff] }
  0x3f   :  { %8639 = vst [vmem:[#allocation66_spill] sm:$0xff] %v6436_v61  ;;  %8640 = vst [vmem:[#allocation67_spill] sm:$0xff] %v6441_v53  ;;  %v8351_v6 = vand.u32 4294901760, %v6436_v61  ;;  %4874 = vmatpush1.bf16.msra.mxu0 %v6441_v53  ;;  %v474_v26 = vsub.f32 %v6430_v45, %v8347_v49  ;;  %v178_v36 = vand.u32 4294901760, %v70_v35  ;;  %v6460_v20 = vsub.f32 %v68_v50, %v174_v40  ;;  %v72_v49 = vld [vmem:[%s8249_s5 + $0x160] sm:$0xff] }
  0x40   :  { %8641 = vst [vmem:[#allocation68_spill] sm:$0xff] %v6451_v60  ;;  %8642 = vst [vmem:[#allocation69_spill] sm:$0xff] %v6454_v39  ;;  %v463_v27 = vand.u32 4294901760, %v462_v1  ;;  %v6465_v33 = vpack.c.bf16 %v469_v22, %v457_v8  ;;  %v8356_v41 = vand.u32 4294901760, %v6454_v39  ;;  %v180_v1 = vand.u32 4294901760, %v73_v32  ;;  %4816 = vmatprep.subr.bf16.mxu1 %v6451_v60 }
  0x41   :  { %8643 = vst [vmem:[#allocation70_spill] sm:$0xff] %v6460_v20  ;;  %v480_v9 = vsub.f32 %v6436_v61, %v8351_v6  ;;  %v475_v50 = vand.u32 4294901760, %v474_v26  ;;  %v6475_v53 = vpack.c.bf16 %v178_v36, %v174_v40  ;;  %v8360_v28 = vand.u32 4294901760, %v6460_v20  ;;  %v74_v26 = vld [vmem:[%s8249_s5 + $0x170] sm:$0xff] }
  0x42   :  { %8644 = vst [vmem:[#allocation71_spill] sm:$0xff] %v6465_v33  ;;  %v6478_v8 = vsub.f32 %v70_v35, %v178_v36  ;;  %4876 = vmatprep.subr.bf16.mxu0 %v6465_v33  ;;  %v492_v6 = vsub.f32 %v6454_v39, %v8356_v41  ;;  %v184_v18 = vand.u32 4294901760, %v75_v56  ;;  %v6484_v42 = vsub.f32 %v73_v32, %v180_v1  ;;  %v77_v41 = vld [vmem:[%s8249_s5 + $0x188] sm:$0xff] }
  0x43   :  { %8645 = vst [vmem:[#allocation72_spill] sm:$0xff] %v6475_v53  ;;  %v481_v22 = vand.u32 4294901760, %v480_v9  ;;  %v6489_v40 = vpack.c.bf16 %v475_v50, %v463_v27  ;;  %v486_v36 = vsub.f32 %v6460_v20, %v8360_v28  ;;  %v182_v9 = vand.u32 4294901760, %v72_v49  ;;  %4818 = vmatpush1.bf16.msra.mxu1 %v6475_v53 }
  0x44   :  { %8646 = vst [vmem:[#allocation73_spill] sm:$0xff] %v6478_v8  ;;  %8647 = vst [vmem:[#allocation74_spill] sm:$0xff] %v6484_v42  ;;  %v8365_v35 = vand.u32 4294901760, %v6478_v8  ;;  %v493_v32 = vand.u32 4294901760, %v492_v6  ;;  %v6499_v33 = vpack.c.bf16 %v184_v18, %v180_v1  ;;  %v8369_v60 = vand.u32 4294901760, %v6484_v42  ;;  %v79_v6 = vld [vmem:[%s8249_s5 + $0x198] sm:$0xff] }
  0x45   :  { %8648 = vst [vmem:[#allocation75_spill] sm:$0xff] %v6489_v40  ;;  %v6502_v27 = vsub.f32 %v75_v56, %v184_v18  ;;  %4878 = vmatpush1.bf16.msra.mxu0 %v6489_v40  ;;  %v487_v50 = vand.u32 4294901760, %v486_v36  ;;  %v186_v47 = vand.u32 4294901760, %v74_v26  ;;  %v6508_v7 = vsub.f32 %v72_v49, %v182_v9 }
  0x46   :  { %8649 = vst [vmem:[#allocation76_spill] sm:$0xff] %v6499_v33  ;;  %v498_v28 = vsub.f32 %v6478_v8, %v8365_v35  ;;  %v6513_v1 = vpack.c.bf16 %v493_v32, %v481_v22  ;;  %v504_v18 = vsub.f32 %v6484_v42, %v8369_v60  ;;  %v188_v36 = vand.u32 4294901760, %v77_v41  ;;  %v76_v35 = vld [vmem:[%s8249_s5 + $0x180] sm:$0xff]  ;;  %4820 = vmatprep.subr.bf16.mxu1 %v6499_v33 }
  0x47   :  { %8650 = vst [vmem:[#allocation77_spill] sm:$0xff] %v6502_v27  ;;  %8651 = vst [vmem:[#allocation78_spill] sm:$0xff] %v6508_v7  ;;  %v8374_v56 = vand.u32 4294901760, %v6502_v27  ;;  %v6523_v40 = vpack.c.bf16 %v186_v47, %v182_v9  ;;  %v8378_v53 = vand.u32 4294901760, %v6508_v7  ;;  %v6526_v22 = vsub.f32 %v74_v26, %v186_v47 }
  0x48   :  { %8652 = vst [vmem:[#allocation79_spill] sm:$0xff] %v6513_v1  ;;  %v499_v49 = vand.u32 4294901760, %v498_v28  ;;  %4880 = vmatprep.subr.bf16.mxu0 %v6513_v1  ;;  %v505_v32 = vand.u32 4294901760, %v504_v18  ;;  %v192_v10 = vand.u32 4294901760, %v79_v6  ;;  %v6532_v46 = vsub.f32 %v77_v41, %v188_v36  ;;  %v78_v28 = vld [vmem:[%s8249_s5 + $0x190] sm:$0xff] }
  0x49   :  { %8653 = vst [vmem:[#allocation80_spill] sm:$0xff] %v6523_v40  ;;  %8654 = vst [vmem:[#allocation81_spill] sm:$0xff] %v6526_v22  ;;  %v516_v60 = vsub.f32 %v6502_v27, %v8374_v56  ;;  %v510_v47 = vsub.f32 %v6508_v7, %v8378_v53  ;;  %v8383_v26 = vand.u32 4294901760, %v6526_v22  ;;  %v190_v18 = vand.u32 4294901760, %v76_v35  ;;  %v81_v56 = vld [vmem:[%s8249_s5 + $0x1a8] sm:$0xff]  ;;  %4822 = vmatpush1.bf16.msra.mxu1 %v6523_v40 }
  0x4a   :  { %8655 = vst [vmem:[#allocation82_spill] sm:$0xff] %v6532_v46  ;;  %v6537_v9 = vpack.c.bf16 %v499_v49, %v487_v50  ;;  %v6547_v1 = vpack.c.bf16 %v192_v10, %v188_v36  ;;  %v8387_v33 = vand.u32 4294901760, %v6532_v46  ;;  %v6550_v50 = vsub.f32 %v79_v6, %v192_v10 }
  0x4b   :  { %v517_v41 = vand.u32 4294901760, %v516_v60  ;;  %v511_v49 = vand.u32 4294901760, %v510_v47  ;;  %v522_v53 = vsub.f32 %v6526_v22, %v8383_v26  ;;  %v194_v0 = vand.u32 4294901760, %v78_v28  ;;  %v83_v60 = vld [vmem:[%s8249_s5 + $0x1b8] sm:$0xff]  ;;  %v80_v26 = vld [vmem:[%s8249_s5 + $0x1a0] sm:$0xff] }
  0x4c   :  { %8656 = vst [vmem:[#allocation83_spill] sm:$0xff] %v6537_v9  ;;  %8657 = vst [vmem:[#allocation84_spill] sm:$0xff] %v6547_v1  ;;  %4882 = vmatpush1.bf16.msra.mxu0 %v6537_v9  ;;  %v6556_v44 = vsub.f32 %v76_v35, %v190_v18  ;;  %v528_v10 = vsub.f32 %v6532_v46, %v8387_v33  ;;  %v8392_v6 = vand.u32 4294901760, %v6550_v50  ;;  %v196_v47 = vand.u32 4294901760, %v81_v56 }
  0x4d   :  { %8658 = vst [vmem:[#allocation85_spill] sm:$0xff] %v6550_v50  ;;  %v6561_v36 = vpack.c.bf16 %v517_v41, %v505_v32  ;;  %4824 = vmatprep.subr.bf16.mxu1 %v6547_v1  ;;  %v523_v35 = vand.u32 4294901760, %v522_v53  ;;  %v6571_v9 = vpack.c.bf16 %v194_v0, %v190_v18  ;;  %v6574_v32 = vsub.f32 %v78_v28, %v194_v0  ;;  %v82_v53 = vld [vmem:[%s8249_s5 + $0x1b0] sm:$0xff] }
  0x4e   :  { %8659 = vst [vmem:[#allocation86_spill] sm:$0xff] %v6556_v44  ;;  %v8396_v40 = vand.u32 4294901760, %v6556_v44  ;;  %v529_v41 = vand.u32 4294901760, %v528_v10  ;;  %v540_v33 = vsub.f32 %v6550_v50, %v8392_v6  ;;  %v200_v16 = vand.u32 4294901760, %v83_v60  ;;  %v85_v6 = vld [vmem:[%s8249_s5 + $0x1c8] sm:$0xff] }
  0x4f   :  { %8660 = vst [vmem:[#allocation87_spill] sm:$0xff] %v6561_v36  ;;  %8661 = vst [vmem:[#allocation88_spill] sm:$0xff] %v6571_v9  ;;  %4884 = vmatprep.subr.bf16.mxu0 %v6561_v36  ;;  %v6580_v2 = vsub.f32 %v81_v56, %v196_v47  ;;  %v6585_v18 = vpack.c.bf16 %v523_v35, %v511_v49  ;;  %v8401_v28 = vand.u32 4294901760, %v6574_v32  ;;  %v198_v10 = vand.u32 4294901760, %v80_v26 }
  0x50   :  { %8662 = vst [vmem:[#allocation89_spill] sm:$0xff] %v6574_v32  ;;  %v534_v0 = vsub.f32 %v6556_v44, %v8396_v40  ;;  %4826 = vmatpush1.bf16.msra.mxu1 %v6571_v9  ;;  %v541_v56 = vand.u32 4294901760, %v540_v33  ;;  %v6595_v36 = vpack.c.bf16 %v200_v16, %v196_v47  ;;  %v6598_v49 = vsub.f32 %v83_v60, %v200_v16  ;;  %v87_v33 = vld [vmem:[%s8249_s5 + $0x1d8] sm:$0xff] }
  0x51   :  { %8663 = vst [vmem:[#allocation90_spill] sm:$0xff] %v6580_v2  ;;  %8664 = vst [vmem:[#allocation91_spill] sm:$0xff] %v6585_v18  ;;  %v8405_v1 = vand.u32 4294901760, %v6580_v2  ;;  %4886 = vmatpush1.bf16.msra.mxu0 %v6585_v18  ;;  %v546_v40 = vsub.f32 %v6574_v32, %v8401_v28  ;;  %v202_v55 = vand.u32 4294901760, %v82_v53  ;;  %v6604_v38 = vsub.f32 %v80_v26, %v198_v10  ;;  %v84_v28 = vld [vmem:[%s8249_s5 + $0x1c0] sm:$0xff] }
  0x52   :  { %8665 = vst [vmem:[#allocation92_spill] sm:$0xff] %v6595_v36  ;;  %8666 = vst [vmem:[#allocation93_spill] sm:$0xff] %v6598_v49  ;;  %v535_v35 = vand.u32 4294901760, %v534_v0  ;;  %v6609_v47 = vpack.c.bf16 %v541_v56, %v529_v41  ;;  %v8410_v60 = vand.u32 4294901760, %v6598_v49  ;;  %v204_v0 = vand.u32 4294901760, %v85_v6  ;;  %4828 = vmatprep.subr.bf16.mxu1 %v6595_v36 }
  0x53   :  { %8667 = vst [vmem:[#allocation94_spill] sm:$0xff] %v6604_v38  ;;  %v552_v16 = vsub.f32 %v6580_v2, %v8405_v1  ;;  %v547_v26 = vand.u32 4294901760, %v546_v40  ;;  %v6619_v18 = vpack.c.bf16 %v202_v55, %v198_v10  ;;  %v8414_v9 = vand.u32 4294901760, %v6604_v38  ;;  %v86_v40 = vld [vmem:[%s8249_s5 + $0x1d0] sm:$0xff] }
  0x54   :  { %8668 = vst [vmem:[#allocation95_spill] sm:$0xff] %v6609_v47  ;;  %v6622_v41 = vsub.f32 %v82_v53, %v202_v55  ;;  %4888 = vmatprep.subr.bf16.mxu0 %v6609_v47  ;;  %v564_v1 = vsub.f32 %v6598_v49, %v8410_v60  ;;  %v208_v30 = vand.u32 4294901760, %v87_v33  ;;  %v6628_v11 = vsub.f32 %v85_v6, %v204_v0  ;;  %v89_v60 = vld [vmem:[%s8249_s5 + $0x1e8] sm:$0xff] }
  0x55   :  { %8669 = vst [vmem:[#allocation96_spill] sm:$0xff] %v6619_v18  ;;  %v553_v56 = vand.u32 4294901760, %v552_v16  ;;  %v6633_v10 = vpack.c.bf16 %v547_v26, %v535_v35  ;;  %v558_v55 = vsub.f32 %v6604_v38, %v8414_v9  ;;  %v206_v16 = vand.u32 4294901760, %v84_v28  ;;  %4830 = vmatpush1.bf16.msra.mxu1 %v6619_v18 }
  0x56   :  { %8670 = vst [vmem:[#allocation97_spill] sm:$0xff] %v6622_v41  ;;  %8671 = vst [vmem:[#allocation98_spill] sm:$0xff] %v6628_v11  ;;  %v8419_v53 = vand.u32 4294901760, %v6622_v41  ;;  %v565_v6 = vand.u32 4294901760, %v564_v1  ;;  %v6643_v47 = vpack.c.bf16 %v208_v30, %v204_v0  ;;  %v8423_v36 = vand.u32 4294901760, %v6628_v11  ;;  %v91_v1 = vld [vmem:[%s8249_s5 + $0x1f8] sm:$0xff] }
  0x57   :  { %8672 = vst [vmem:[#allocation99_spill] sm:$0xff] %v6633_v10  ;;  %v6646_v35 = vsub.f32 %v87_v33, %v208_v30  ;;  %4890 = vmatpush1.bf16.msra.mxu0 %v6633_v10  ;;  %v559_v26 = vand.u32 4294901760, %v558_v55  ;;  %v210_v3 = vand.u32 4294901760, %v86_v40  ;;  %v6652_v63 = vsub.f32 %v84_v28, %v206_v16 }
  0x58   :  { %8673 = vst [vmem:[#allocation100_spill] sm:$0xff] %v6643_v47  ;;  %v570_v9 = vsub.f32 %v6622_v41, %v8419_v53  ;;  %v6657_v0 = vpack.c.bf16 %v565_v6, %v553_v56  ;;  %v576_v30 = vsub.f32 %v6628_v11, %v8423_v36  ;;  %v212_v55 = vand.u32 4294901760, %v89_v60  ;;  %v88_v53 = vld [vmem:[%s8249_s5 + $0x1e0] sm:$0xff]  ;;  %4832 = vmatprep.subr.bf16.mxu1 %v6643_v47 }
  0x59   :  { %8674 = vst [vmem:[#allocation101_spill] sm:$0xff] %v6646_v35  ;;  %8675 = vst [vmem:[#allocation102_spill] sm:$0xff] %v6652_v63  ;;  %v8428_v33 = vand.u32 4294901760, %v6646_v35  ;;  %v6667_v10 = vpack.c.bf16 %v210_v3, %v206_v16  ;;  %v8430_v18 = vand.u32 4294901760, %v6652_v63  ;;  %v6670_v56 = vsub.f32 %v86_v40, %v210_v3 }
  0x5a   :  { %8676 = vst [vmem:[#allocation103_spill] sm:$0xff] %v6657_v0  ;;  %v571_v28 = vand.u32 4294901760, %v570_v9  ;;  %4892 = vmatprep.subr.bf16.mxu0 %v6657_v0  ;;  %v577_v6 = vand.u32 4294901760, %v576_v30  ;;  %v216_v62 = vand.u32 4294901760, %v91_v1  ;;  %v6676_v48 = vsub.f32 %v89_v60, %v212_v55  ;;  %v90_v9 = vld [vmem:[%s8249_s5 + $0x1f0] sm:$0xff] }
  0x5b   :  { %8677 = vst [vmem:[#allocation104_spill] sm:$0xff] %v6667_v10  ;;  %8678 = vst [vmem:[#allocation105_spill] sm:$0xff] %v6670_v56  ;;  %v588_v36 = vsub.f32 %v6646_v35, %v8428_v33  ;;  %v582_v3 = vsub.f32 %v6652_v63, %v8430_v18  ;;  %v8439_v40 = vand.u32 4294901760, %v6670_v56  ;;  %v214_v30 = vand.u32 4294901760, %v88_v53  ;;  %v6690_v33 = vld [vmem:[%s8250_s0 + $0x8] sm:$0xff]  ;;  %4834 = vmatpush1.bf16.msra.mxu1 %v6667_v10 }
  0x5c   :  { %8679 = vst [vmem:[#allocation106_spill] sm:$0xff] %v6676_v48  ;;  %v6681_v16 = vpack.c.bf16 %v571_v28, %v559_v26  ;;  %8681 = vst [vmem:[#allocation108_spill] sm:$0xff] %v6690_v33  ;;  %v6693_v0 = vpack.c.bf16 %v216_v62, %v212_v55  ;;  %v8440_v26 = vand.u32 4294901760, %v6676_v48  ;;  %v6696_v28 = vsub.f32 %v91_v1, %v216_v62 }
  0x5d   :  { %v589_v60 = vand.u32 4294901760, %v588_v36  ;;  %v583_v18 = vand.u32 4294901760, %v582_v3  ;;  %v594_v47 = vsub.f32 %v6670_v56, %v8439_v40  ;;  %v218_v37 = vand.u32 4294901760, %v90_v9 }
  0x5e   :  { %8680 = vst [vmem:[#allocation107_spill] sm:$0xff] %v6681_v16  ;;  %8682 = vst [vmem:[#allocation109_spill] sm:$0xff] %v6693_v0  ;;  %4894 = vmatpush1.bf16.msra.mxu0 %v6681_v16  ;;  %v6702_v63 = vsub.f32 %v88_v53, %v214_v30  ;;  %v600_v36 = vsub.f32 %v6676_v48, %v8440_v26  ;;  %v8442_v55 = vand.u32 4294901760, %v6696_v28  ;;  %v6711_v62 = vand.u32 4294901760, %v6690_v33 }
  0x5f   :  { %8683 = vst [vmem:[#allocation110_spill] sm:$0xff] %v6696_v28  ;;  %v6704_v35 = vpack.c.bf16 %v589_v60, %v577_v6  ;;  %4836 = vmatprep.subr.bf16.mxu1 %v6693_v0  ;;  %v595_v1 = vand.u32 4294901760, %v594_v47  ;;  %v6714_v3 = vpack.c.bf16 %v218_v37, %v214_v30  ;;  %v6717_v53 = vsub.f32 %v90_v9, %v218_v37  ;;  %v6733_v37 = vld [vmem:[%s8250_s0] sm:$0xff] }
  0x60   :  { %8684 = vst [vmem:[#allocation111_spill] sm:$0xff] %v6702_v63  ;;  %v8441_v40 = vand.u32 4294901760, %v6702_v63  ;;  %v601_v6 = vand.u32 4294901760, %v600_v36  ;;  %v612_v60 = vsub.f32 %v6696_v28, %v8442_v55  ;;  %622 = vmatprep.mubr.f32.mxu0 %v6711_v62  ;;  %8689 = vst [vmem:[#allocation116_spill] sm:$0xff] %v6733_v37  ;;  %v6748_v55 = vand.u32 4294901760, %v6733_v37 }
  0x61   :  { %8685 = vst [vmem:[#allocation112_spill] sm:$0xff] %v6704_v35  ;;  %8686 = vst [vmem:[#allocation113_spill] sm:$0xff] %v6714_v3  ;;  %4896 = vmatprep.subr.bf16.mxu0 %v6704_v35  ;;  %v6724_v26 = vpack.c.bf16 %v595_v1, %v583_v18  ;;  %v8444_v30 = vand.u32 4294901760, %v6717_v53  ;;  %4838 = vmatpush1.bf16.msra.mxu1 %v6714_v3 }
  0x62   :  { %8687 = vst [vmem:[#allocation114_spill] sm:$0xff] %v6717_v53  ;;  %v606_v47 = vsub.f32 %v6702_v63, %v8441_v40  ;;  %v613_v9 = vand.u32 4294901760, %v612_v60  ;;  %5160 = vmatprep.subr.bf16.mxu1 %v5982_v12  ;;  %v6745_v40 = vpack.c.bf16 %v5986_v14, %v5984_v13  ;;  %8692 = vst [vmem:[#allocation119_spill] sm:$0xff] %v6748_v55 }
  0x63   :  { %8688 = vst [vmem:[#allocation115_spill] sm:$0xff] %v6724_v26  ;;  %4898 = vmatpush1.bf16.msra.mxu0 %v6724_v26  ;;  %v618_v36 = vsub.f32 %v6717_v53, %v8444_v30  ;;  %v6752_v60 = vpack.c.bf16 %v5998_v19, %v5988_v15  ;;  %v6773_v30 = vpack.c.bf16 %v6334_v59, %v6316_v54 }
  0x64   :  { %v607_v18 = vand.u32 4294901760, %v606_v47  ;;  %v6741_v1 = vpack.c.bf16 %v613_v9, %v601_v6  ;;  %8691 = vst [vmem:[#allocation118_spill] sm:$0xff] %v6745_v40  ;;  %v6756_v47 = vpack.c.bf16 %v6007_v25, %v6002_v21  ;;  %v6760_v6 = vpack.c.bf16 %v6262_v58, %v6244_v24 }
  0x65   :  { %v619_v35 = vand.u32 4294901760, %v618_v36  ;;  %8693 = vst [vmem:[#allocation120_spill] sm:$0xff] %v6752_v60  ;;  %v6765_v9 = vpack.c.bf16 %v6286_v31, %v6268_v4  ;;  %v6769_v36 = vpack.c.bf16 %v6310_v34, %v6292_v52  ;;  %8698 = vst [vmem:[#allocation125_spill] sm:$0xff] %v6773_v30  ;;  %v6777_v26 = vpack.c.bf16 %v6358_v17, %v6340_v23 }
  0x66   :  { %8690 = vst [vmem:[#allocation117_spill] sm:$0xff] %v6741_v1  ;;  %8694 = vst [vmem:[#allocation121_spill] sm:$0xff] %v6756_v47  ;;  %4900 = vmatprep.subr.bf16.mxu0 %v6741_v1  ;;  %v6783_v1 = vpack.c.bf16 %v6382_v57, %v6364_v51  ;;  %v6787_v31 = vpack.c.bf16 %v6406_v5, %v6388_v43  ;;  %v6791_v34 = vpack.c.bf16 %v6430_v45, %v6412_v29  ;;  %v8739_v29 = vld [vmem:[#allocation33_spill] sm:$0xff] }
  0x67   :  { %8695 = vst [vmem:[#allocation122_spill] sm:$0xff] %v6760_v6  ;;  %8696 = vst [vmem:[#allocation123_spill] sm:$0xff] %v6765_v9  ;;  %v6779_v16 = vpack.c.bf16 %v619_v35, %v607_v18  ;;  %v6795_v59 = vpack.c.bf16 %v6454_v39, %v6436_v61  ;;  %v6799_v35 = vpack.c.bf16 %v6478_v8, %v6460_v20  ;;  %v8736_v20 = vld [vmem:[#allocation30_spill] sm:$0xff]  ;;  %v8742_v57 = vld [vmem:[#allocation37_spill] sm:$0xff] }
  0x68   :  { %8697 = vst [vmem:[#allocation124_spill] sm:$0xff] %v6769_v36  ;;  %8699 = vst [vmem:[#allocation126_spill] sm:$0xff] %v6777_v26  ;;  %v6803_v18 = vpack.c.bf16 %v6502_v27, %v6484_v42  ;;  %v6807_v5 = vpack.c.bf16 %v6526_v22, %v6508_v7  ;;  %v6812_v45 = vpack.c.bf16 %v6550_v50, %v6532_v46  ;;  %v8714_v50 = vld [vmem:[#allocation102_spill] sm:$0xff]  ;;  %v8733_v7 = vld [vmem:[#allocation25_spill] sm:$0xff] }
  0x69   :  { %8700 = vst [vmem:[#allocation127_spill] sm:$0xff] %v6779_v16  ;;  %8701 = vst [vmem:[#allocation128_spill] sm:$0xff] %v6783_v1  ;;  %4902 = vmatpush1.bf16.msra.mxu0 %v6779_v16  ;;  %v6816_v39 = vpack.c.bf16 %v6574_v32, %v6556_v44  ;;  %v6820_v8 = vpack.c.bf16 %v6598_v49, %v6580_v2  ;;  %v6824_v27 = vpack.c.bf16 %v6622_v41, %v6604_v38  ;;  %v8712_v16 = vld [vmem:[#allocation101_spill] sm:$0xff]  ;;  %v8730_v2 = vld [vmem:[#allocation22_spill] sm:$0xff] }
  0x6a   :  { %8702 = vst [vmem:[#allocation129_spill] sm:$0xff] %v6787_v31  ;;  %8703 = vst [vmem:[#allocation130_spill] sm:$0xff] %v6791_v34  ;;  %4904 = vmatprep.subr.bf16.mxu0 %v6745_v40  ;;  %v6829_v22 = vpack.c.bf16 %v8712_v16, %v6628_v11  ;;  %v6833_v46 = vpack.c.bf16 %v6670_v56, %v8714_v50  ;;  %v6837_v32 = vpack.c.bf16 %v6696_v28, %v6676_v48  ;;  %v8718_v40 = vld [vmem:[#allocation6_spill] sm:$0xff]  ;;  %v8719_v16 = vld [vmem:[#allocation7_spill] sm:$0xff] }
  0x6b   :  { %8704 = vst [vmem:[#allocation131_spill] sm:$0xff] %v6795_v59  ;;  %8705 = vst [vmem:[#allocation132_spill] sm:$0xff] %v6799_v35  ;;  %v6841_v49 = vpack.c.bf16 %v6717_v53, %v6702_v63  ;;  %v6845_v41 = vsub.f32 %v6690_v33, %v6711_v62  ;;  %v6851_v56 = vpack.c.bf16 %v8719_v16, %v8718_v40  ;;  %v8721_v28 = vld [vmem:[#allocation12_spill] sm:$0xff]  ;;  %v8722_v48 = vld [vmem:[#allocation13_spill] sm:$0xff] }
  0x6c   :  { %8706 = vst [vmem:[#allocation133_spill] sm:$0xff] %v6803_v18  ;;  %8707 = vst [vmem:[#allocation134_spill] sm:$0xff] %v6807_v5  ;;  %624 = vmatmul.mubr.f32.vlgmr.msra.gmra.mrb[0].mxu0 %v6748_v55  ;;  %v6857_v53 = vpack.c.bf16 %v8722_v48, %v8721_v28  ;;  %v8724_v33 = vld [vmem:[#allocation14_spill] sm:$0xff]  ;;  %v8725_v63 = vld [vmem:[#allocation16_spill] sm:$0xff] }
  0x6d   :  { %8708 = vst [vmem:[#allocation135_spill] sm:$0xff] %v6812_v45  ;;  %8709 = vst [vmem:[#allocation136_spill] sm:$0xff] %v6816_v39  ;;  %4906 = vmatpush1.bf16.msra.mxu0 %v6752_v60  ;;  %824 = vmatprep.mubr.f32.mxu0 %v6845_v41  ;;  %v6862_v50 = vpack.c.bf16 %v8725_v63, %v8724_v33  ;;  %v8727_v60 = vld [vmem:[#allocation18_spill] sm:$0xff]  ;;  %v8728_v11 = vld [vmem:[#allocation20_spill] sm:$0xff] }
  0x6e   :  { %8710 = vst [vmem:[#allocation137_spill] sm:$0xff] %v6820_v8  ;;  %8711 = vst [vmem:[#allocation138_spill] sm:$0xff] %v6824_v27  ;;  %4908 = vmatprep.subr.bf16.mxu0 %v6756_v47  ;;  %v6867_v38 = vpack.c.bf16 %v8728_v11, %v8727_v60  ;;  %v8731_v47 = vld [vmem:[#allocation24_spill] sm:$0xff] }
  0x6f   :  { %8713 = vst [vmem:[#allocation139_spill] sm:$0xff] %v6829_v22  ;;  %8715 = vst [vmem:[#allocation140_spill] sm:$0xff] %v6833_v46  ;;  %v6872_v44 = vpack.c.bf16 %v8731_v47, %v8730_v2 }
  0x70   :  { %8716 = vst [vmem:[#allocation141_spill] sm:$0xff] %v6837_v32  ;;  %8717 = vst [vmem:[#allocation142_spill] sm:$0xff] %v6841_v49 }
  0x71   :  { %8720 = vst [vmem:[#allocation6_spill] sm:$0xff] %v6851_v56  ;;  %8723 = vst [vmem:[#allocation7_spill] sm:$0xff] %v6857_v53  ;;  %4910 = vmatpush1.bf16.msra.mxu0 %v6851_v56  ;;  %v8734_v56 = vld [vmem:[#allocation28_spill] sm:$0xff] }
  0x72   :  { %8726 = vst [vmem:[#allocation12_spill] sm:$0xff] %v6862_v50  ;;  %4912 = vmatprep.subr.bf16.mxu0 %v6857_v53  ;;  %8729 = vst [vmem:[#allocation13_spill] sm:$0xff] %v6867_v38  ;;  %v6877_v42 = vpack.c.bf16 %v8734_v56, %v8733_v7  ;;  %v8737_v53 = vld [vmem:[#allocation32_spill] sm:$0xff] }
  0x73   :  { %8732 = vst [vmem:[#allocation14_spill] sm:$0xff] %v6872_v44  ;;  %v6882_v61 = vpack.c.bf16 %v8737_v53, %v8736_v20 }
  0x74   :  { %8735 = vst [vmem:[#allocation16_spill] sm:$0xff] %v6877_v42 }
  0x75   :  { %4914 = vmatpush1.bf16.msra.mxu0 %v6862_v50  ;;  %8738 = vst [vmem:[#allocation18_spill] sm:$0xff] %v6882_v61  ;;  %v8740_v50 = vld [vmem:[#allocation36_spill] sm:$0xff] }
  0x76   :  { %4916 = vmatprep.subr.bf16.mxu0 %v6867_v38  ;;  %v6887_v43 = vpack.c.bf16 %v8740_v50, %v8739_v29  ;;  %v8743_v38 = vld [vmem:[#allocation40_spill] sm:$0xff] }
  0x77   :  { %v6892_v51 = vpack.c.bf16 %v8743_v38, %v8742_v57 }
  0x78   :  { %8741 = vst [vmem:[#allocation20_spill] sm:$0xff] %v6887_v43 }
  0x79   :  { %4918 = vmatpush1.bf16.msra.mxu0 %v6872_v44  ;;  %8744 = vst [vmem:[#allocation22_spill] sm:$0xff] %v6892_v51  ;;  %v8767_v44 = vld [vmem:[#allocation80_spill] sm:$0xff] }
  0x7a   :  { %4920 = vmatprep.subr.bf16.mxu0 %v6877_v42  ;;  %v8766_v42 = vld [vmem:[#allocation76_spill] sm:$0xff] }
  0x7d   :  { %4922 = vmatpush1.bf16.msra.mxu0 %v6882_v61  ;;  %v8765_v61 = vld [vmem:[#allocation72_spill] sm:$0xff] }
  0x7e   :  { %4924 = vmatprep.subr.bf16.mxu0 %v6887_v43  ;;  %v8764_v43 = vld [vmem:[#allocation68_spill] sm:$0xff] }
  0x81   :  { %4926 = vmatpush1.bf16.msra.mxu0 %v6892_v51  ;;  %v8763_v51 = vld [vmem:[#allocation64_spill] sm:$0xff] }
  0x82   :  { %4928 = vmatprep.subr.bf16.mxu0 %v6760_v6  ;;  %v8762_v6 = vld [vmem:[#allocation60_spill] sm:$0xff] }
  0x85   :  { %4930 = vmatpush1.bf16.msra.mxu0 %v6765_v9  ;;  %v8761_v9 = vld [vmem:[#allocation56_spill] sm:$0xff] }
  0x86   :  { %4932 = vmatprep.subr.bf16.mxu0 %v6769_v36  ;;  %v8760_v36 = vld [vmem:[#allocation53_spill] sm:$0xff] }
  0x89   :  { %4934 = vmatpush1.bf16.msra.mxu0 %v6773_v30  ;;  %v8759_v30 = vld [vmem:[#allocation50_spill] sm:$0xff] }
  0x8a   :  { %4936 = vmatprep.subr.bf16.mxu0 %v6777_v26  ;;  %v8758_v26 = vld [vmem:[#allocation47_spill] sm:$0xff] }
  0x8d   :  { %4938 = vmatpush1.bf16.msra.mxu0 %v6783_v1  ;;  %v8757_v1 = vld [vmem:[#allocation44_spill] sm:$0xff] }
  0x8e   :  { %4940 = vmatprep.subr.bf16.mxu0 %v6787_v31  ;;  %v8756_v31 = vld [vmem:[#allocation42_spill] sm:$0xff] }
  0x91   :  { %4942 = vmatpush1.bf16.msra.mxu0 %v6791_v34  ;;  %v8755_v34 = vld [vmem:[#allocation39_spill] sm:$0xff] }
  0x92   :  { %4944 = vmatprep.subr.bf16.mxu0 %v6795_v59  ;;  %v8754_v59 = vld [vmem:[#allocation35_spill] sm:$0xff] }
  0x95   :  { %4946 = vmatpush1.bf16.msra.mxu0 %v6799_v35  ;;  %v227_v35 = vsub.f32 %v6733_v37, %v6748_v55  ;;  %v8768_v37 = vld [vmem:[#allocation84_spill] sm:$0xff] }
  0x96   :  { %4948 = vmatprep.subr.bf16.mxu0 %v6803_v18  ;;  %v8753_v18 = vld [vmem:[#allocation31_spill] sm:$0xff]  ;;  %v8769_v55 = vld [vmem:[#allocation88_spill] sm:$0xff] }
  0x99   :  { %4950 = vmatpush1.bf16.msra.mxu0 %v6807_v5  ;;  %v222_v5 = vand.u32 4294901760, %v6845_v41 }
  0x9a   :  { %4952 = vmatprep.subr.bf16.mxu0 %v6812_v45  ;;  %v8751_v45 = vld [vmem:[#allocation23_spill] sm:$0xff] }
  0x9d   :  { %4954 = vmatpush1.bf16.msra.mxu0 %v6816_v39  ;;  %v8745_v39 = vld [vmem:[#allocation3_spill] sm:$0xff] }
  0x9e   :  { %4956 = vmatprep.subr.bf16.mxu0 %v6820_v8  ;;  %v8750_v8 = vld [vmem:[#allocation17_spill] sm:$0xff] }
  0xa1   :  { %4958 = vmatpush1.bf16.msra.mxu0 %v6824_v27  ;;  %v8746_v27 = vld [vmem:[#allocation4_spill] sm:$0xff] }
  0xa2   :  { %4960 = vmatprep.subr.bf16.mxu0 %v6829_v22  ;;  %v8747_v22 = vld [vmem:[#allocation5_spill] sm:$0xff] }
  0xa5   :  { %4962 = vmatpush1.bf16.msra.mxu0 %v6833_v46  ;;  %v8748_v46 = vld [vmem:[#allocation11_spill] sm:$0xff] }
  0xa6   :  { %4964 = vmatprep.subr.bf16.mxu0 %v6837_v32  ;;  %v8749_v32 = vld [vmem:[#allocation15_spill] sm:$0xff] }
  0xa9   :  { %4966 = vmatpush1.bf16.msra.mxu0 %v6841_v49  ;;  %v8752_v49 = vld [vmem:[#allocation27_spill] sm:$0xff] }
  0xaa   :  { %4968 = vmatprep.subr.bf16.mxu0 %v5982_v12  ;;  %v8770_v12 = vld [vmem:[#allocation92_spill] sm:$0xff] }
  0xac   :  { %827 = vmatmul.mubr.f32.vlgmr.msra.gmra.mrb[0].mxu0 %v227_v35 }
  0xad   :  { %4970 = vmatpush1.bf16.msra.mxu0 %v8745_v39  ;;  %964 = vmatprep.mubr.f32.mxu0 %v222_v5 }
  0xae   :  { %4972 = vmatprep.subr.bf16.mxu0 %v8746_v27 }
  0xb1   :  { %4974 = vmatpush1.bf16.msra.mxu0 %v8747_v22 }
  0xb2   :  { %4976 = vmatprep.subr.bf16.mxu0 %v8748_v46 }
  0xb5   :  { %4978 = vmatpush1.bf16.msra.mxu0 %v8749_v32 }
  0xb6   :  { %4980 = vmatprep.subr.bf16.mxu0 %v8750_v8 }
  0xb9   :  { %4982 = vmatpush1.bf16.msra.mxu0 %v8751_v45 }
  0xba   :  { %4984 = vmatprep.subr.bf16.mxu0 %v8752_v49 }
  0xbd   :  { %4986 = vmatpush1.bf16.msra.mxu0 %v8753_v18 }
  0xbe   :  { %4988 = vmatprep.subr.bf16.mxu0 %v8754_v59 }
  0xc1   :  { %4990 = vmatpush1.bf16.msra.mxu0 %v8755_v34 }
  0xc2   :  { %4992 = vmatprep.subr.bf16.mxu0 %v8756_v31 }
  0xc5   :  { %4994 = vmatpush1.bf16.msra.mxu0 %v8757_v1 }
  0xc6   :  { %4996 = vmatprep.subr.bf16.mxu0 %v8758_v26 }
  0xc9   :  { %4998 = vmatpush1.bf16.msra.mxu0 %v8759_v30 }
  0xca   :  { %5000 = vmatprep.subr.bf16.mxu0 %v8760_v36  ;;  %v8771_v36 = vld [vmem:[#allocation96_spill] sm:$0xff] }
  0xcd   :  { %5002 = vmatpush1.bf16.msra.mxu0 %v8761_v9  ;;  %v8772_v9 = vld [vmem:[#allocation100_spill] sm:$0xff] }
  0xce   :  { %5004 = vmatprep.subr.bf16.mxu0 %v8762_v6 }
  0xd1   :  { %5006 = vmatpush1.bf16.msra.mxu0 %v8763_v51  ;;  %v228_v51 = vand.u32 4294901760, %v227_v35 }
  0xd2   :  { %5008 = vmatprep.subr.bf16.mxu0 %v8764_v43 }
  0xd5   :  { %5010 = vmatpush1.bf16.msra.mxu0 %v8765_v61  ;;  %v8773_v61 = vand.u32 4294901760, %v5984_v13  ;;  %v8777_v13 = vand.u32 4294901760, %v6002_v21  ;;  %v8781_v21 = vand.u32 4294901760, %v8721_v28  ;;  %v8789_v28 = vand.u32 4294901760, %v8733_v7 }
  0xd6   :  { %5012 = vmatprep.subr.bf16.mxu0 %v8766_v42  ;;  %v8774_v42 = vand.u32 4294901760, %v5986_v14  ;;  %v8778_v14 = vand.u32 4294901760, %v6007_v25  ;;  %v8782_v25 = vand.u32 4294901760, %v8722_v48  ;;  %v8785_v48 = vand.u32 4294901760, %v8727_v60 }
  0xd7   :  { %v8793_v7 = vand.u32 4294901760, %v8739_v29  ;;  %v8797_v29 = vand.u32 4294901760, %v6244_v24  ;;  %v8802_v24 = vand.u32 4294901760, %v6292_v52  ;;  %v8808_v52 = vand.u32 4294901760, %v6340_v23 }
  0xd9   :  { %5014 = vmatpush1.bf16.msra.mxu0 %v8767_v44  ;;  %v6954_v44 = vpack.c.bf16 %v8774_v42, %v8773_v61  ;;  %v6969_v61 = vpack.c.bf16 %v8778_v14, %v8777_v13  ;;  %v8803_v14 = vld [vmem:[#allocation48_spill] sm:$0xff] }
  0xda   :  { %5016 = vmatprep.subr.bf16.mxu0 %v8768_v37  ;;  %v223_v37 = vsub.f32 %v6845_v41, %v222_v5  ;;  %v8786_v41 = vand.u32 4294901760, %v8728_v11  ;;  %v8790_v11 = vand.u32 4294901760, %v8734_v56  ;;  %v8794_v56 = vand.u32 4294901760, %v8740_v50 }
  0xdb   :  { %v8798_v50 = vand.u32 4294901760, %v6262_v58  ;;  %v8804_v58 = vand.u32 4294901760, %v8803_v14 }
  0xdc   :  { %v224_v43 = vand.u32 4294901760, %v223_v37  ;;  %v8792_v37 = vand.u32 4294901760, %v8737_v53  ;;  %v8796_v53 = vand.u32 4294901760, %v8743_v38 }
  0xdd   :  { %5018 = vmatpush1.bf16.msra.mxu0 %v8769_v55  ;;  %v229_v55 = vsub.f32 %v227_v35, %v228_v51  ;;  %v8800_v35 = vld [vmem:[#allocation45_spill] sm:$0xff] }
  0xde   :  { %5020 = vmatprep.subr.bf16.mxu0 %v8770_v12  ;;  %225 = vmatprep.mubr.f32.mxu1 %v224_v43  ;;  %v8783_v43 = vand.u32 4294901760, %v8724_v33  ;;  %v8787_v33 = vand.u32 4294901760, %v8730_v2  ;;  %v8791_v2 = vand.u32 4294901760, %v8736_v20  ;;  %v8795_v20 = vand.u32 4294901760, %v8742_v57 }
  0xdf   :  { %v230_v12 = vand.u32 4294901760, %v229_v55  ;;  %v7018_v55 = vpack.c.bf16 %v8790_v11, %v8789_v28  ;;  %v8799_v57 = vand.u32 4294901760, %v6268_v4  ;;  %v8801_v38 = vand.u32 4294901760, %v8800_v35  ;;  %v8816_v28 = vld [vmem:[#allocation53_spill] sm:$0xff]  ;;  %v8817_v11 = vld [vmem:[#allocation58_spill] sm:$0xff] }
  0xe0   :  { %v7026_v60 = vpack.c.bf16 %v8792_v37, %v8791_v2  ;;  %v8805_v4 = vand.u32 4294901760, %v6316_v54  ;;  %v8818_v23 = vand.u32 4294901760, %v8817_v11  ;;  %v8819_v2 = vld [vmem:[#allocation61_spill] sm:$0xff] }
  0xe1   :  { %5022 = vmatpush1.bf16.msra.mxu0 %v8771_v36  ;;  %v8775_v36 = vand.u32 4294901760, %v5988_v15  ;;  %231 = vmatmul.mubr.f32.vlgmr.msra.gmra.mrb[0].mxu1 %v230_v12  ;;  %v8779_v15 = vand.u32 4294901760, %v8718_v40  ;;  %v6985_v12 = vpack.c.bf16 %v8782_v25, %v8781_v21  ;;  %v7058_v13 = vpack.c.bf16 %v8801_v38, %v8799_v57  ;;  %v8828_v57 = vld [vmem:[#allocation66_spill] sm:$0xff]  ;;  %v8830_v38 = vld [vmem:[#allocation69_spill] sm:$0xff] }
  0xe2   :  { %5024 = vmatprep.subr.bf16.mxu0 %v8772_v9  ;;  %v8776_v9 = vand.u32 4294901760, %v5998_v19  ;;  %5162 = vmatpush1.bf16.msra.mxu1 %v8745_v39  ;;  %v8780_v19 = vand.u32 4294901760, %v8719_v16  ;;  %v7002_v16 = vpack.c.bf16 %v8786_v41, %v8785_v48  ;;  %v8811_v48 = vld [vmem:[#allocation54_spill] sm:$0xff]  ;;  %v8813_v41 = vld [vmem:[#allocation57_spill] sm:$0xff]  ;;  %v8829_v35 = vand.u32 4294901760, %v8828_v57  ;;  %v8851_v57 = vld [vmem:[#allocation76_spill] sm:$0xff] }
  0xe3   :  { %5164 = vmatprep.subr.bf16.mxu1 %v8746_v27  ;;  %v8812_v54 = vand.u32 4294901760, %v8811_v48  ;;  %v8839_v48 = vld [vmem:[#allocation68_spill] sm:$0xff] }
  0xe4   :  { %v6977_v42 = vpack.c.bf16 %v8780_v19, %v8779_v15  ;;  %v7066_v15 = vpack.c.bf16 %v8804_v58, %v8802_v24  ;;  %v8806_v19 = vld [vmem:[#allocation51_spill] sm:$0xff]  ;;  %v8831_v24 = vand.u32 4294901760, %v8830_v38  ;;  %v8833_v58 = vld [vmem:[#allocation64_spill] sm:$0xff] }
  0xe5   :  { %5026 = vmatpush1.bf16.msra.mxu0 %v6667_v10  ;;  %v6962_v10 = vpack.c.bf16 %v8776_v9, %v8775_v36  ;;  %v7042_v9 = vpack.c.bf16 %v8796_v53, %v8795_v20  ;;  %v7050_v36 = vpack.c.bf16 %v8798_v50, %v8797_v29  ;;  %v8807_v21 = vand.u32 4294901760, %v8806_v19  ;;  %v8825_v53 = vld [vmem:[#allocation65_spill] sm:$0xff] }
  0xe6   :  { %5028 = vmatprep.subr.bf16.mxu0 %v6693_v0  ;;  %5166 = vmatpush1.bf16.msra.mxu1 %v8747_v22  ;;  %v8826_v29 = vand.u32 4294901760, %v8825_v53  ;;  %v7114_v14 = vpack.c.bf16 %v8831_v24, %v8829_v35  ;;  %v8852_v35 = vld [vmem:[#allocation82_spill] sm:$0xff]  ;;  %v8854_v24 = vld [vmem:[#allocation85_spill] sm:$0xff] }
  0xe7   :  { %5168 = vmatprep.subr.bf16.mxu1 %v8748_v46  ;;  %v7074_v25 = vpack.c.bf16 %v8807_v21, %v8805_v4  ;;  %v8834_v4 = vld [vmem:[#allocation70_spill] sm:$0xff]  ;;  %v8836_v21 = vld [vmem:[#allocation73_spill] sm:$0xff]  ;;  %v8853_v38 = vand.u32 4294901760, %v8852_v35 }
  0xe8   :  { %8832 = vst [vmem:[#allocation32_spill] sm:$0xff] %v7114_v14  ;;  %v8835_v19 = vand.u32 4294901760, %v8834_v4  ;;  %v8855_v4 = vand.u32 4294901760, %v8854_v24  ;;  %v8869_v24 = vld [vmem:[#allocation88_spill] sm:$0xff] }
  0xe9   :  { %5030 = vmatpush1.bf16.msra.mxu0 %v6714_v3 }
  0xea   :  { %5032 = vmatprep.subr.bf16.mxu0 %v6954_v44  ;;  %5170 = vmatpush1.bf16.msra.mxu1 %v8749_v32 }
  0xeb   :  { %5172 = vmatprep.subr.bf16.mxu1 %v8750_v8 }
  0xec   :  { %968 = vmatmul.mubr.f32.vlgmr.msra.gmra.mrb[0].mxu0 %v228_v51  ;;  %v8784_v51 = vand.u32 4294901760, %v8725_v63  ;;  %v8788_v63 = vand.u32 4294901760, %v8731_v47  ;;  %v7034_v47 = vpack.c.bf16 %v8794_v56, %v8793_v7  ;;  %v8822_v7 = vld [vmem:[#allocation56_spill] sm:$0xff]  ;;  %v8823_v56 = vld [vmem:[#allocation62_spill] sm:$0xff] }
  0xed   :  { %5034 = vmatpush1.bf16.msra.mxu0 %v6962_v10  ;;  %1231 = vmatprep.mubr.f32.mxu0 %v6711_v62  ;;  %v8824_v20 = vand.u32 4294901760, %v8823_v56 }
  0xee   :  { %5036 = vmatprep.subr.bf16.mxu0 %v6969_v61  ;;  %v6994_v5 = vpack.c.bf16 %v8784_v51, %v8783_v43  ;;  %v7010_v40 = vpack.c.bf16 %v8788_v63, %v8787_v33  ;;  %5174 = vmatpush1.bf16.msra.mxu1 %v8751_v45  ;;  %v8809_v43 = vand.u32 4294901760, %v6358_v17  ;;  %v8814_v33 = vand.u32 4294901760, %v8813_v41 }
  0xef   :  { %5176 = vmatprep.subr.bf16.mxu1 %v8752_v49  ;;  %v8820_v17 = vand.u32 4294901760, %v8819_v2  ;;  %v7106_v50 = vpack.c.bf16 %v8826_v29, %v8824_v20  ;;  %v8845_v2 = vld [vmem:[#allocation72_spill] sm:$0xff]  ;;  %v8848_v20 = vld [vmem:[#allocation81_spill] sm:$0xff] }
  0xf0   :  { %v7082_v51 = vpack.c.bf16 %v8809_v43, %v8808_v52  ;;  %v7090_v63 = vpack.c.bf16 %v8814_v33, %v8812_v54  ;;  %v8837_v52 = vand.u32 4294901760, %v8836_v21  ;;  %v8840_v54 = vld [vmem:[#allocation74_spill] sm:$0xff]  ;;  %v8842_v33 = vld [vmem:[#allocation77_spill] sm:$0xff]  ;;  %v8849_v53 = vand.u32 4294901760, %v8848_v20  ;;  %v8857_v21 = vld [vmem:[#allocation80_spill] sm:$0xff] }
  0xf1   :  { %5038 = vmatpush1.bf16.msra.mxu0 %v6977_v42  ;;  %v7098_v37 = vpack.c.bf16 %v8820_v17, %v8818_v23  ;;  %8827 = vst [vmem:[#allocation30_spill] sm:$0xff] %v7106_v50  ;;  %v8841_v41 = vand.u32 4294901760, %v8840_v54  ;;  %v8843_v11 = vand.u32 4294901760, %v8842_v33  ;;  %v8846_v17 = vld [vmem:[#allocation78_spill] sm:$0xff] }
  0xf2   :  { %5040 = vmatprep.subr.bf16.mxu0 %v6985_v12  ;;  %5178 = vmatpush1.bf16.msra.mxu1 %v8753_v18  ;;  %8810 = vst [vmem:[#allocation24_spill] sm:$0xff] %v7082_v51  ;;  %8815 = vst [vmem:[#allocation25_spill] sm:$0xff] %v7090_v63  ;;  %v7122_v43 = vpack.c.bf16 %v8837_v52, %v8835_v19  ;;  %v8847_v56 = vand.u32 4294901760, %v8846_v17  ;;  %v7146_v19 = vpack.c.bf16 %v8855_v4, %v8853_v38  ;;  %v8858_v52 = vld [vmem:[#allocation86_spill] sm:$0xff]  ;;  %v8863_v17 = vld [vmem:[#allocation84_spill] sm:$0xff] }
  0xf3   :  { %5180 = vmatprep.subr.bf16.mxu1 %v8754_v59  ;;  %8821 = vst [vmem:[#allocation28_spill] sm:$0xff] %v7098_v37  ;;  %v7130_v23 = vpack.c.bf16 %v8843_v11, %v8841_v41  ;;  %v8859_v54 = vand.u32 4294901760, %v8858_v52  ;;  %v8860_v41 = vld [vmem:[#allocation89_spill] sm:$0xff]  ;;  %v8870_v4 = vld [vmem:[#allocation94_spill] sm:$0xff] }
  0xf4   :  { %8838 = vst [vmem:[#allocation33_spill] sm:$0xff] %v7122_v43  ;;  %v7138_v29 = vpack.c.bf16 %v8849_v53, %v8847_v56  ;;  %8856 = vst [vmem:[#allocation40_spill] sm:$0xff] %v7146_v19  ;;  %v8861_v33 = vand.u32 4294901760, %v8860_v41  ;;  %v8864_v56 = vld [vmem:[#allocation90_spill] sm:$0xff]  ;;  %v8866_v53 = vld [vmem:[#allocation93_spill] sm:$0xff]  ;;  %v8871_v52 = vand.u32 4294901760, %v8870_v4 }
  0xf5   :  { %5042 = vmatpush1.bf16.msra.mxu0 %v6994_v5  ;;  %8844 = vst [vmem:[#allocation36_spill] sm:$0xff] %v7130_v23  ;;  %v8865_v20 = vand.u32 4294901760, %v8864_v56  ;;  %v8867_v35 = vand.u32 4294901760, %v8866_v53 }
  0xf6   :  { %5044 = vmatprep.subr.bf16.mxu0 %v7002_v16  ;;  %5182 = vmatpush1.bf16.msra.mxu1 %v8755_v34  ;;  %8850 = vst [vmem:[#allocation37_spill] sm:$0xff] %v7138_v29  ;;  %v7154_v11 = vpack.c.bf16 %v8861_v33, %v8859_v54  ;;  %v8875_v33 = vld [vmem:[#allocation92_spill] sm:$0xff] }
  0xf7   :  { %5184 = vmatprep.subr.bf16.mxu1 %v8756_v31  ;;  %v7162_v38 = vpack.c.bf16 %v8867_v35, %v8865_v20  ;;  %v8881_v35 = vld [vmem:[#allocation96_spill] sm:$0xff] }
  0xf8   :  { %8862 = vst [vmem:[#allocation3_spill] sm:$0xff] %v7154_v11 }
  0xf9   :  { %5046 = vmatpush1.bf16.msra.mxu0 %v7010_v40  ;;  %8868 = vst [vmem:[#allocation4_spill] sm:$0xff] %v7162_v38 }
  0xfa   :  { %5048 = vmatprep.subr.bf16.mxu0 %v7018_v55  ;;  %5186 = vmatpush1.bf16.msra.mxu1 %v8757_v1 }
  0xfb   :  { %5188 = vmatprep.subr.bf16.mxu1 %v8758_v26 }
  0xfd   :  { %5050 = vmatpush1.bf16.msra.mxu0 %v7026_v60 }
  0xfe   :  { %5052 = vmatprep.subr.bf16.mxu0 %v7034_v47  ;;  %5190 = vmatpush1.bf16.msra.mxu1 %v8759_v30 }
  0xff   :  { %5192 = vmatprep.subr.bf16.mxu1 %v8816_v28 }
 0x101   :  { %5054 = vmatpush1.bf16.msra.mxu0 %v7042_v9 }
 0x102   :  { %5056 = vmatprep.subr.bf16.mxu0 %v7050_v36  ;;  %5194 = vmatpush1.bf16.msra.mxu1 %v8822_v7 }
 0x103   :  { %5196 = vmatprep.subr.bf16.mxu1 %v8762_v6 }
 0x105   :  { %5058 = vmatpush1.bf16.msra.mxu0 %v7058_v13 }
 0x106   :  { %5060 = vmatprep.subr.bf16.mxu0 %v7066_v15  ;;  %5198 = vmatpush1.bf16.msra.mxu1 %v8833_v58 }
 0x107   :  { %5200 = vmatprep.subr.bf16.mxu1 %v8839_v48 }
 0x109   :  { %5062 = vmatpush1.bf16.msra.mxu0 %v7074_v25 }
 0x10a   :  { %5064 = vmatprep.subr.bf16.mxu0 %v7082_v51  ;;  %5202 = vmatpush1.bf16.msra.mxu1 %v8845_v2  ;;  %v8912_v51 = vld [vmem:[#allocation34_spill] sm:$0xff] }
 0x10b   :  { %5204 = vmatprep.subr.bf16.mxu1 %v8851_v57 }
 0x10d   :  { %5066 = vmatpush1.bf16.msra.mxu0 %v7090_v63  ;;  %v8910_v63 = vld [vmem:[#allocation26_spill] sm:$0xff] }
 0x10e   :  { %5068 = vmatprep.subr.bf16.mxu0 %v7098_v37  ;;  %5206 = vmatpush1.bf16.msra.mxu1 %v8857_v21 }
 0x10f   :  { %5208 = vmatprep.subr.bf16.mxu1 %v8863_v17 }
 0x111   :  { %5070 = vmatpush1.bf16.msra.mxu0 %v7106_v50  ;;  %v8896_v50 = vld [vmem:[#allocation114_spill] sm:$0xff] }
 0x112   :  { %5072 = vmatprep.subr.bf16.mxu0 %v7114_v14  ;;  %5210 = vmatpush1.bf16.msra.mxu1 %v8869_v24  ;;  %v8890_v14 = vld [vmem:[#allocation110_spill] sm:$0xff] }
 0x113   :  { %5212 = vmatprep.subr.bf16.mxu1 %v8875_v33 }
 0x115   :  { %5074 = vmatpush1.bf16.msra.mxu0 %v7122_v43  ;;  %v8884_v43 = vld [vmem:[#allocation105_spill] sm:$0xff] }
 0x116   :  { %5076 = vmatprep.subr.bf16.mxu0 %v7130_v23  ;;  %v8878_v23 = vld [vmem:[#allocation101_spill] sm:$0xff]  ;;  %5214 = vmatpush1.bf16.msra.mxu1 %v8881_v35 }
 0x117   :  { %v8879_v53 = vand.u32 4294901760, %v8878_v23  ;;  %v8891_v23 = vand.u32 4294901760, %v8890_v14  ;;  %v8899_v14 = vld [vmem:[#allocation8_spill] sm:$0xff] }
 0x119   :  { %5078 = vmatpush1.bf16.msra.mxu0 %v7138_v29  ;;  %v8872_v29 = vld [vmem:[#allocation97_spill] sm:$0xff] }
 0x11a   :  { %5080 = vmatprep.subr.bf16.mxu0 %v7146_v19  ;;  %v8873_v41 = vand.u32 4294901760, %v8872_v29  ;;  %v8876_v19 = vld [vmem:[#allocation98_spill] sm:$0xff]  ;;  %v8885_v29 = vand.u32 4294901760, %v8884_v43  ;;  %v8897_v43 = vand.u32 4294901760, %v8896_v50 }
 0x11b   :  { %v8877_v56 = vand.u32 4294901760, %v8876_v19 }
 0x11c   :  { %v7170_v54 = vpack.c.bf16 %v8873_v41, %v8871_v52  ;;  %v8887_v41 = vld [vmem:[#allocation100_spill] sm:$0xff] }
 0x11d   :  { %5082 = vmatpush1.bf16.msra.mxu0 %v7154_v11  ;;  %v7178_v20 = vpack.c.bf16 %v8879_v53, %v8877_v56  ;;  %v8882_v11 = vld [vmem:[#allocation102_spill] sm:$0xff]  ;;  %5216 = vmatprep.subr.bf16.mxu1 %v8887_v41  ;;  %v8893_v53 = vld [vmem:[#allocation104_spill] sm:$0xff] }
 0x11e   :  { %8874 = vst [vmem:[#allocation5_spill] sm:$0xff] %v7170_v54  ;;  %5084 = vmatprep.subr.bf16.mxu0 %v7162_v38  ;;  %v8883_v4 = vand.u32 4294901760, %v8882_v11  ;;  %v8888_v38 = vld [vmem:[#allocation106_spill] sm:$0xff]  ;;  %5218 = vmatpush1.bf16.msra.mxu1 %v8893_v53 }
 0x11f   :  { %8880 = vst [vmem:[#allocation11_spill] sm:$0xff] %v7178_v20  ;;  %v8889_v19 = vand.u32 4294901760, %v8888_v38  ;;  %5220 = vmatprep.subr.bf16.mxu1 %v6693_v0  ;;  %v8900_v38 = vld [vmem:[#allocation2_spill] sm:$0xff] }
 0x120   :  { %v7186_v52 = vpack.c.bf16 %v8885_v29, %v8883_v4  ;;  %v8901_v29 = vld [vmem:[#allocation119_spill] sm:$0xff] }
 0x121   :  { %5086 = vmatpush1.bf16.msra.mxu0 %v7170_v54  ;;  %v7194_v56 = vpack.c.bf16 %v8891_v23, %v8889_v19  ;;  %v8894_v54 = vld [vmem:[#allocation111_spill] sm:$0xff] }
 0x122   :  { %8886 = vst [vmem:[#allocation15_spill] sm:$0xff] %v7186_v52  ;;  %5088 = vmatprep.subr.bf16.mxu0 %v7178_v20  ;;  %v8895_v11 = vand.u32 4294901760, %v8894_v54  ;;  %5222 = vmatpush1.bf16.msra.mxu1 %v6714_v3 }
 0x123   :  { %8892 = vst [vmem:[#allocation17_spill] sm:$0xff] %v7194_v56  ;;  %5224 = vmatprep.subr.bf16.mxu1 %v8899_v14 }
 0x124   :  { %v7202_v4 = vpack.c.bf16 %v8897_v43, %v8895_v11  ;;  %v8902_v43 = vld [vmem:[#allocation116_spill] sm:$0xff] }
 0x125   :  { %5090 = vmatpush1.bf16.msra.mxu0 %v7186_v52 }
 0x126   :  { %8898 = vst [vmem:[#allocation23_spill] sm:$0xff] %v7202_v4  ;;  %5092 = vmatprep.subr.bf16.mxu0 %v7194_v56 }
 0x129   :  { %5094 = vmatpush1.bf16.msra.mxu0 %v7202_v4  ;;  %v8904_v4 = vld [vmem:[#allocation108_spill] sm:$0xff] }
 0x12a   :  { %5096 = vmatprep.subr.bf16.mxu0 %v8900_v38 }
 0x12c   :  { %1233 = vmatmul.mubr.f32.vlgmr.msra.gmra.mrb[0].mxu0 %v8901_v29 }
 0x12d   :  { %5098 = vmatpush1.bf16.msra.mxu0 %v8745_v39  ;;  %1368 = vmatprep.mubr.f32.mxu0 %v6711_v62 }
 0x12e   :  { %5100 = vmatprep.subr.bf16.mxu0 %v8746_v27 }
 0x131   :  { %5102 = vmatpush1.bf16.msra.mxu0 %v8747_v22 }
 0x132   :  { %5104 = vmatprep.subr.bf16.mxu0 %v8748_v46 }
 0x135   :  { %5106 = vmatpush1.bf16.msra.mxu0 %v8749_v32 }
 0x136   :  { %5108 = vmatprep.subr.bf16.mxu0 %v8750_v8 }
 0x139   :  { %5110 = vmatpush1.bf16.msra.mxu0 %v8751_v45 }
 0x13a   :  { %5112 = vmatprep.subr.bf16.mxu0 %v8752_v49 }
 0x13d   :  { %5114 = vmatpush1.bf16.msra.mxu0 %v8753_v18 }
 0x13e   :  { %5116 = vmatprep.subr.bf16.mxu0 %v8754_v59 }
 0x141   :  { %5118 = vmatpush1.bf16.msra.mxu0 %v8755_v34 }
 0x142   :  { %5120 = vmatprep.subr.bf16.mxu0 %v8756_v31 }
 0x145   :  { %5122 = vmatpush1.bf16.msra.mxu0 %v8757_v1 }
 0x146   :  { %5124 = vmatprep.subr.bf16.mxu0 %v8758_v26 }
 0x149   :  { %5126 = vmatpush1.bf16.msra.mxu0 %v8759_v30 }
 0x14a   :  { %5128 = vmatprep.subr.bf16.mxu0 %v8816_v28 }
 0x14d   :  { %5130 = vmatpush1.bf16.msra.mxu0 %v8822_v7 }
 0x14e   :  { %5132 = vmatprep.subr.bf16.mxu0 %v8762_v6 }
 0x151   :  { %5134 = vmatpush1.bf16.msra.mxu0 %v8833_v58 }
 0x152   :  { %5136 = vmatprep.subr.bf16.mxu0 %v8839_v48 }
 0x155   :  { %5138 = vmatpush1.bf16.msra.mxu0 %v8845_v2 }
 0x156   :  { %5140 = vmatprep.subr.bf16.mxu0 %v8851_v57 }
 0x159   :  { %5142 = vmatpush1.bf16.msra.mxu0 %v8857_v21 }
 0x15a   :  { %5144 = vmatprep.subr.bf16.mxu0 %v8863_v17 }
 0x15d   :  { %5146 = vmatpush1.bf16.msra.mxu0 %v8869_v24 }
 0x15e   :  { %5148 = vmatprep.subr.bf16.mxu0 %v8875_v33 }
 0x161   :  { %5150 = vmatpush1.bf16.msra.mxu0 %v8881_v35 }
 0x162   :  { %5152 = vmatprep.subr.bf16.mxu0 %v8887_v41 }
 0x165   :  { %5154 = vmatpush1.bf16.msra.mxu0 %v8893_v53 }
 0x166   :  { %5156 = vmatprep.subr.bf16.mxu0 %v6693_v0 }
 0x169   :  { %5158 = vmatpush1.bf16.msra.mxu0 %v6714_v3 }
 0x16c   :  { %1370 = vmatmul.mubr.f32.vlgmr.msra.gmra.mrb[0].mxu0 %v8901_v29 }
 0x1b4   :  { %v232_v62 = vpop.f32.mrb[0].mxu1 }
 0x1b5   :  { %v234_v50 = vpop.f32.mrb[1].mxu1 }
 0x23f   :  { %v1371_v54 = vpop.f32.mrb[0].mxu0 }
 0x240   :  { %v5879_v19 = vadd.f32 %v1371_v54, %v232_v62  ;;  %v1373_v23 = vpop.f32.mrb[1].mxu0 }
 0x241   :  { %v5880_v11 = vadd.f32 %v1373_v23, %v234_v50 }
 0x242   :  { %v7245_v14 = vsub.f32 %v8902_v43, %v5879_v19 }
 0x243   :  { %v7248_v56 = vsub.f32 %v8904_v4, %v5880_v11 }
 0x244   :  { %8903 = vst [vmem:[#allocation27_spill] sm:$0xff] %v7245_v14  ;;  %v1378_v52 = vmul.f32 %v7245_v14, %v7245_v14  ;;  %v8909_v14 = vld [vmem:[#allocation21_spill] sm:$0xff] }
 0x245   :  { %8905 = vst [vmem:[#allocation31_spill] sm:$0xff] %v7248_v56  ;;  %v1379_v20 = vmul.f32 %v7248_v56, %v7248_v56  ;;  %v8908_v56 = vld [vmem:[#allocation19_spill] sm:$0xff] }
 0x246   :  { %v7254_v37 = vand.u32 4294901760, %v1378_v52 }
 0x247   :  { %v7256_v29 = vand.u32 4294901760, %v1379_v20 }
 0x248   :  { %v7259_v62 = vsub.f32 %v1378_v52, %v7254_v37  ;;  %v8906_v52 = vld [vmem:[#allocation9_spill] sm:$0xff] }
 0x249   :  { %v7262_v50 = vsub.f32 %v1379_v20, %v7256_v29  ;;  %v8907_v20 = vld [vmem:[#allocation10_spill] sm:$0xff] }
 0x24a   :  { %v8537_v54 = vand.u32 4294901760, %v7259_v62 }
 0x24b   :  { %v1510_v4 = vand.u32 4294901760, %v7262_v50 }
 0x24c   :  { %v1517_v19 = vsub.f32 %v7259_v62, %v8537_v54  ;;  %v8911_v54 = vld [vmem:[#allocation29_spill] sm:$0xff] }
 0x24d   :  { %v1511_v23 = vsub.f32 %v7262_v50, %v1510_v4 }
 0x24e   :  { %v1518_v43 = vand.u32 4294901760, %v1517_v19  ;;  %v8914_v19 = vld [vmem:[#allocation41_spill] sm:$0xff] }
 0x24f   :  { %v1512_v11 = vand.u32 4294901760, %v1511_v23  ;;  %v8913_v23 = vld [vmem:[#allocation38_spill] sm:$0xff] }
 0x251   :  { %1513 = vmatprep.mubr.f32.mxu1 %v1512_v11  ;;  %v8915_v11 = vld [vmem:[#allocation43_spill] sm:$0xff] }
 0x252   :  { %1519 = vmatmul.mubr.f32.vlgmr.msra.gmra.mrb[2].mxu1 %v1518_v43  ;;  %v8916_v43 = vld [vmem:[#allocation46_spill] sm:$0xff] }
 0x253   :  { %5226 = vmatpush1.bf16.msra.mxu1 %v8906_v52  ;;  %1910 = vmatprep.mubr.f32.mxu1 %v7256_v29  ;;  %v8917_v52 = vld [vmem:[#allocation49_spill] sm:$0xff] }
 0x254   :  { %5228 = vmatprep.subr.bf16.mxu1 %v8907_v20  ;;  %v8918_v20 = vld [vmem:[#allocation52_spill] sm:$0xff] }
 0x257   :  { %5230 = vmatpush1.bf16.msra.mxu1 %v8908_v56  ;;  %v8919_v56 = vld [vmem:[#allocation55_spill] sm:$0xff] }
 0x258   :  { %5232 = vmatprep.subr.bf16.mxu1 %v8909_v14  ;;  %v8920_v14 = vld [vmem:[#allocation59_spill] sm:$0xff] }
 0x25b   :  { %5234 = vmatpush1.bf16.msra.mxu1 %v8910_v63  ;;  %v8921_v63 = vld [vmem:[#allocation63_spill] sm:$0xff] }
 0x25c   :  { %5236 = vmatprep.subr.bf16.mxu1 %v8911_v54  ;;  %v8922_v54 = vld [vmem:[#allocation67_spill] sm:$0xff] }
 0x25f   :  { %5238 = vmatpush1.bf16.msra.mxu1 %v8912_v51  ;;  %v8923_v51 = vld [vmem:[#allocation71_spill] sm:$0xff] }
 0x260   :  { %5240 = vmatprep.subr.bf16.mxu1 %v8913_v23  ;;  %v8924_v23 = vld [vmem:[#allocation75_spill] sm:$0xff] }
 0x263   :  { %5242 = vmatpush1.bf16.msra.mxu1 %v8914_v19  ;;  %v8925_v19 = vld [vmem:[#allocation79_spill] sm:$0xff] }
 0x264   :  { %5244 = vmatprep.subr.bf16.mxu1 %v8915_v11  ;;  %v8926_v11 = vld [vmem:[#allocation83_spill] sm:$0xff] }
 0x267   :  { %5246 = vmatpush1.bf16.msra.mxu1 %v8916_v43  ;;  %v8927_v43 = vld [vmem:[#allocation87_spill] sm:$0xff] }
 0x268   :  { %5248 = vmatprep.subr.bf16.mxu1 %v8917_v52  ;;  %v8928_v52 = vld [vmem:[#allocation91_spill] sm:$0xff] }
 0x26b   :  { %5250 = vmatpush1.bf16.msra.mxu1 %v8918_v20  ;;  %v8929_v20 = vld [vmem:[#allocation95_spill] sm:$0xff] }
 0x26c   :  { %5252 = vmatprep.subr.bf16.mxu1 %v8919_v56  ;;  %v8930_v56 = vld [vmem:[#allocation99_spill] sm:$0xff] }
 0x26f   :  { %5254 = vmatpush1.bf16.msra.mxu1 %v8920_v14  ;;  %v8931_v14 = vld [vmem:[#allocation103_spill] sm:$0xff] }
 0x270   :  { %5256 = vmatprep.subr.bf16.mxu1 %v8921_v63  ;;  %v8932_v63 = vld [vmem:[#allocation107_spill] sm:$0xff] }
 0x273   :  { %5258 = vmatpush1.bf16.msra.mxu1 %v8922_v54  ;;  %v8933_v54 = vld [vmem:[#allocation112_spill] sm:$0xff] }
 0x274   :  { %5260 = vmatprep.subr.bf16.mxu1 %v8923_v51  ;;  %v8934_v51 = vld [vmem:[#allocation115_spill] sm:$0xff] }
 0x277   :  { %5262 = vmatpush1.bf16.msra.mxu1 %v8924_v23  ;;  %v8935_v23 = vld [vmem:[#allocation117_spill] sm:$0xff] }
 0x278   :  { %5264 = vmatprep.subr.bf16.mxu1 %v8925_v19  ;;  %v8936_v19 = vld [vmem:[#allocation127_spill] sm:$0xff] }
 0x27b   :  { %5266 = vmatpush1.bf16.msra.mxu1 %v8926_v11  ;;  %v8937_v11 = vld [vmem:[#allocation118_spill] sm:$0xff] }
 0x27c   :  { %5268 = vmatprep.subr.bf16.mxu1 %v8927_v43  ;;  %v8938_v43 = vld [vmem:[#allocation120_spill] sm:$0xff] }
 0x27f   :  { %5270 = vmatpush1.bf16.msra.mxu1 %v8928_v52  ;;  %v8939_v52 = vld [vmem:[#allocation121_spill] sm:$0xff] }
 0x280   :  { %5272 = vmatprep.subr.bf16.mxu1 %v8929_v20  ;;  %v8940_v20 = vld [vmem:[#allocation6_spill] sm:$0xff] }
 0x283   :  { %5274 = vmatpush1.bf16.msra.mxu1 %v8930_v56  ;;  %v8941_v56 = vld [vmem:[#allocation7_spill] sm:$0xff] }
 0x284   :  { %5276 = vmatprep.subr.bf16.mxu1 %v8931_v14  ;;  %v8942_v14 = vld [vmem:[#allocation12_spill] sm:$0xff] }
 0x287   :  { %5278 = vmatpush1.bf16.msra.mxu1 %v8932_v63  ;;  %v8943_v63 = vld [vmem:[#allocation13_spill] sm:$0xff] }
 0x288   :  { %5280 = vmatprep.subr.bf16.mxu1 %v8933_v54  ;;  %v8944_v54 = vld [vmem:[#allocation14_spill] sm:$0xff] }
 0x28b   :  { %5282 = vmatpush1.bf16.msra.mxu1 %v8934_v51  ;;  %v8945_v51 = vld [vmem:[#allocation16_spill] sm:$0xff] }
 0x28c   :  { %5284 = vmatprep.subr.bf16.mxu1 %v8935_v23  ;;  %v8946_v23 = vld [vmem:[#allocation18_spill] sm:$0xff] }
 0x28f   :  { %5286 = vmatpush1.bf16.msra.mxu1 %v8936_v19  ;;  %v8947_v19 = vld [vmem:[#allocation20_spill] sm:$0xff] }
 0x290   :  { %5288 = vmatprep.subr.bf16.mxu1 %v8937_v11  ;;  %v8948_v11 = vld [vmem:[#allocation22_spill] sm:$0xff] }
 0x292   :  { %1912 = vmatmul.mubr.f32.vlgmr.msra.gmra.mrb[2].mxu1 %v7254_v37 }
 0x293   :  { %5290 = vmatpush1.bf16.msra.mxu1 %v8938_v43  ;;  %2112 = vmatprep.mubr.f32.mxu1 %v7262_v50  ;;  %v8949_v43 = vld [vmem:[#allocation122_spill] sm:$0xff]  ;;  %v8969_v50 = vand.u32 4294901760, %v7259_v62 }
 0x294   :  { %5292 = vmatprep.subr.bf16.mxu1 %v8939_v52  ;;  %v8950_v52 = vld [vmem:[#allocation123_spill] sm:$0xff] }
 0x297   :  { %5294 = vmatpush1.bf16.msra.mxu1 %v8940_v20  ;;  %v8951_v20 = vld [vmem:[#allocation124_spill] sm:$0xff] }
 0x298   :  { %5296 = vmatprep.subr.bf16.mxu1 %v8941_v56  ;;  %v8952_v56 = vld [vmem:[#allocation125_spill] sm:$0xff] }
 0x29b   :  { %5298 = vmatpush1.bf16.msra.mxu1 %v8942_v14  ;;  %v8953_v14 = vld [vmem:[#allocation126_spill] sm:$0xff] }
 0x29c   :  { %5300 = vmatprep.subr.bf16.mxu1 %v8943_v63  ;;  %v8954_v63 = vld [vmem:[#allocation128_spill] sm:$0xff] }
 0x29f   :  { %5302 = vmatpush1.bf16.msra.mxu1 %v8944_v54  ;;  %v8955_v54 = vld [vmem:[#allocation129_spill] sm:$0xff] }
 0x2a0   :  { %5304 = vmatprep.subr.bf16.mxu1 %v8945_v51  ;;  %v8956_v51 = vld [vmem:[#allocation130_spill] sm:$0xff] }
 0x2a3   :  { %5306 = vmatpush1.bf16.msra.mxu1 %v8946_v23  ;;  %v8957_v23 = vld [vmem:[#allocation131_spill] sm:$0xff] }
 0x2a4   :  { %5308 = vmatprep.subr.bf16.mxu1 %v8947_v19  ;;  %v8958_v19 = vld [vmem:[#allocation132_spill] sm:$0xff] }
 0x2a7   :  { %5310 = vmatpush1.bf16.msra.mxu1 %v8948_v11  ;;  %v8959_v11 = vld [vmem:[#allocation133_spill] sm:$0xff] }
 0x2a8   :  { %5312 = vmatprep.subr.bf16.mxu1 %v8949_v43  ;;  %v8960_v43 = vld [vmem:[#allocation134_spill] sm:$0xff] }
 0x2ab   :  { %5314 = vmatpush1.bf16.msra.mxu1 %v8950_v52  ;;  %v8961_v52 = vld [vmem:[#allocation135_spill] sm:$0xff] }
 0x2ac   :  { %5316 = vmatprep.subr.bf16.mxu1 %v8951_v20  ;;  %v8962_v20 = vld [vmem:[#allocation136_spill] sm:$0xff] }
 0x2af   :  { %5318 = vmatpush1.bf16.msra.mxu1 %v8952_v56  ;;  %v8963_v56 = vld [vmem:[#allocation137_spill] sm:$0xff] }
 0x2b0   :  { %5320 = vmatprep.subr.bf16.mxu1 %v8953_v14  ;;  %v8964_v14 = vld [vmem:[#allocation138_spill] sm:$0xff] }
 0x2b3   :  { %5322 = vmatpush1.bf16.msra.mxu1 %v8954_v63  ;;  %v8965_v63 = vld [vmem:[#allocation139_spill] sm:$0xff] }
 0x2b4   :  { %5324 = vmatprep.subr.bf16.mxu1 %v8955_v54  ;;  %v8966_v54 = vld [vmem:[#allocation140_spill] sm:$0xff] }
 0x2b7   :  { %5326 = vmatpush1.bf16.msra.mxu1 %v8956_v51  ;;  %v8967_v51 = vld [vmem:[#allocation141_spill] sm:$0xff] }
 0x2b8   :  { %5328 = vmatprep.subr.bf16.mxu1 %v8957_v23  ;;  %v8968_v23 = vld [vmem:[#allocation142_spill] sm:$0xff] }
 0x2bb   :  { %5330 = vmatpush1.bf16.msra.mxu1 %v8958_v19  ;;  %v2685_v19 = vld [vmem:[%s8251_s1 + $0x88] sm:$0xff] }
 0x2bc   :  { %5332 = vmatprep.subr.bf16.mxu1 %v8959_v11  ;;  %v2668_v11 = vld [vmem:[%s8251_s1] sm:$0xff] }
 0x2bf   :  { %5334 = vmatpush1.bf16.msra.mxu1 %v8960_v43  ;;  %v2708_v43 = vand.u32 4294901760, %v2668_v11 }
 0x2c0   :  { %5336 = vmatprep.subr.bf16.mxu1 %v8961_v52  ;;  %v2686_v52 = vld [vmem:[%s8251_s1 + $0x90] sm:$0xff] }
 0x2c3   :  { %5338 = vmatpush1.bf16.msra.mxu1 %v8962_v20  ;;  %v2687_v20 = vld [vmem:[%s8251_s1 + $0x98] sm:$0xff] }
 0x2c4   :  { %5340 = vmatprep.subr.bf16.mxu1 %v8963_v56 }
 0x2c7   :  { %5342 = vmatpush1.bf16.msra.mxu1 %v8964_v14  ;;  %v2762_v14 = vand.u32 4294901760, %v2686_v52 }
 0x2c8   :  { %5344 = vmatprep.subr.bf16.mxu1 %v8965_v63  ;;  %v2765_v63 = vand.u32 4294901760, %v2687_v20 }
 0x2cb   :  { %5346 = vmatpush1.bf16.msra.mxu1 %v8966_v54  ;;  %v7405_v54 = vld [vmem:[%s8251_s1 + $0x18] sm:$0xff] }
 0x2cc   :  { %5348 = vmatprep.subr.bf16.mxu1 %v8967_v51 }
 0x2cf   :  { %5350 = vmatpush1.bf16.msra.mxu1 %v8968_v23 }
 0x2d0   :  { %5352 = vmatprep.subr.bf16.mxu1 %v8900_v38 }
 0x2d2   :  { %2115 = vmatmul.mubr.f32.vlgmr.msra.gmra.mrb[2].mxu1 %v7259_v62  ;;  %v2759_v62 = vand.u32 4294901760, %v2685_v19 }
 0x2d3   :  { %5354 = vmatpush1.bf16.msra.mxu1 %v8745_v39  ;;  %2252 = vmatprep.mubr.f32.mxu1 %v1510_v4  ;;  %v2684_v4 = vld [vmem:[%s8251_s1 + $0x80] sm:$0xff] }
 0x2d4   :  { %5356 = vmatprep.subr.bf16.mxu1 %v8746_v27  ;;  %v7409_v23 = vsub.f32 %v2685_v19, %v2759_v62  ;;  %v7430_v19 = vld [vmem:[%s8251_s1 + $0xa8] sm:$0xff] }
 0x2d6   :  { %8970 = vst [vmem:[#allocation35_spill] sm:$0xff] %v7409_v23 }
 0x2d7   :  { %5358 = vmatpush1.bf16.msra.mxu1 %v8747_v22 }
 0x2d8   :  { %5360 = vmatprep.subr.bf16.mxu1 %v8748_v46 }
 0x2db   :  { %5362 = vmatpush1.bf16.msra.mxu1 %v8749_v32 }
 0x2dc   :  { %5364 = vmatprep.subr.bf16.mxu1 %v8750_v8 }
 0x2df   :  { %5366 = vmatpush1.bf16.msra.mxu1 %v8751_v45 }
 0x2e0   :  { %5368 = vmatprep.subr.bf16.mxu1 %v8752_v49 }
 0x2e3   :  { %5370 = vmatpush1.bf16.msra.mxu1 %v8753_v18 }
 0x2e4   :  { %5372 = vmatprep.subr.bf16.mxu1 %v8754_v59 }
 0x2e7   :  { %5374 = vmatpush1.bf16.msra.mxu1 %v8755_v34 }
 0x2e8   :  { %5376 = vmatprep.subr.bf16.mxu1 %v8756_v31 }
 0x2eb   :  { %5378 = vmatpush1.bf16.msra.mxu1 %v8757_v1 }
 0x2ec   :  { %5380 = vmatprep.subr.bf16.mxu1 %v8758_v26 }
 0x2ef   :  { %5382 = vmatpush1.bf16.msra.mxu1 %v8759_v30 }
 0x2f0   :  { %5384 = vmatprep.subr.bf16.mxu1 %v8816_v28 }
 0x2f3   :  { %5386 = vmatpush1.bf16.msra.mxu1 %v8822_v7 }
 0x2f4   :  { %5388 = vmatprep.subr.bf16.mxu1 %v8762_v6 }
 0x2f7   :  { %5390 = vmatpush1.bf16.msra.mxu1 %v8833_v58 }
 0x2f8   :  { %5392 = vmatprep.subr.bf16.mxu1 %v8839_v48 }
 0x2fb   :  { %5394 = vmatpush1.bf16.msra.mxu1 %v8845_v2 }
 0x2fc   :  { %5396 = vmatprep.subr.bf16.mxu1 %v8851_v57 }
 0x2ff   :  { %5398 = vmatpush1.bf16.msra.mxu1 %v8857_v21 }
 0x300   :  { %5400 = vmatprep.subr.bf16.mxu1 %v8863_v17 }
 0x303   :  { %5402 = vmatpush1.bf16.msra.mxu1 %v8869_v24 }
 0x304   :  { %5404 = vmatprep.subr.bf16.mxu1 %v8875_v33 }
 0x307   :  { %5406 = vmatpush1.bf16.msra.mxu1 %v8881_v35  ;;  %v7424_v35 = vsub.f32 %v2687_v20, %v2765_v63 }
 0x308   :  { %5408 = vmatprep.subr.bf16.mxu1 %v8887_v41  ;;  %v7422_v41 = vsub.f32 %v2686_v52, %v2762_v14 }
 0x30a   :  { %v5611_v24 = vpack.c.bf16 %v7424_v35, %v7422_v41 }
 0x30b   :  { %5410 = vmatpush1.bf16.msra.mxu1 %v8893_v53 }
 0x30c   :  { %5412 = vmatprep.subr.bf16.mxu1 %v6693_v0  ;;  %v7417_v0 = vld [vmem:[%s8251_s1 + $0xa0] sm:$0xff] }
 0x30f   :  { %5414 = vmatpush1.bf16.msra.mxu1 %v6714_v3 }
 0x310   :  { %5416 = vmatprep.subr.bf16.mxu1 %v6954_v44  ;;  %v2756_v44 = vand.u32 4294901760, %v2684_v4 }
 0x312   :  { %2256 = vmatmul.mubr.f32.vlgmr.msra.gmra.mrb[2].mxu1 %v8969_v50  ;;  %v7407_v51 = vsub.f32 %v2684_v4, %v2756_v44  ;;  %v7411_v50 = vsub.f32 %v2668_v11, %v2708_v43  ;;  %v7435_v11 = vld [vmem:[%s8251_s1 + $0x20] sm:$0xff]  ;;  %v7450_v20 = vpack.c.bf16 %v2759_v62, %v2756_v44 }
 0x313   :  { %5418 = vmatpush1.bf16.msra.mxu1 %v6962_v10  ;;  %2519 = vmatprep.mubr.f32.mxu1 %v7256_v29  ;;  %v2669_v10 = vld [vmem:[%s8251_s1 + $0x8] sm:$0xff]  ;;  %v2720_v44 = vand.u32 4294901760, %v7435_v11 }
 0x314   :  { %5420 = vmatprep.subr.bf16.mxu1 %v6969_v61  ;;  %v2711_v56 = vand.u32 4294901760, %v2669_v10  ;;  %v7400_v61 = vld [vmem:[%s8251_s1 + $0x10] sm:$0xff] }
 0x315   :  { %v8549_v3 = vand.u32 4294901760, %v7400_v61 }
 0x316   :  { %v7420_v53 = vsub.f32 %v2669_v10, %v2711_v56  ;;  %v5607_v10 = vpack.c.bf16 %v7409_v23, %v7407_v51  ;;  %v7452_v4 = vpack.c.bf16 %v2711_v56, %v2708_v43  ;;  %v2768_v23 = vand.u32 4294901760, %v7417_v0 }
 0x317   :  { %5422 = vmatpush1.bf16.msra.mxu1 %v6977_v42  ;;  %v7440_v42 = vld [vmem:[%s8251_s1 + $0x28] sm:$0xff]  ;;  %v7448_v52 = vsub.f32 %v7400_v61, %v8549_v3  ;;  %v2771_v3 = vand.u32 4294901760, %v7430_v19  ;;  %v7467_v43 = vpack.c.bf16 %v2765_v63, %v2762_v14  ;;  %v8976_v63 = vld [vmem:[#allocation32_spill] sm:$0xff] }
 0x318   :  { %5424 = vmatprep.subr.bf16.mxu1 %v6985_v12  ;;  %v5609_v33 = vpack.c.bf16 %v7420_v53, %v7411_v50  ;;  %v8971_v12 = vand.u32 4294901760, %v7405_v54  ;;  %5608 = vmatprep.subr.bf16.mxu0 %v5607_v10  ;;  %v2723_v62 = vand.u32 4294901760, %v7440_v42 }
 0x319   :  { %v7481_v10 = vsub.f32 %v7430_v19, %v2771_v3 }
 0x31a   :  { %v7461_v17 = vsub.f32 %v7405_v54, %v8971_v12  ;;  %5610 = vmatpush3.bf16.msra.mxu0 %v5609_v33  ;;  %v7475_v12 = vsub.f32 %v7417_v0, %v2768_v23  ;;  %v7491_v33 = vsub.f32 %v7440_v42, %v2723_v62  ;;  %v2694_v0 = vld [vmem:[%s8251_s1 + $0xd0] sm:$0xff] }
 0x31b   :  { %5426 = vmatpush1.bf16.msra.mxu1 %v6994_v5  ;;  %5612 = vmatprep.subr.bf16.mxu0 %v5611_v24  ;;  %v7486_v5 = vsub.f32 %v7435_v11, %v2720_v44  ;;  %v8973_v24 = vld [vmem:[#allocation25_spill] sm:$0xff]  ;;  %v2786_v19 = vand.u32 4294901760, %v2694_v0  ;;  %v2678_v42 = vld [vmem:[%s8251_s1 + $0x50] sm:$0xff] }
 0x31c   :  { %v5613_v56 = vpack.c.bf16 %v7461_v17, %v7448_v52  ;;  %5428 = vmatprep.subr.bf16.mxu1 %v7002_v16  ;;  %v5615_v14 = vpack.c.bf16 %v7481_v10, %v7475_v12 }
 0x31d   :  { %v5617_v16 = vpack.c.bf16 %v7491_v33, %v7486_v5 }
 0x31e   :  { %5614 = vmatpush3.bf16.msra.mxu0 %v5613_v56  ;;  %v8983_v56 = vld [vmem:[#allocation5_spill] sm:$0xff] }
 0x31f   :  { %5430 = vmatpush1.bf16.msra.mxu1 %v7010_v40  ;;  %5616 = vmatprep.subr.bf16.mxu0 %v5615_v14  ;;  %v8972_v40 = vld [vmem:[#allocation24_spill] sm:$0xff]  ;;  %v8984_v14 = vld [vmem:[#allocation11_spill] sm:$0xff] }
 0x320   :  { %5432 = vmatprep.subr.bf16.mxu1 %v7018_v55  ;;  %v8974_v55 = vld [vmem:[#allocation28_spill] sm:$0xff] }
 0x322   :  { %5618 = vmatpush3.bf16.msra.mxu0 %v5617_v16  ;;  %v8985_v16 = vld [vmem:[#allocation15_spill] sm:$0xff] }
 0x323   :  { %5434 = vmatpush1.bf16.msra.mxu1 %v7026_v60  ;;  %v8975_v60 = vld [vmem:[#allocation30_spill] sm:$0xff] }
 0x324   :  { %5436 = vmatprep.subr.bf16.mxu1 %v7034_v47  ;;  %v8977_v47 = vld [vmem:[#allocation33_spill] sm:$0xff] }
 0x327   :  { %5438 = vmatpush1.bf16.msra.mxu1 %v7042_v9  ;;  %v8978_v9 = vld [vmem:[#allocation36_spill] sm:$0xff] }
 0x328   :  { %5440 = vmatprep.subr.bf16.mxu1 %v7050_v36  ;;  %v8979_v36 = vld [vmem:[#allocation37_spill] sm:$0xff] }
 0x32b   :  { %5442 = vmatpush1.bf16.msra.mxu1 %v7058_v13  ;;  %v8980_v13 = vld [vmem:[#allocation40_spill] sm:$0xff] }
 0x32c   :  { %5444 = vmatprep.subr.bf16.mxu1 %v7066_v15  ;;  %v8981_v15 = vld [vmem:[#allocation3_spill] sm:$0xff] }
 0x32f   :  { %5446 = vmatpush1.bf16.msra.mxu1 %v7074_v25  ;;  %v8982_v25 = vld [vmem:[#allocation4_spill] sm:$0xff] }
 0x330   :  { %5448 = vmatprep.subr.bf16.mxu1 %v8972_v40  ;;  %v8986_v40 = vld [vmem:[#allocation17_spill] sm:$0xff] }
 0x333   :  { %5450 = vmatpush1.bf16.msra.mxu1 %v8973_v24  ;;  %v8987_v24 = vld [vmem:[#allocation23_spill] sm:$0xff] }
 0x334   :  { %5452 = vmatprep.subr.bf16.mxu1 %v8974_v55 }
 0x337   :  { %5454 = vmatpush1.bf16.msra.mxu1 %v8975_v60  ;;  %v2677_v60 = vld [vmem:[%s8251_s1 + $0x48] sm:$0xff] }
 0x338   :  { %5456 = vmatprep.subr.bf16.mxu1 %v8976_v63 }
 0x33b   :  { %5458 = vmatpush1.bf16.msra.mxu1 %v8977_v47 }
 0x33c   :  { %5460 = vmatprep.subr.bf16.mxu1 %v8978_v9  ;;  %v2735_v9 = vand.u32 4294901760, %v2677_v60 }
 0x33f   :  { %5462 = vmatpush1.bf16.msra.mxu1 %v8979_v36  ;;  %v7607_v36 = vpack.c.bf16 %v2771_v3, %v2768_v23  ;;  %v2695_v3 = vld [vmem:[%s8251_s1 + $0xd8] sm:$0xff] }
 0x340   :  { %5464 = vmatprep.subr.bf16.mxu1 %v8980_v13  ;;  %v2789_v11 = vand.u32 4294901760, %v2695_v3 }
 0x343   :  { %5466 = vmatpush1.bf16.msra.mxu1 %v8981_v15 }
 0x344   :  { %5468 = vmatprep.subr.bf16.mxu1 %v8982_v25  ;;  %v7617_v25 = vpack.c.bf16 %v2723_v62, %v2720_v44  ;;  %v2679_v44 = vld [vmem:[%s8251_s1 + $0x58] sm:$0xff] }
 0x347   :  { %5470 = vmatpush1.bf16.msra.mxu1 %v8983_v56 }
 0x348   :  { %5472 = vmatprep.subr.bf16.mxu1 %v8984_v14  ;;  %v7621_v14 = vsub.f32 %v2677_v60, %v2735_v9 }
 0x34b   :  { %5474 = vmatpush1.bf16.msra.mxu1 %v8985_v16 }
 0x34c   :  { %5476 = vmatprep.subr.bf16.mxu1 %v8986_v40 }
 0x34f   :  { %5478 = vmatpush1.bf16.msra.mxu1 %v8987_v24  ;;  %v2738_v24 = vand.u32 4294901760, %v2678_v42 }
 0x350   :  { %5480 = vmatprep.subr.bf16.mxu1 %v8900_v38  ;;  %v2693_v38 = vld [vmem:[%s8251_s1 + $0xc8] sm:$0xff] }
 0x351   :  { %v2783_v55 = vand.u32 4294901760, %v2693_v38 }
 0x352   :  { %2521 = vmatmul.mubr.f32.vlgmr.msra.gmra.mrb[2].mxu1 %v7254_v37 }
 0x353   :  { %5482 = vmatpush1.bf16.msra.mxu1 %v8745_v39  ;;  %2656 = vmatprep.mubr.f32.mxu1 %v7256_v29  ;;  %v8993_v39 = vld [vmem:[#allocation104_spill] sm:$0xff]  ;;  %v7611_v15 = vsub.f32 %v2693_v38, %v2783_v55 }
 0x354   :  { %5484 = vmatprep.subr.bf16.mxu1 %v8746_v27  ;;  %v8995_v27 = vld [vmem:[#allocation113_spill] sm:$0xff] }
 0x357   :  { %5486 = vmatpush1.bf16.msra.mxu1 %v8747_v22  ;;  %v2690_v22 = vld [vmem:[%s8251_s1 + $0xb0] sm:$0xff] }
 0x358   :  { %5488 = vmatprep.subr.bf16.mxu1 %v8748_v46  ;;  %v8988_v46 = vld [vmem:[#allocation84_spill] sm:$0xff] }
 0x35b   :  { %5490 = vmatpush1.bf16.msra.mxu1 %v8749_v32  ;;  %v2691_v32 = vld [vmem:[%s8251_s1 + $0xb8] sm:$0xff] }
 0x35c   :  { %5492 = vmatprep.subr.bf16.mxu1 %v8750_v8  ;;  %v8994_v8 = vld [vmem:[#allocation109_spill] sm:$0xff] }
 0x35f   :  { %5494 = vmatpush1.bf16.msra.mxu1 %v8751_v45  ;;  %v8992_v45 = vld [vmem:[#allocation100_spill] sm:$0xff] }
 0x360   :  { %5496 = vmatprep.subr.bf16.mxu1 %v8752_v49  ;;  %v2774_v49 = vand.u32 4294901760, %v2690_v22 }
 0x363   :  { %5498 = vmatpush1.bf16.msra.mxu1 %v8753_v18 }
 0x364   :  { %5500 = vmatprep.subr.bf16.mxu1 %v8754_v59  ;;  %v8991_v59 = vld [vmem:[#allocation96_spill] sm:$0xff] }
 0x367   :  { %5502 = vmatpush1.bf16.msra.mxu1 %v8755_v34  ;;  %v8990_v34 = vld [vmem:[#allocation92_spill] sm:$0xff] }
 0x368   :  { %5504 = vmatprep.subr.bf16.mxu1 %v8756_v31  ;;  %v8989_v31 = vld [vmem:[#allocation88_spill] sm:$0xff] }
 0x36b   :  { %5506 = vmatpush1.bf16.msra.mxu1 %v8757_v1  ;;  %v2675_v1 = vld [vmem:[%s8251_s1 + $0x38] sm:$0xff] }
 0x36c   :  { %5508 = vmatprep.subr.bf16.mxu1 %v8758_v26  ;;  %v2777_v26 = vand.u32 4294901760, %v2691_v32  ;;  %v2729_v18 = vand.u32 4294901760, %v2675_v1 }
 0x36e   :  { %v7641_v16 = vpack.c.bf16 %v2777_v26, %v2774_v49 }
 0x36f   :  { %5510 = vmatpush1.bf16.msra.mxu1 %v8759_v30  ;;  %v2674_v30 = vld [vmem:[%s8251_s1 + $0x30] sm:$0xff] }
 0x370   :  { %5512 = vmatprep.subr.bf16.mxu1 %v8816_v28  ;;  %v7572_v28 = vsub.f32 %v2690_v22, %v2774_v49  ;;  %v7664_v22 = vsub.f32 %v2678_v42, %v2738_v24 }
 0x373   :  { %5514 = vmatpush1.bf16.msra.mxu1 %v8822_v7  ;;  %v8996_v7 = vand.u32 4294901760, %v7400_v61 }
 0x374   :  { %5516 = vmatprep.subr.bf16.mxu1 %v8762_v6  ;;  %v2726_v6 = vand.u32 4294901760, %v2674_v30 }
 0x376   :  { %v7643_v40 = vpack.c.bf16 %v2729_v18, %v2726_v6 }
 0x377   :  { %5518 = vmatpush1.bf16.msra.mxu1 %v8833_v58  ;;  %v8997_v58 = vand.u32 4294901760, %v7405_v54  ;;  %v2676_v54 = vld [vmem:[%s8251_s1 + $0x40] sm:$0xff] }
 0x378   :  { %5520 = vmatprep.subr.bf16.mxu1 %v8839_v48  ;;  %v2732_v47 = vand.u32 4294901760, %v2676_v54 }
 0x379   :  { %v7580_v48 = vpack.c.bf16 %v8997_v58, %v8996_v7  ;;  %v2699_v7 = vld [vmem:[%s8251_s1 + $0xf8] sm:$0xff]  ;;  %v2682_v58 = vld [vmem:[%s8251_s1 + $0x70] sm:$0xff] }
 0x37a   :  { %v7619_v56 = vsub.f32 %v2676_v54, %v2732_v47  ;;  %v7683_v38 = vpack.c.bf16 %v2735_v9, %v2732_v47  ;;  %v2801_v9 = vand.u32 4294901760, %v2699_v7 }
 0x37b   :  { %5522 = vmatpush1.bf16.msra.mxu1 %v8845_v2  ;;  %v7582_v2 = vsub.f32 %v2674_v30, %v2726_v6 }
 0x37c   :  { %5524 = vmatprep.subr.bf16.mxu1 %v8851_v57  ;;  %v7584_v57 = vsub.f32 %v2675_v1, %v2729_v18  ;;  %v5625_v62 = vpack.c.bf16 %v7621_v14, %v7619_v56 }
 0x37e   :  { %v5621_v63 = vpack.c.bf16 %v7584_v57, %v7582_v2 }
 0x37f   :  { %5526 = vmatpush1.bf16.msra.mxu1 %v8857_v21  ;;  %v2692_v21 = vld [vmem:[%s8251_s1 + $0xc0] sm:$0xff] }
 0x380   :  { %5528 = vmatprep.subr.bf16.mxu1 %v8988_v46  ;;  %v2780_v61 = vand.u32 4294901760, %v2692_v21  ;;  %v2696_v46 = vld [vmem:[%s8251_s1 + $0xe0] sm:$0xff] }
 0x382   :  { %v7609_v13 = vsub.f32 %v2692_v21, %v2780_v61  ;;  %v2683_v21 = vld [vmem:[%s8251_s1 + $0x78] sm:$0xff] }
 0x383   :  { %5530 = vmatpush1.bf16.msra.mxu1 %v8989_v31  ;;  %v2697_v31 = vld [vmem:[%s8251_s1 + $0xe8] sm:$0xff] }
 0x384   :  { %5532 = vmatprep.subr.bf16.mxu1 %v8990_v34  ;;  %v5623_v23 = vpack.c.bf16 %v7611_v15, %v7609_v13  ;;  %v2680_v34 = vld [vmem:[%s8251_s1 + $0x60] sm:$0xff]  ;;  %v2795_v49 = vand.u32 4294901760, %v2697_v31 }
 0x385   :  { %v2744_v6 = vand.u32 4294901760, %v2680_v34 }
 0x387   :  { %5534 = vmatpush1.bf16.msra.mxu1 %v8991_v59  ;;  %v7654_v59 = vsub.f32 %v2694_v0, %v2786_v19  ;;  %v7694_v60 = vsub.f32 %v2680_v34, %v2744_v6 }
 0x388   :  { %5536 = vmatprep.subr.bf16.mxu1 %v8992_v45  ;;  %v7656_v45 = vsub.f32 %v2695_v3, %v2789_v11  ;;  %v2750_v3 = vand.u32 4294901760, %v2682_v58 }
 0x38a   :  { %v5627_v30 = vpack.c.bf16 %v7656_v45, %v7654_v59 }
 0x38b   :  { %5538 = vmatpush1.bf16.msra.mxu1 %v8993_v39  ;;  %v2741_v39 = vand.u32 4294901760, %v2679_v44 }
 0x38c   :  { %5540 = vmatprep.subr.bf16.mxu1 %v8994_v8  ;;  %v7658_v8 = vpack.c.bf16 %v2783_v55, %v2780_v61  ;;  %v7687_v61 = vsub.f32 %v2697_v31, %v2795_v49  ;;  %v7689_v55 = vpack.c.bf16 %v2789_v11, %v2786_v19 }
 0x38d   :  { %v7671_v1 = vsub.f32 %v2679_v44, %v2741_v39  ;;  %v7702_v11 = vpack.c.bf16 %v2741_v39, %v2738_v24  ;;  %v7707_v44 = vsub.f32 %v2699_v7, %v2801_v9 }
 0x38e   :  { %8998 = vst [vmem:[#allocation39_spill] sm:$0xff] %v7689_v55 }
 0x38f   :  { %5542 = vmatpush1.bf16.msra.mxu1 %v8995_v27  ;;  %v2681_v27 = vld [vmem:[%s8251_s1 + $0x68] sm:$0xff]  ;;  %v5629_v54 = vpack.c.bf16 %v7671_v1, %v7664_v22  ;;  %8999 = vst [vmem:[#allocation42_spill] sm:$0xff] %v7702_v11 }
 0x390   :  { %5544 = vmatprep.subr.bf16.mxu1 %v7450_v20  ;;  %v2747_v18 = vand.u32 4294901760, %v2681_v27 }
 0x392   :  { %2658 = vmatmul.mubr.f32.vlgmr.msra.gmra.mrb[2].mxu1 %v7254_v37  ;;  %v7574_v37 = vsub.f32 %v2691_v32, %v2777_v26  ;;  %v2792_v32 = vand.u32 4294901760, %v2696_v46  ;;  %v2698_v26 = vld [vmem:[%s8251_s1 + $0xf0] sm:$0xff]  ;;  %v7721_v39 = vpack.c.bf16 %v2747_v18, %v2744_v6 }
 0x393   :  { %5546 = vmatpush3.bf16.msra.mxu1 %v7452_v4  ;;  %v2798_v0 = vand.u32 4294901760, %v2698_v26 }
 0x394   :  { %5548 = vmatprep.subr.bf16.mxu1 %v7467_v43  ;;  %v5619_v29 = vpack.c.bf16 %v7574_v37, %v7572_v28  ;;  %v7714_v31 = vpack.c.bf16 %v2795_v49, %v2792_v32  ;;  %9001 = vst [vmem:[#allocation47_spill] sm:$0xff] %v7721_v39 }
 0x395   :  { %v7704_v42 = vsub.f32 %v2698_v26, %v2798_v0  ;;  %v9002_v26 = vld [vmem:[#allocation35_spill] sm:$0xff]  ;;  %v7727_v49 = vpack.c.bf16 %v2801_v9, %v2798_v0  ;;  %v2864_v0 = vand.u32 4294901760, %v7582_v2 }
 0x396   :  { %5620 = vmatprep.subr.bf16.mxu0 %v5619_v29  ;;  %v7685_v29 = vsub.f32 %v2696_v46, %v2792_v32  ;;  %9000 = vst [vmem:[#allocation44_spill] sm:$0xff] %v7714_v31 }
 0x397   :  { %5550 = vmatpush3.bf16.msra.mxu1 %v7580_v48  ;;  %5622 = vmatpush3.bf16.msra.mxu0 %v5621_v63  ;;  %v7696_v63 = vsub.f32 %v2681_v27, %v2747_v18  ;;  %v5635_v34 = vpack.c.bf16 %v7707_v44, %v7704_v42  ;;  %v2934_v27 = vand.u32 4294901760, %v7407_v51  ;;  %9003 = vst [vmem:[#allocation50_spill] sm:$0xff] %v7727_v49 }
 0x398   :  { %5552 = vmatprep.subr.bf16.mxu1 %v7607_v36  ;;  %5624 = vmatprep.subr.bf16.mxu0 %v5623_v23  ;;  %v5631_v47 = vpack.c.bf16 %v7687_v61, %v7685_v29  ;;  %v2753_v23 = vand.u32 4294901760, %v2683_v21 }
 0x399   :  { %v5633_v19 = vpack.c.bf16 %v7696_v63, %v7694_v60  ;;  %v2935_v7 = vsub.f32 %v7407_v51, %v2934_v27  ;;  %v2871_v51 = vand.u32 4294901760, %v7584_v57 }
 0x39a   :  { %v7711_v46 = vsub.f32 %v2683_v21, %v2753_v23 }
 0x39b   :  { %5554 = vmatpush3.bf16.msra.mxu1 %v7617_v25  ;;  %5626 = vmatpush3.bf16.msra.mxu0 %v5625_v62  ;;  %v7709_v62 = vsub.f32 %v2682_v58, %v2750_v3  ;;  %v7730_v58 = vpack.c.bf16 %v2753_v23, %v2750_v3  ;;  %v2936_v18 = vand.u32 4294901760, %v2935_v7  ;;  %v7741_v3 = vpack.c.bf16 %v2871_v51, %v2864_v0 }
 0x39c   :  { %5556 = vmatprep.subr.bf16.mxu1 %v7641_v16  ;;  %5628 = vmatprep.subr.bf16.mxu0 %v5627_v30  ;;  %v2941_v30 = vand.u32 4294901760, %v9002_v26  ;;  %v2990_v23 = vand.u32 4294901760, %v7609_v13  ;;  %v2865_v7 = vsub.f32 %v7582_v2, %v2864_v0 }
 0x39d   :  { %v5637_v24 = vpack.c.bf16 %v7711_v46, %v7709_v62  ;;  %9004 = vst [vmem:[#allocation60_spill] sm:$0xff] %v7730_v58 }
 0x39e   :  { %v5671_v32 = vpack.c.bf16 %v2941_v30, %v2934_v27  ;;  %v2942_v6 = vsub.f32 %v9002_v26, %v2941_v30  ;;  %v2885_v27 = vand.u32 4294901760, %v7621_v14 }
 0x39f   :  { %5558 = vmatpush3.bf16.msra.mxu1 %v7643_v40  ;;  %5630 = vmatpush3.bf16.msra.mxu0 %v5629_v54 }
 0x3a0   :  { %5560 = vmatprep.subr.bf16.mxu1 %v7658_v8  ;;  %5632 = vmatprep.subr.bf16.mxu0 %v5631_v47  ;;  %v2943_v21 = vand.u32 4294901760, %v2942_v6  ;;  %v2976_v47 = vand.u32 4294901760, %v7572_v28 }
 0x3a2   :  { %v5575_v54 = vpack.c.bf16 %v2943_v21, %v2936_v18  ;;  %v2977_v26 = vsub.f32 %v7572_v28, %v2976_v47  ;;  %v2872_v21 = vsub.f32 %v7584_v57, %v2871_v51  ;;  %v2892_v28 = vand.u32 4294901760, %v7664_v22 }
 0x3a3   :  { %5562 = vmatpush3.bf16.msra.mxu1 %v7683_v38  ;;  %5634 = vmatpush3.bf16.msra.mxu0 %v5633_v19  ;;  %v2983_v19 = vand.u32 4294901760, %v7574_v37 }
 0x3a4   :  { %5564 = vmatprep.subr.bf16.mxu1 %v7689_v55  ;;  %5636 = vmatprep.subr.bf16.mxu0 %v5635_v34  ;;  %v2997_v34 = vand.u32 4294901760, %v7611_v15  ;;  %v2978_v18 = vand.u32 4294901760, %v2977_v26  ;;  %v3018_v55 = vand.u32 4294901760, %v7685_v29 }
 0x3a5   :  { %v7739_v9 = vpack.c.bf16 %v2983_v19, %v2976_v47  ;;  %v2899_v47 = vand.u32 4294901760, %v7671_v1 }
 0x3a6   :  { %v7748_v30 = vpack.c.bf16 %v2997_v34, %v2990_v23  ;;  %v2998_v0 = vsub.f32 %v7611_v15, %v2997_v34  ;;  %v2913_v15 = vand.u32 4294901760, %v7696_v63 }
 0x3a7   :  { %5566 = vmatpush3.bf16.msra.mxu1 %v7702_v11  ;;  %5638 = vmatpush3.bf16.msra.mxu0 %v5637_v24  ;;  %v2878_v24 = vand.u32 4294901760, %v7619_v56  ;;  %v7768_v26 = vpack.c.bf16 %v2899_v47, %v2892_v28 }
 0x3a8   :  { %5568 = vmatprep.subr.bf16.mxu1 %v7714_v31  ;;  %5672 = vmatprep.subr.bf16.mxu0 %v5671_v32  ;;  %v2984_v32 = vsub.f32 %v7574_v37, %v2983_v19  ;;  %v2873_v31 = vand.u32 4294901760, %v2872_v21  ;;  %v2991_v37 = vsub.f32 %v7609_v13, %v2990_v23  ;;  %v2999_v21 = vand.u32 4294901760, %v2998_v0 }
 0x3a9   :  { %v7752_v6 = vpack.c.bf16 %v2885_v27, %v2878_v24  ;;  %v2879_v57 = vsub.f32 %v7619_v56, %v2878_v24  ;;  %v3025_v13 = vand.u32 4294901760, %v7687_v61 }
 0x3ab   :  { %5570 = vmatpush3.bf16.msra.mxu1 %v7721_v39  ;;  %v3011_v39 = vand.u32 4294901760, %v7656_v45  ;;  %v2880_v11 = vand.u32 4294901760, %v2879_v57 }
 0x3ac   :  { %5572 = vmatprep.subr.bf16.mxu1 %v7727_v49  ;;  %v3004_v49 = vand.u32 4294901760, %v7654_v59 }
 0x3ad   :  { %v3012_v34 = vsub.f32 %v7656_v45, %v3011_v39  ;;  %v2927_v45 = vand.u32 4294901760, %v7711_v46 }
 0x3ae   :  { %v7762_v2 = vpack.c.bf16 %v3011_v39, %v3004_v49  ;;  %v3005_v56 = vsub.f32 %v7654_v59, %v3004_v49  ;;  %v3039_v59 = vand.u32 4294901760, %v7707_v44 }
 0x3af   :  { %5574 = vmatpush3.bf16.msra.mxu1 %v7730_v58  ;;  %v2866_v58 = vand.u32 4294901760, %v2865_v7  ;;  %v2886_v7 = vsub.f32 %v7621_v14, %v2885_v27  ;;  %v2893_v14 = vsub.f32 %v7664_v22, %v2892_v28  ;;  %v3013_v0 = vand.u32 4294901760, %v3012_v34 }
 0x3b0   :  { %5576 = vmatprep.subr.bf16.mxu1 %v5575_v54  ;;  %v2985_v54 = vand.u32 4294901760, %v2984_v32  ;;  %v2992_v32 = vand.u32 4294901760, %v2991_v37  ;;  %v2900_v37 = vsub.f32 %v7671_v1, %v2899_v47  ;;  %v3019_v22 = vsub.f32 %v7685_v29, %v3018_v55 }
 0x3b1   :  { %v7766_v51 = vpack.c.bf16 %v2873_v31, %v2866_v58  ;;  %v2887_v23 = vand.u32 4294901760, %v2886_v7  ;;  %v7778_v58 = vpack.c.bf16 %v3025_v13, %v3018_v55  ;;  %v2894_v57 = vand.u32 4294901760, %v2893_v14 }
 0x3b2   :  { %v7760_v19 = vpack.c.bf16 %v2985_v54, %v2978_v18  ;;  %v2906_v18 = vand.u32 4294901760, %v7694_v60  ;;  %v7776_v31 = vpack.c.bf16 %v2999_v21, %v2992_v32  ;;  %v3006_v54 = vand.u32 4294901760, %v3005_v56 }
 0x3b3   :  { %v7782_v24 = vpack.c.bf16 %v2887_v23, %v2880_v11  ;;  %v3032_v7 = vand.u32 4294901760, %v7704_v42  ;;  %v2901_v49 = vand.u32 4294901760, %v2900_v37  ;;  %v2920_v32 = vand.u32 4294901760, %v7709_v62 }
 0x3b4   :  { %v7784_v27 = vpack.c.bf16 %v2913_v15, %v2906_v18  ;;  %v7792_v11 = vpack.c.bf16 %v3013_v0, %v3006_v54  ;;  %v3026_v28 = vsub.f32 %v7687_v61, %v3025_v13  ;;  %v2907_v1 = vsub.f32 %v7694_v60, %v2906_v18 }
 0x3b5   :  { %v7794_v39 = vpack.c.bf16 %v3039_v59, %v3032_v7  ;;  %v7798_v47 = vpack.c.bf16 %v2901_v49, %v2894_v57  ;;  %v7800_v21 = vpack.c.bf16 %v2927_v45, %v2920_v32  ;;  %v3020_v23 = vand.u32 4294901760, %v3019_v22  ;;  %v9005_v22 = vld [vmem:[#allocation27_spill] sm:$0xff] }
 0x3b6   :  { %v2914_v56 = vsub.f32 %v7696_v63, %v2913_v15  ;;  %v3027_v34 = vand.u32 4294901760, %v3026_v28  ;;  %v2908_v14 = vand.u32 4294901760, %v2907_v1  ;;  %v3033_v37 = vsub.f32 %v7704_v42, %v3032_v7 }
 0x3b7   :  { %v3040_v29 = vsub.f32 %v7707_v44, %v3039_v59  ;;  %v2921_v54 = vsub.f32 %v7709_v62, %v2920_v32  ;;  %v2928_v61 = vsub.f32 %v7711_v46, %v2927_v45  ;;  %v2822_v46 = vand.u32 4294901760, %v7411_v50 }
 0x3b8   :  { %v2915_v55 = vand.u32 4294901760, %v2914_v56  ;;  %v7807_v13 = vpack.c.bf16 %v3027_v34, %v3020_v23  ;;  %v3034_v60 = vand.u32 4294901760, %v3033_v37  ;;  %v2829_v32 = vand.u32 4294901760, %v7420_v53  ;;  %v9006_v23 = vld [vmem:[#allocation31_spill] sm:$0xff] }
 0x3b9   :  { %v3041_v18 = vand.u32 4294901760, %v3040_v29  ;;  %v2922_v57 = vand.u32 4294901760, %v2921_v54  ;;  %v2929_v49 = vand.u32 4294901760, %v2928_v61  ;;  %v2948_v1 = vand.u32 4294901760, %v7422_v41 }
 0x3ba   :  { %v7809_v0 = vpack.c.bf16 %v2915_v55, %v2908_v14  ;;  %v2955_v34 = vand.u32 4294901760, %v7424_v35  ;;  %v2823_v14 = vsub.f32 %v7411_v50, %v2822_v46  ;;  %v2830_v37 = vsub.f32 %v7420_v53, %v2829_v32 }
 0x3bb   :  { %v7811_v63 = vpack.c.bf16 %v3041_v18, %v3034_v60  ;;  %v7813_v15 = vpack.c.bf16 %v2929_v49, %v2922_v57  ;;  %v5673_v54 = vpack.c.bf16 %v2829_v32, %v2822_v46  ;;  %v2949_v61 = vsub.f32 %v7422_v41, %v2948_v1 }
 0x3bc   :  { %v2836_v18 = vand.u32 4294901760, %v7448_v52  ;;  %v2843_v57 = vand.u32 4294901760, %v7461_v17  ;;  %v2956_v49 = vsub.f32 %v7424_v35, %v2955_v34  ;;  %v5675_v53 = vpack.c.bf16 %v2955_v34, %v2948_v1 }
 0x3bd   :  { %v2969_v41 = vand.u32 4294901760, %v7481_v10  ;;  %v2950_v32 = vand.u32 4294901760, %v2949_v61 }
 0x3be   :  { %v2844_v35 = vsub.f32 %v7461_v17, %v2843_v57  ;;  %v2850_v17 = vand.u32 4294901760, %v7486_v5 }
 0x3bf   :  { %v2970_v1 = vsub.f32 %v7481_v10, %v2969_v41 }
 0x3c0   :  { %v2851_v10 = vsub.f32 %v7486_v5, %v2850_v17 }
 0x465   :  { %v2659_v42 = vpop.f32.mrb[2].mxu1 }
 0x466   :  { %v5881_v7 = vadd.f32 1e-05, %v2659_v42  ;;  %v2661_v44 = vpop.f32.mrb[3].mxu1  ;;  %v2824_v42 = vand.u32 4294901760, %v2823_v14 }
 0x467   :  { %v5882_v59 = vadd.f32 1e-05, %v2661_v44 }
 0x468   :  { %5915 = vrsqrt.f32 %v5881_v7  ;;  %v2831_v7 = vand.u32 4294901760, %v2830_v37 }
 0x469   :  { %5917 = vrsqrt.f32 %v5882_v59  ;;  %v2962_v59 = vand.u32 4294901760, %v7475_v12 }
 0x46a   :  { %v5577_v34 = vpack.c.bf16 %v2831_v7, %v2824_v42  ;;  %v2852_v42 = vand.u32 4294901760, %v2851_v10 }
 0x46b   :  { %v5679_v14 = vpack.c.bf16 %v2969_v41, %v2962_v59 }
 0x472   :  { %v5916_v62 = vpop.eup %5915 }
 0x473   :  { %v5918_v45 = vpop.eup %5917  ;;  %v2666_v28 = vmul.f32 %v5916_v62, %v9005_v22  ;;  %v2837_v62 = vsub.f32 %v7448_v52, %v2836_v18  ;;  %v2957_v22 = vand.u32 4294901760, %v2956_v49  ;;  %v5677_v52 = vpack.c.bf16 %v2843_v57, %v2836_v18 }
 0x474   :  { %v2667_v56 = vmul.f32 %v5918_v45, %v9006_v23 }
 0x475   :  { %v7823_v29 = vand.u32 4294901760, %v2666_v28  ;;  %v2838_v37 = vand.u32 4294901760, %v2837_v62  ;;  %v5579_v18 = vpack.c.bf16 %v2957_v22, %v2950_v32  ;;  %v3578_v62 = vld [vmem:[%s8252_s6 + $0x40] sm:$0xff]  ;;  %v3580_v22 = vld [vmem:[%s8252_s6 + $0x50] sm:$0xff] }
 0x476   :  { %v7825_v55 = vand.u32 4294901760, %v2667_v56  ;;  %v3611_v32 = vand.u32 4294901760, %v3578_v62 }
 0x477   :  { %v7829_v60 = vsub.f32 %v2666_v28, %v7823_v29  ;;  %v2963_v28 = vsub.f32 %v7475_v12, %v2962_v59  ;;  %v2845_v12 = vand.u32 4294901760, %v2844_v35 }
 0x478   :  { %v7835_v50 = vsub.f32 %v2667_v56, %v7825_v55  ;;  %v2857_v56 = vand.u32 4294901760, %v7491_v33  ;;  %v8010_v10 = vsub.f32 %v3578_v62, %v3611_v32 }
 0x479   :  { %v8562_v44 = vand.u32 4294901760, %v7829_v60  ;;  %v2964_v57 = vand.u32 4294901760, %v2963_v28  ;;  %v3581_v28 = vld [vmem:[%s8252_s6 + $0x58] sm:$0xff] }
 0x47a   :  { %3181 = vmatprep.mubr.f32.mxu0 %v7835_v50  ;;  %v8563_v46 = vand.u32 4294901760, %v7835_v50 }
 0x47b   :  { %3184 = vmatmul.mubr.f32.vlgmr.msra.gmra.mrb[2].mxu0 %v7829_v60  ;;  %v2812_v45 = vsub.f32 %v7829_v60, %v8562_v44  ;;  %v2971_v44 = vand.u32 4294901760, %v2970_v1  ;;  %v3617_v1 = vand.u32 4294901760, %v3580_v22 }
 0x47c   :  { %5674 = vmatpush3.bf16.msra.mxu0 %v5673_v54  ;;  %3458 = vmatprep.mubr.f32.mxu0 %v7825_v55  ;;  %v2806_v23 = vsub.f32 %v7835_v50, %v8563_v46  ;;  %v2858_v54 = vsub.f32 %v7491_v33, %v2857_v56  ;;  %v5681_v46 = vpack.c.bf16 %v2857_v56, %v2850_v17  ;;  %v9007_v33 = vand.u32 4294901760, %v7835_v50  ;;  %v3582_v17 = vld [vmem:[%s8252_s6 + $0x60] sm:$0xff]  ;;  %v3583_v56 = vld [vmem:[%s8252_s6 + $0x68] sm:$0xff] }
 0x47d   :  { %5676 = vmatprep.subr.bf16.mxu0 %v5675_v53  ;;  %v2813_v49 = vand.u32 4294901760, %v2812_v45  ;;  %v5581_v53 = vpack.c.bf16 %v2845_v12, %v2838_v37  ;;  %v5583_v59 = vpack.c.bf16 %v2971_v44, %v2964_v57  ;;  %v3585_v12 = vld [vmem:[%s8252_s6 + $0x78] sm:$0xff] }
 0x47e   :  { %v2807_v61 = vand.u32 4294901760, %v2806_v23  ;;  %v2859_v7 = vand.u32 4294901760, %v2858_v54 }
 0x480   :  { %5678 = vmatpush3.bf16.msra.mxu0 %v5677_v52  ;;  %2808 = vmatprep.mubr.f32.mxu1 %v2807_v61  ;;  %v5585_v5 = vpack.c.bf16 %v2859_v7, %v2852_v42  ;;  %v3620_v52 = vand.u32 4294901760, %v3581_v28  ;;  %v3584_v61 = vld [vmem:[%s8252_s6 + $0x70] sm:$0xff]  ;;  %v3632_v7 = vand.u32 4294901760, %v3585_v12 }
 0x481   :  { %2814 = vmatmul.mubr.f32.vlgmr.msra.gmra.mrb[4].mxu1 %v2813_v49  ;;  %5680 = vmatprep.subr.bf16.mxu0 %v5679_v14  ;;  %v3626_v14 = vand.u32 4294901760, %v3583_v56  ;;  %v8014_v49 = vsub.f32 %v3580_v22, %v3617_v1  ;;  %v3629_v42 = vand.u32 4294901760, %v3584_v61 }
 0x482   :  { %5578 = vmatpush3.bf16.msra.mxu1 %v5577_v34  ;;  %3044 = vmatprep.mubr.f32.mxu1 %v7825_v55  ;;  %v7992_v23 = vpack.c.bf16 %v3620_v52, %v3617_v1  ;;  %v3623_v34 = vand.u32 4294901760, %v3582_v17 }
 0x483   :  { %5580 = vmatprep.subr.bf16.mxu1 %v5579_v18  ;;  %v8016_v18 = vsub.f32 %v3581_v28, %v3620_v52  ;;  %v8571_v52 = vand.u32 4294901760, %v8010_v10 }
 0x484   :  { %5682 = vmatpush3.bf16.msra.mxu0 %v5681_v46  ;;  %v3579_v46 = vld [vmem:[%s8252_s6 + $0x48] sm:$0xff]  ;;  %v8002_v37 = vpack.c.bf16 %v3626_v14, %v3623_v34  ;;  %v8019_v57 = vsub.f32 %v3582_v17, %v3623_v34 }
 0x485   :  { %5684 = vmatprep.subr.bf16.mxu0 %v7739_v9  ;;  %v9008_v9 = vld [vmem:[#allocation39_spill] sm:$0xff]  ;;  %v3614_v35 = vand.u32 4294901760, %v3579_v46 }
 0x486   :  { %5582 = vmatpush3.bf16.msra.mxu1 %v5581_v53  ;;  %v8021_v53 = vsub.f32 %v3583_v56, %v3626_v14  ;;  %v3737_v14 = vsub.f32 %v8010_v10, %v8571_v52 }
 0x487   :  { %5584 = vmatprep.subr.bf16.mxu1 %v5583_v59  ;;  %v7982_v45 = vpack.c.bf16 %v3614_v35, %v3611_v32  ;;  %v8012_v54 = vsub.f32 %v3579_v46, %v3614_v35 }
 0x488   :  { %5686 = vmatpush3.bf16.msra.mxu0 %v7741_v3  ;;  %v9009_v3 = vld [vmem:[#allocation42_spill] sm:$0xff] }
 0x489   :  { %5688 = vmatprep.subr.bf16.mxu0 %v7748_v30  ;;  %v9010_v30 = vld [vmem:[#allocation44_spill] sm:$0xff]  ;;  %v8570_v17 = vand.u32 4294901760, %v8012_v54 }
 0x48a   :  { %5586 = vmatpush3.bf16.msra.mxu1 %v5585_v5 }
 0x48b   :  { %5588 = vmatprep.subr.bf16.mxu1 %v7760_v19  ;;  %v9012_v19 = vld [vmem:[#allocation50_spill] sm:$0xff] }
 0x48c   :  { %5690 = vmatpush3.bf16.msra.mxu0 %v7752_v6  ;;  %v9011_v6 = vld [vmem:[#allocation47_spill] sm:$0xff] }
 0x48d   :  { %5692 = vmatprep.subr.bf16.mxu0 %v7762_v2  ;;  %v9013_v2 = vld [vmem:[#allocation60_spill] sm:$0xff] }
 0x48e   :  { %5590 = vmatpush3.bf16.msra.mxu1 %v7766_v51  ;;  %v9014_v51 = vand.u32 4294901760, %v7829_v60 }
 0x48f   :  { %5592 = vmatprep.subr.bf16.mxu1 %v7776_v31 }
 0x490   :  { %5694 = vmatpush3.bf16.msra.mxu0 %v7768_v26 }
 0x491   :  { %5696 = vmatprep.subr.bf16.mxu0 %v7778_v58 }
 0x492   :  { %5594 = vmatpush3.bf16.msra.mxu1 %v7782_v24  ;;  %v3576_v24 = vld [vmem:[%s8252_s6 + $0x30] sm:$0xff] }
 0x493   :  { %5596 = vmatprep.subr.bf16.mxu1 %v7792_v11 }
 0x494   :  { %5698 = vmatpush3.bf16.msra.mxu0 %v7784_v27  ;;  %v3577_v27 = vld [vmem:[%s8252_s6 + $0x38] sm:$0xff] }
 0x495   :  { %5700 = vmatprep.subr.bf16.mxu0 %v7794_v39 }
 0x496   :  { %5598 = vmatpush3.bf16.msra.mxu1 %v7798_v47 }
 0x497   :  { %5600 = vmatprep.subr.bf16.mxu1 %v7807_v13 }
 0x498   :  { %5702 = vmatpush3.bf16.msra.mxu0 %v7800_v21 }
 0x49a   :  { %5602 = vmatpush3.bf16.msra.mxu1 %v7809_v0 }
 0x49b   :  { %3460 = vmatmul.mubr.f32.vlgmr.msra.gmra.mrb[4].mxu0 %v7823_v29  ;;  %5604 = vmatprep.subr.bf16.mxu1 %v7811_v63 }
 0x49e   :  { %5606 = vmatpush3.bf16.msra.mxu1 %v7813_v15 }
 0x49f   :  { %5640 = vmatprep.subr.bf16.mxu1 %v7450_v20 }
 0x4a1   :  { %3046 = vmatmul.mubr.f32.vlgmr.msra.gmra.mrb[6].mxu1 %v7823_v29 }
 0x4a2   :  { %5642 = vmatpush3.bf16.msra.mxu1 %v7452_v4  ;;  %3288 = vmatprep.mubr.f32.mxu1 %v9007_v33  ;;  %v8026_v33 = vpack.c.bf16 %v3632_v7, %v3629_v42 }
 0x4a3   :  { %5644 = vmatprep.subr.bf16.mxu1 %v7467_v43 }
 0x4a6   :  { %5646 = vmatpush3.bf16.msra.mxu1 %v7580_v48 }
 0x4a7   :  { %5648 = vmatprep.subr.bf16.mxu1 %v7607_v36 }
 0x4aa   :  { %5650 = vmatpush3.bf16.msra.mxu1 %v7617_v25 }
 0x4ab   :  { %5652 = vmatprep.subr.bf16.mxu1 %v7641_v16 }
 0x4ae   :  { %5654 = vmatpush3.bf16.msra.mxu1 %v7643_v40 }
 0x4af   :  { %5656 = vmatprep.subr.bf16.mxu1 %v7658_v8 }
 0x4b2   :  { %5658 = vmatpush3.bf16.msra.mxu1 %v7683_v38 }
 0x4b3   :  { %5660 = vmatprep.subr.bf16.mxu1 %v9008_v9 }
 0x4b6   :  { %5662 = vmatpush3.bf16.msra.mxu1 %v9009_v3 }
 0x4b7   :  { %5664 = vmatprep.subr.bf16.mxu1 %v9010_v30 }
 0x4ba   :  { %5666 = vmatpush3.bf16.msra.mxu1 %v9011_v6 }
 0x4bb   :  { %5668 = vmatprep.subr.bf16.mxu1 %v9012_v19 }
 0x4be   :  { %5670 = vmatpush3.bf16.msra.mxu1 %v9013_v2 }
 0x4bf   :  { %5704 = vmatprep.subr.bf16.mxu1 %v7450_v20  ;;  %v3570_v20 = vld [vmem:[%s8252_s6] sm:$0xff] }
 0x4c1   :  { %3292 = vmatmul.mubr.f32.vlgmr.msra.gmra.mrb[8].mxu1 %v9014_v51 }
 0x4c2   :  { %5706 = vmatpush3.bf16.msra.mxu1 %v7452_v4  ;;  %3562 = vmatprep.mubr.f32.mxu1 %v7825_v55  ;;  %v5921_v4 = vmov 0.0|0.0   ;;  %v3608_v55 = vand.u32 4294901760, %v3577_v27 }
 0x4c3   :  { %5708 = vmatprep.subr.bf16.mxu1 %v7467_v43  ;;  %5735 = vmatprep.subr.bf16.mxu0 %v5921_v4  ;;  %v3571_v43 = vld [vmem:[%s8252_s6 + $0x8] sm:$0xff] }
 0x4c4   :  { %v7964_v50 = vsub.f32 %v3577_v27, %v3608_v55 }
 0x4c6   :  { %5710 = vmatpush3.bf16.msra.mxu1 %v7580_v48  ;;  %v3572_v48 = vld [vmem:[%s8252_s6 + $0x10] sm:$0xff] }
 0x4c7   :  { %5712 = vmatprep.subr.bf16.mxu1 %v7607_v36  ;;  %v3587_v36 = vand.u32 4294901760, %v3570_v20 }
 0x4c9   :  { %v7946_v39 = vsub.f32 %v3570_v20, %v3587_v36 }
 0x4ca   :  { %5714 = vmatpush3.bf16.msra.mxu1 %v7617_v25  ;;  %v3590_v25 = vand.u32 4294901760, %v3571_v43 }
 0x4cb   :  { %5716 = vmatprep.subr.bf16.mxu1 %v7641_v16  ;;  %v3573_v16 = vld [vmem:[%s8252_s6 + $0x18] sm:$0xff]  ;;  %v3680_v59 = vand.u32 4294901760, %v7946_v39 }
 0x4cc   :  { %v3596_v26 = vand.u32 4294901760, %v3573_v16  ;;  %v7944_v11 = vpack.c.bf16 %v3590_v25, %v3587_v36  ;;  %v7948_v47 = vsub.f32 %v3571_v43, %v3590_v25 }
 0x4ce   :  { %5718 = vmatpush3.bf16.msra.mxu1 %v7643_v40  ;;  %v3593_v40 = vand.u32 4294901760, %v3572_v48  ;;  %v7952_v13 = vsub.f32 %v3573_v16, %v3596_v26  ;;  %5737 = vmatpush3.bf16.msra.mxu0 %v7944_v11  ;;  %v3687_v5 = vand.u32 4294901760, %v7948_v47 }
 0x4cf   :  { %5720 = vmatprep.subr.bf16.mxu1 %v7658_v8  ;;  %v3574_v8 = vld [vmem:[%s8252_s6 + $0x20] sm:$0xff]  ;;  %5738 = vmatprep.subr.bf16.mxu0 %v5921_v4 }
 0x4d0   :  { %v3599_v31 = vand.u32 4294901760, %v3574_v8  ;;  %v7950_v21 = vsub.f32 %v3572_v48, %v3593_v40  ;;  %v7957_v63 = vpack.c.bf16 %v3596_v26, %v3593_v40  ;;  %v3701_v51 = vand.u32 4294901760, %v7952_v13 }
 0x4d2   :  { %5722 = vmatpush3.bf16.msra.mxu1 %v7683_v38  ;;  %v3575_v38 = vld [vmem:[%s8252_s6 + $0x28] sm:$0xff]  ;;  %v7954_v0 = vsub.f32 %v3574_v8, %v3599_v31  ;;  %5740 = vmatpush3.bf16.msra.mxu0 %v7957_v63  ;;  %v3702_v36 = vsub.f32 %v7952_v13, %v3701_v51 }
 0x4d3   :  { %5724 = vmatprep.subr.bf16.mxu1 %v9008_v9  ;;  %v3602_v58 = vand.u32 4294901760, %v3575_v38  ;;  %5741 = vmatprep.subr.bf16.mxu0 %v5921_v4  ;;  %v8028_v9 = vsub.f32 %v3584_v61, %v3629_v42  ;;  %v3744_v61 = vsub.f32 %v8012_v54, %v8570_v17 }
 0x4d4   :  { %v3703_v40 = vand.u32 4294901760, %v3702_v36  ;;  %v3708_v8 = vand.u32 4294901760, %v7954_v0 }
 0x4d5   :  { %v7959_v15 = vsub.f32 %v3575_v38, %v3602_v58  ;;  %v7967_v44 = vpack.c.bf16 %v3602_v58, %v3599_v31  ;;  %v3745_v42 = vand.u32 4294901760, %v3744_v61 }
 0x4d6   :  { %5726 = vmatpush3.bf16.msra.mxu1 %v9009_v3  ;;  %v8030_v3 = vsub.f32 %v3585_v12, %v3632_v7  ;;  %v3709_v31 = vsub.f32 %v7954_v0, %v3708_v8  ;;  %v3738_v12 = vand.u32 4294901760, %v3737_v14  ;;  %v8569_v7 = vand.u32 4294901760, %v8014_v49 }
 0x4d7   :  { %5728 = vmatprep.subr.bf16.mxu1 %v9010_v30  ;;  %5743 = vmatpush3.bf16.msra.mxu0 %v7967_v44  ;;  %v5923_v30 = vmov 0.0   ;;  %v8574_v38 = vand.u32 4294901760, %v7959_v15 }
 0x4d8   :  { %5744 = vmatprep.subr.bf16.mxu0 %v5921_v4  ;;  %4597 = vmatprep.mubr.msk.f32.mxu0 %vm5922_vm0, %v5923_v30 }
 0x4d9   :  { %v3716_v58 = vsub.f32 %v7959_v15, %v8574_v38 }
 0x4da   :  { %5730 = vmatpush3.bf16.msra.mxu1 %v9011_v6  ;;  %v3681_v6 = vsub.f32 %v7946_v39, %v3680_v59 }
 0x4db   :  { %5732 = vmatprep.subr.bf16.mxu1 %v9012_v19  ;;  %v3688_v19 = vsub.f32 %v7948_v47, %v3687_v5  ;;  %v3717_v27 = vand.u32 4294901760, %v3716_v58  ;;  %v8567_v58 = vand.u32 4294901760, %v8019_v57 }
 0x4dc   :  { %v3682_v20 = vand.u32 4294901760, %v3681_v6  ;;  %v8568_v6 = vand.u32 4294901760, %v8016_v18 }
 0x4dd   :  { %v3689_v43 = vand.u32 4294901760, %v3688_v19 }
 0x4de   :  { %5734 = vmatpush3.bf16.msra.mxu1 %v9013_v2  ;;  %v3694_v2 = vand.u32 4294901760, %v7950_v21  ;;  %v3758_v36 = vsub.f32 %v8016_v18, %v8568_v6 }
 0x4df   :  { %v8050_v25 = vpack.c.bf16 %v3689_v43, %v3682_v20  ;;  %v8084_v43 = vpack.c.bf16 %v3745_v42, %v3738_v12 }
 0x4e0   :  { %v3695_v48 = vsub.f32 %v7950_v21, %v3694_v2 }
 0x4e1   :  { %3564 = vmatmul.mubr.f32.vlgmr.msra.gmra.mrb[10].mxu1 %v7823_v29  ;;  %v3605_v29 = vand.u32 4294901760, %v3576_v24 }
 0x4e2   :  { %v3696_v16 = vand.u32 4294901760, %v3695_v48  ;;  %v3751_v48 = vsub.f32 %v8014_v49, %v8569_v7 }
 0x4e3   :  { %v7962_v60 = vsub.f32 %v3576_v24, %v3605_v29  ;;  %v7971_v41 = vpack.c.bf16 %v3608_v55, %v3605_v29  ;;  %v3710_v24 = vand.u32 4294901760, %v3709_v31  ;;  %v8572_v55 = vand.u32 4294901760, %v7964_v50 }
 0x4e4   :  { %v8054_v26 = vpack.c.bf16 %v3703_v40, %v3696_v16  ;;  %v3752_v40 = vand.u32 4294901760, %v3751_v48  ;;  %v3759_v31 = vand.u32 4294901760, %v3758_v36  ;;  %v5784_v48 = vpack.c.bf16 %v7948_v47, %v7946_v39 }
 0x4e5   :  { %5746 = vmatpush3.bf16.msra.mxu0 %v7971_v41  ;;  %v8573_v29 = vand.u32 4294901760, %v7962_v60  ;;  %v8064_v62 = vpack.c.bf16 %v3717_v27, %v3710_v24  ;;  %v3730_v32 = vsub.f32 %v7964_v50, %v8572_v55  ;;  %v8566_v24 = vand.u32 4294901760, %v8021_v53 }
 0x4e6   :  { %5747 = vmatprep.subr.bf16.mxu0 %v5921_v4  ;;  %v5775_v27 = vpack.c.bf16 %v3759_v31, %v3752_v40  ;;  %v5787_v36 = vpack.c.bf16 %v7952_v13, %v7950_v21  ;;  %v5790_v40 = vpack.c.bf16 %v7959_v15, %v7954_v0  ;;  %v9015_v39 = vand.u32 4294901760, %v7959_v15 }
 0x4e7   :  { %v3723_v46 = vsub.f32 %v7962_v60, %v8573_v29  ;;  %v3731_v1 = vand.u32 4294901760, %v3730_v32  ;;  %v3772_v32 = vsub.f32 %v8021_v53, %v8566_v24  ;;  %v5799_v24 = vpack.c.bf16 %v8016_v18, %v8014_v49 }
 0x4e8   :  { %v5838_v47 = vpack.c.bf16 %v9015_v39, %v3708_v8  ;;  %v9017_v21 = vand.u32 4294901760, %v7964_v50  ;;  %v9020_v0 = vand.u32 4294901760, %v8014_v49  ;;  %v9021_v15 = vand.u32 4294901760, %v8016_v18 }
 0x4e9   :  { %5749 = vmatpush3.bf16.msra.mxu0 %v7982_v45  ;;  %v3724_v28 = vand.u32 4294901760, %v3723_v46  ;;  %v3765_v46 = vsub.f32 %v8019_v57, %v8567_v58 }
 0x4ea   :  { %5750 = vmatprep.subr.bf16.mxu0 %v5921_v4  ;;  %v5847_v8 = vpack.c.bf16 %v9021_v15, %v9020_v0 }
 0x4eb   :  { %v8074_v34 = vpack.c.bf16 %v3731_v1, %v3724_v28  ;;  %v8565_v28 = vand.u32 4294901760, %v8028_v9  ;;  %v8564_v1 = vand.u32 4294901760, %v8030_v3 }
 0x4ed   :  { %5752 = vmatpush3.bf16.msra.mxu0 %v7992_v23  ;;  %v3779_v61 = vsub.f32 %v8028_v9, %v8565_v28  ;;  %v3786_v12 = vsub.f32 %v8030_v3, %v8564_v1 }
 0x4ee   :  { %5753 = vmatprep.subr.bf16.mxu0 %v5921_v4 }
 0x4ef   :  { %v3780_v42 = vand.u32 4294901760, %v3779_v61 }
 0x4f1   :  { %5755 = vmatpush3.bf16.msra.mxu0 %v8002_v37 }
 0x4f2   :  { %5756 = vmatprep.subr.bf16.mxu0 %v5921_v4 }
 0x4f5   :  { %5758 = vmatpush3.bf16.msra.mxu0 %v8026_v33 }
 0x4f6   :  { %5759 = vmatprep.subr.bf16.mxu0 %v5921_v4 }
 0x54e   :  { %v4355_v35 = vpop.f32.mrb[2].mxu0 }
 0x54f   :  { %v4356_v22 = vpop.f32.mrb[3].mxu0 }
 0x550   :  { %v4357_v56 = vadd.f32 %v4356_v22, %v4355_v35  ;;  %v3766_v35 = vand.u32 4294901760, %v3765_v46  ;;  %v3773_v22 = vand.u32 4294901760, %v3772_v32 }
 0x552   :  { %v5778_v14 = vpack.c.bf16 %v3773_v22, %v3766_v35  ;;  %v5793_v35 = vpack.c.bf16 %v7964_v50, %v7962_v60  ;;  %v4250_v22 = vld [vmem:[%s8253_s2] ss:$0 sm:$0xff]  ;;  %v9023_v50 = vand.u32 4294901760, %v8021_v53 }
 0x554   :  { %v4285_v19 = vpop.f32.mrb[4].mxu1 }
 0x555   :  { %v4286_v20 = vpop.f32.mrb[5].mxu1 }
 0x556   :  { %v4287_v16 = vadd.f32 %v4286_v20, %v4285_v19  ;;  %v3787_v19 = vand.u32 4294901760, %v3786_v12  ;;  %v5796_v12 = vpack.c.bf16 %v8012_v54, %v8010_v10 }
 0x558   :  { %v5781_v20 = vpack.c.bf16 %v3787_v19, %v3780_v42  ;;  %v2816_v19 = vadd.f32 %v4287_v16, %v4250_v22 }
 0x56e   :  { %v4425_v31 = vpop.f32.mrb[4].mxu0 }
 0x56f   :  { %v4426_v46 = vpop.f32.mrb[5].mxu0 }
 0x570   :  { %v4427_v32 = vadd.f32 %v4426_v46, %v4425_v31  ;;  %v5802_v31 = vpack.c.bf16 %v8021_v53, %v8019_v57  ;;  %v5805_v46 = vpack.c.bf16 %v8030_v3, %v8028_v9 }
 0x574   :  { %v4320_v61 = vpop.f32.mrb[6].mxu1 }
 0x575   :  { %v4321_v42 = vpop.f32.mrb[7].mxu1 }
 0x576   :  { %v4322_v1 = vadd.f32 %v4321_v42, %v4320_v61 }
 0x578   :  { %v3048_v28 = vadd.f32 %v4322_v1, %v2816_v19 }
 0x57a   :  { %v3186_v58 = vadd.f32 %v4357_v56, %v3048_v28 }
 0x594   :  { %v4390_v6 = vpop.f32.mrb[8].mxu1 }
 0x595   :  { %v4391_v7 = vpop.f32.mrb[9].mxu1 }
 0x596   :  { %v4392_v17 = vadd.f32 %v4391_v7, %v4390_v6 }
 0x598   :  { %v3294_v52 = vadd.f32 %v4392_v17, %v3186_v58 }
 0x59a   :  { %v3462_v55 = vadd.f32 %v4427_v32, %v3294_v52 }
 0x5b4   :  { %v4460_v29 = vpop.f32.mrb[10].mxu1 }
 0x5b5   :  { %v4461_v38 = vpop.f32.mrb[11].mxu1 }
 0x5b6   :  { %v4462_v16 = vadd.f32 %v4461_v38, %v4460_v29  ;;  %v5835_v38 = vpack.c.bf16 %v3701_v51, %v3694_v2  ;;  %v9019_v2 = vand.u32 4294901760, %v8012_v54  ;;  %v9025_v54 = vand.u32 4294901760, %v8030_v3 }
 0x5b8   :  { %v8127_v22 = vadd.f32 %v4462_v16, %v3462_v55 }
 0x5ba   :  { %v3569_v1 = vmul.f32 %v8127_v22, %v8127_v22 }
 0x5bc   :  { %v8131_v56 = vand.u32 4294901760, %v3569_v1 }
 0x5be   :  { %v3668_v28 = vsub.f32 %v3569_v1, %v8131_v56 }
 0x5c0   :  { %v3669_v61 = vand.u32 4294901760, %v3668_v28 }
 0x5c2   :  { %v3670_v42 = vsub.f32 %v3668_v28, %v3669_v61 }
 0x5c4   :  { %v3671_v19 = vand.u32 4294901760, %v3670_v42 }
 0x5c6   :  { %4598 = vmatmul.mubr.f32.vlgmr.msra.gmra.mrb[6].mxu0 %v3671_v19 }
 0x5c7   :  { %5761 = vmatpush3.bf16.msra.mxu0 %v8050_v25  ;;  %4632 = vmatprep.mubr.msk.f32.mxu0 %vm5922_vm0, %v5923_v30  ;;  %v5832_v25 = vpack.c.bf16 %v3687_v5, %v3680_v59  ;;  %v9016_v59 = vand.u32 4294901760, %v7962_v60  ;;  %v9018_v5 = vand.u32 4294901760, %v8010_v10  ;;  %v9022_v60 = vand.u32 4294901760, %v8019_v57 }
 0x5c8   :  { %5762 = vmatprep.subr.bf16.mxu0 %v5921_v4  ;;  %v9024_v10 = vand.u32 4294901760, %v8028_v9 }
 0x5c9   :  { %v5841_v13 = vpack.c.bf16 %v9017_v21, %v9016_v59  ;;  %v5844_v51 = vpack.c.bf16 %v9019_v2, %v9018_v5 }
 0x5ca   :  { %v5853_v29 = vpack.c.bf16 %v9025_v54, %v9024_v10 }
 0x5cb   :  { %5764 = vmatpush3.bf16.msra.mxu0 %v8054_v26  ;;  %v5850_v26 = vpack.c.bf16 %v9023_v50, %v9022_v60 }
 0x5cc   :  { %5765 = vmatprep.subr.bf16.mxu0 %v5921_v4 }
 0x5cf   :  { %5767 = vmatpush3.bf16.msra.mxu0 %v8064_v62 }
 0x5d0   :  { %5768 = vmatprep.subr.bf16.mxu0 %v5921_v4 }
 0x5d3   :  { %5770 = vmatpush3.bf16.msra.mxu0 %v8074_v34 }
 0x5d4   :  { %5771 = vmatprep.subr.bf16.mxu0 %v5921_v4 }
 0x5d7   :  { %5773 = vmatpush3.bf16.msra.mxu0 %v8084_v43 }
 0x5d8   :  { %5774 = vmatprep.subr.bf16.mxu0 %v5921_v4 }
 0x5db   :  { %5776 = vmatpush3.bf16.msra.mxu0 %v5775_v27 }
 0x5dc   :  { %5777 = vmatprep.subr.bf16.mxu0 %v5921_v4 }
 0x5df   :  { %5779 = vmatpush3.bf16.msra.mxu0 %v5778_v14 }
 0x5e0   :  { %5780 = vmatprep.subr.bf16.mxu0 %v5921_v4 }
 0x5e3   :  { %5782 = vmatpush3.bf16.msra.mxu0 %v5781_v20 }
 0x5e4   :  { %5783 = vmatprep.subr.bf16.mxu0 %v5921_v4 }
 0x5e6   :  { %4633 = vmatmul.mubr.f32.vlgmr.msra.gmra.mrb[6].mxu0 %v8131_v56 }
 0x5e7   :  { %5785 = vmatpush3.bf16.msra.mxu0 %v5784_v48  ;;  %4667 = vmatprep.mubr.msk.f32.mxu0 %vm5922_vm0, %v5923_v30 }
 0x5e8   :  { %5786 = vmatprep.subr.bf16.mxu0 %v5921_v4 }
 0x5eb   :  { %5788 = vmatpush3.bf16.msra.mxu0 %v5787_v36 }
 0x5ec   :  { %5789 = vmatprep.subr.bf16.mxu0 %v5921_v4 }
 0x5ef   :  { %5791 = vmatpush3.bf16.msra.mxu0 %v5790_v40 }
 0x5f0   :  { %5792 = vmatprep.subr.bf16.mxu0 %v5921_v4 }
 0x5f3   :  { %5794 = vmatpush3.bf16.msra.mxu0 %v5793_v35 }
 0x5f4   :  { %5795 = vmatprep.subr.bf16.mxu0 %v5921_v4 }
 0x5f7   :  { %5797 = vmatpush3.bf16.msra.mxu0 %v5796_v12 }
 0x5f8   :  { %5798 = vmatprep.subr.bf16.mxu0 %v5921_v4 }
 0x5fb   :  { %5800 = vmatpush3.bf16.msra.mxu0 %v5799_v24 }
 0x5fc   :  { %5801 = vmatprep.subr.bf16.mxu0 %v5921_v4 }
 0x5ff   :  { %5803 = vmatpush3.bf16.msra.mxu0 %v5802_v31 }
 0x600   :  { %5804 = vmatprep.subr.bf16.mxu0 %v5921_v4 }
 0x603   :  { %5806 = vmatpush3.bf16.msra.mxu0 %v5805_v46 }
 0x604   :  { %5807 = vmatprep.subr.bf16.mxu0 %v5921_v4 }
 0x606   :  { %4668 = vmatmul.mubr.f32.vlgmr.msra.gmra.mrb[6].mxu0 %v3668_v28 }
 0x607   :  { %5809 = vmatpush3.bf16.msra.mxu0 %v7944_v11  ;;  %4702 = vmatprep.mubr.msk.f32.mxu0 %vm5922_vm0, %v5923_v30 }
 0x608   :  { %5810 = vmatprep.subr.bf16.mxu0 %v5921_v4 }
 0x60b   :  { %5812 = vmatpush3.bf16.msra.mxu0 %v7957_v63 }
 0x60c   :  { %5813 = vmatprep.subr.bf16.mxu0 %v5921_v4 }
 0x60f   :  { %5815 = vmatpush3.bf16.msra.mxu0 %v7967_v44 }
 0x610   :  { %5816 = vmatprep.subr.bf16.mxu0 %v5921_v4 }
 0x613   :  { %5818 = vmatpush3.bf16.msra.mxu0 %v7971_v41 }
 0x614   :  { %5819 = vmatprep.subr.bf16.mxu0 %v5921_v4 }
 0x617   :  { %5821 = vmatpush3.bf16.msra.mxu0 %v7982_v45 }
 0x618   :  { %5822 = vmatprep.subr.bf16.mxu0 %v5921_v4 }
 0x61b   :  { %5824 = vmatpush3.bf16.msra.mxu0 %v7992_v23 }
 0x61c   :  { %5825 = vmatprep.subr.bf16.mxu0 %v5921_v4 }
 0x61f   :  { %5827 = vmatpush3.bf16.msra.mxu0 %v8002_v37 }
 0x620   :  { %5828 = vmatprep.subr.bf16.mxu0 %v5921_v4 }
 0x623   :  { %5830 = vmatpush3.bf16.msra.mxu0 %v8026_v33 }
 0x624   :  { %5831 = vmatprep.subr.bf16.mxu0 %v5921_v4 }
 0x626   :  { %4703 = vmatmul.mubr.f32.vlgmr.msra.gmra.mrb[6].mxu0 %v3669_v61 }
 0x627   :  { %5833 = vmatpush3.bf16.msra.mxu0 %v5832_v25  ;;  %4737 = vmatprep.mubr.msk.f32.mxu0 %vm5922_vm0, %v5923_v30 }
 0x628   :  { %5834 = vmatprep.subr.bf16.mxu0 %v5921_v4 }
 0x62b   :  { %5836 = vmatpush3.bf16.msra.mxu0 %v5835_v38 }
 0x62c   :  { %5837 = vmatprep.subr.bf16.mxu0 %v5921_v4 }
 0x62f   :  { %5839 = vmatpush3.bf16.msra.mxu0 %v5838_v47 }
 0x630   :  { %5840 = vmatprep.subr.bf16.mxu0 %v5921_v4 }
 0x633   :  { %5842 = vmatpush3.bf16.msra.mxu0 %v5841_v13 }
 0x634   :  { %5843 = vmatprep.subr.bf16.mxu0 %v5921_v4 }
 0x637   :  { %5845 = vmatpush3.bf16.msra.mxu0 %v5844_v51 }
 0x638   :  { %5846 = vmatprep.subr.bf16.mxu0 %v5921_v4 }
 0x63b   :  { %5848 = vmatpush3.bf16.msra.mxu0 %v5847_v8 }
 0x63c   :  { %5849 = vmatprep.subr.bf16.mxu0 %v5921_v4 }
 0x63f   :  { %5851 = vmatpush3.bf16.msra.mxu0 %v5850_v26 }
 0x640   :  { %5852 = vmatprep.subr.bf16.mxu0 %v5921_v4 }
 0x643   :  { %5854 = vmatpush3.bf16.msra.mxu0 %v5853_v29 }
 0x644   :  { %5855 = vmatprep.subr.bf16.mxu0 %v5921_v4 }
 0x646   :  { %4738 = vmatmul.mubr.f32.vlgmr.msra.gmra.mrb[6].mxu0 %v8131_v56 }
 0x647   :  { %5857 = vmatpush3.bf16.msra.mxu0 %v7944_v11  ;;  %4772 = vmatprep.mubr.msk.f32.mxu0 %vm5922_vm0, %v5923_v30 }
 0x648   :  { %5858 = vmatprep.subr.bf16.mxu0 %v5921_v4 }
 0x64b   :  { %5860 = vmatpush3.bf16.msra.mxu0 %v7957_v63 }
 0x64c   :  { %5861 = vmatprep.subr.bf16.mxu0 %v5921_v4 }
 0x64f   :  { %5863 = vmatpush3.bf16.msra.mxu0 %v7967_v44 }
 0x650   :  { %5864 = vmatprep.subr.bf16.mxu0 %v5921_v4 }
 0x653   :  { %5866 = vmatpush3.bf16.msra.mxu0 %v7971_v41 }
 0x654   :  { %5867 = vmatprep.subr.bf16.mxu0 %v5921_v4 }
 0x657   :  { %5869 = vmatpush3.bf16.msra.mxu0 %v7982_v45  ;;  %v4251_v45 = vld [vmem:[%s8254_s3] ss:$0 sm:$0xff] }
 0x658   :  { %5870 = vmatprep.subr.bf16.mxu0 %v5921_v4 }
 0x65b   :  { %5872 = vmatpush3.bf16.msra.mxu0 %v7992_v23 }
 0x65c   :  { %5873 = vmatprep.subr.bf16.mxu0 %v5921_v4 }
 0x65f   :  { %5875 = vmatpush3.bf16.msra.mxu0 %v8002_v37  ;;  %v4252_v37 = vld [vmem:[%s8255_s4] ss:$0 sm:$0xff] }
 0x660   :  { %5876 = vmatprep.subr.bf16.mxu0 %v5921_v4 }
 0x663   :  { %5878 = vmatpush3.bf16.msra.mxu0 %v8026_v33 }
 0x666   :  { %4773 = vmatmul.mubr.f32.vlgmr.msra.gmra.mrb[6].mxu0 %v8131_v56 }
 0x739   :  { %v4223_v11 = vpop.f32.mrb[6].mxu0 }
 0x73a   :  { %v5883_v63 = vadd.f32 1e-05, %v4223_v11  ;;  %v4774_v44 = vpop.f32.mrb[7].mxu0 }
 0x73c   :  { %5919 = vrsqrt.f32 %v5883_v63 }
 0x746   :  { %v5920_v41 = vpop.eup %5919 }
 0x747   :  { %v4228_v23 = vmul.f32 %v5920_v41, %v8127_v22 }
 0x749   :  { %v4236_v4 = vmul.f32 %v4251_v45, %v4228_v23 }
 0x74b   :  { %v4244_v49 = vadd.f32 %v4252_v37, %v4236_v4 }
 0x74d   :  { %4245 = vst [vmem:[%s8256_s7] sm:$0xff] %v4244_v49 }

</bundles_post_ra>
